<compile_context>
chip_gen: v5e
topology: v5e:2x2
jax: 0.10.0
libtpu: 0.0.40
codegen_flags: <defaults>
</compile_context>

<pallas_src>
import functools

import jax
import jax.numpy as jnp
from jax import lax
from jax.experimental import pallas as pl
from jax.experimental.pallas import tpu as pltpu

EPS = 1e-5
NEG_SLOPE = 0.1
LANE = 128


def _leaky(x):
    return jnp.where(x > 0, x, NEG_SLOPE * x)


def _round_up(n, m):
    return (n + m - 1) // m * m


def bottleneck_kernel(x_ref, w1_ref, w2_ref, w3_ref,
                      b1_ref, b2_ref, b3_ref,
                      o_ref, pad_ref, *, H, W):
    B = x_ref.shape[0]
    HW = H * W
    Cio = x_ref.shape[2]
    Pp = w1_ref.shape[1]
    Wp = pad_ref.shape[2]            # sublane-padded width (>= W + 2)

    x32 = x_ref[...].reshape(B * HW, Cio).astype(jnp.float32)

    # ---- conv1 (1x1): BN1 scale pre-folded into w1 (bf16); bias + LeakyReLU.
    h1 = jnp.dot(x32.astype(jnp.bfloat16), w1_ref[...],
                 preferred_element_type=jnp.float32)
    h1 = _leaky(h1 + b1_ref[...])

    # Re-zero only the 1-pixel halo border every step (4 thin stores).  Keep
    # this per-step: scratch is per-core under megacore sharding and persists
    # across grid iterations.
    pad_ref[:, 0:1, :, :] = jnp.zeros((B, 1, Wp, Pp), jnp.float32)
    pad_ref[:, H + 1:H + 2, :, :] = jnp.zeros((B, 1, Wp, Pp), jnp.float32)
    pad_ref[:, 1:H + 1, 0:1, :] = jnp.zeros((B, H, 1, Pp), jnp.float32)
    pad_ref[:, 1:H + 1, W + 1:W + 2, :] = jnp.zeros((B, H, 1, Pp), jnp.float32)
    # conv1 output goes straight into the scratch interior (no extra temp).
    pad_ref[:, 1:H + 1, 1:W + 1, :] = h1.reshape(B, H, W, Pp)

    # ---- conv2 (3x3, stride 1, pad 1): 9 tap-accumulated matmuls (no im2col
    # patches buffer).  Accumulate in f32, operands in bf16.
    taps = [(ky, kx) for ky in range(3) for kx in range(3)]
    acc = jnp.zeros((B * HW, Pp), jnp.float32)
    for t, (ky, kx) in enumerate(taps):
        tap = pad_ref[:, ky:ky + H, kx:kx + W, :].reshape(B * HW, Pp)
        acc = acc + jnp.dot(tap.astype(jnp.bfloat16),
                            w2_ref[t * Pp:(t + 1) * Pp, :],
                            preferred_element_type=jnp.float32)
    h2 = _leaky(acc + b2_ref[...])

    # ---- conv3 (1x1) + bias + residual + LeakyReLU.
    h3 = jnp.dot(h2.astype(jnp.bfloat16), w3_ref[...],
                 preferred_element_type=jnp.float32)
    h3 = h3 + b3_ref[...] + x32
    o_ref[...] = _leaky(h3).reshape(B, HW, Cio).astype(o_ref.dtype)


def fold_bn(gamma, beta, mean, var):
    scale = gamma / jnp.sqrt(var + EPS)
    bias = beta - mean * scale
    return scale, bias


def bottleneck_forward(x, w1, w2, w3, bn1, bn2, bn3):
    """x: (N, H, W, Cin) NHWC.  w1:(Cin,P)  w2:(3,3,P,P) HWIO  w3:(P,4P)."""
    N, H, W, Cin = x.shape
    P = w1.shape[1]
    Cout = w3.shape[1]
    assert Cout == Cin, "residual add requires inplanes == planes * expansion"

    HW = H * W
    Pp = _round_up(P, LANE)              # internal bottleneck width, lane-padded
    Wp = _round_up(W + 2, 8)             # halo scratch width, sublane-padded
    f32, bf16 = jnp.float32, jnp.bfloat16

    s1, b1 = fold_bn(*bn1)
    s2, b2 = fold_bn(*bn2)
    s3, b3 = fold_bn(*bn3)

    # Fold BN scales into the conv weights (output-channel axis); lane-pad only
    # the internal width P; cast weights to bf16 for MXU-native matmuls.
    w1p = jnp.zeros((Cin, Pp), f32).at[:, :P].set(w1 * s1).astype(bf16)
    w2p = jnp.zeros((3, 3, Pp, Pp), f32).at[:, :, :P, :P].set(w2 * s2)
    w2p = w2p.reshape(9 * Pp, Pp).astype(bf16)       # tap-major weight layout
    w3p = jnp.zeros((Pp, Cout), f32).at[:P, :].set(w3 * s3).astype(bf16)
    b1p = jnp.zeros((1, Pp), f32).at[0, :P].set(b1)
    b2p = jnp.zeros((1, Pp), f32).at[0, :P].set(b2)
    b3p = b3.reshape(1, Cout).astype(f32)

    # No IO channel padding at the HBM boundary: reshape only (free).
    xr = x.reshape(N, HW, Cin)

    # ---- VMEM budget -> images per grid step (b_blk), generation aware. ----
    try:
        info = pltpu.get_tpu_info()
        phys_vmem = int(getattr(info, "vmem_capacity_bytes", 64 << 20))
    except Exception:  # pragma: no cover - fallback when query unavailable
        phys_vmem = 64 << 20
    vmem_limit = min(phys_vmem * 3 // 4, 100 << 20)   # ~48 MiB v7x, ~96 MiB v5e/v6e
    budget = int(vmem_limit * 0.85)

    wbytes = 2 * 2 * (Cin * Pp + 9 * Pp * Pp + Pp * Cout)   # bf16 weights, 2-buf
    wbytes += 2 * 4 * (2 * Pp + Cout)                       # f32 biases, 2-buf

    def est_vmem(b):
        m = b * HW
        io = 2 * 2 * m * Cin * 4                 # in + out blocks, double-buffered
        scratch = b * (H + 2) * Wp * Pp * 4      # halo scratch (f32)
        tmp = m * Pp * 4 * 2 + m * Pp * 2 + m * Cin * 4 * 2   # acc / bf16 / x temps
        return io + scratch + wbytes + tmp

    min_steps = 2 if N >= 2 else 1               # keep both v7x TensorCores busy
    b_blk = 1
    for cand in range(N, 0, -1):
        if N % cand == 0 and N // cand >= min_steps and est_vmem(cand) <= budget:
            b_blk = cand
            break
    grid = (N // b_blk,)

    def full_spec(shape):
        return pl.BlockSpec(shape, lambda n, _s=shape: (0,) * len(_s))

    kernel = functools.partial(bottleneck_kernel, H=H, W=W)
    out = pl.pallas_call(
        kernel,
        out_shape=jax.ShapeDtypeStruct((N, HW, Cout), x.dtype),
        grid=grid,
        in_specs=[
            pl.BlockSpec((b_blk, HW, Cin), lambda n: (n, 0, 0)),
            full_spec((Cin, Pp)),
            full_spec((9 * Pp, Pp)),
            full_spec((Pp, Cout)),
            full_spec((1, Pp)), full_spec((1, Pp)), full_spec((1, Cout)),
        ],
        out_specs=pl.BlockSpec((b_blk, HW, Cout), lambda n: (n, 0, 0)),
        scratch_shapes=[pltpu.VMEM((b_blk, H + 2, Wp, Pp), jnp.float32)],
        compiler_params=pltpu.CompilerParams(
            dimension_semantics=("parallel",),
            vmem_limit_bytes=int(vmem_limit)),
    )(xr, w1p, w2p, w3p, b1p, b2p, b3p)

    return out.reshape(N, H, W, Cout)


def reference_forward(x, w1, w2, w3, bn1, bn2, bn3):
    """Plain-JAX reference (NHWC convolutions, full f32 precision)."""
    dn = lax.conv_dimension_numbers(x.shape, (1, 1, 1, 1),
                                    ("NHWC", "HWIO", "NHWC"))

    def bn(y, p):
        g, b, m, v = p
        return (y - m) / jnp.sqrt(v + EPS) * g + b

    hp = lax.Precision.HIGHEST
    h = lax.conv_general_dilated(x, w1.reshape(1, 1, *w1.shape), (1, 1),
                                 "VALID", dimension_numbers=dn, precision=hp)
    h = _leaky(bn(h, bn1))
    h = lax.conv_general_dilated(h, w2, (1, 1), "SAME",
                                 dimension_numbers=dn, precision=hp)
    h = _leaky(bn(h, bn2))
    h = lax.conv_general_dilated(h, w3.reshape(1, 1, *w3.shape), (1, 1),
                                 "VALID", dimension_numbers=dn, precision=hp)
    h = bn(h, bn3) + x
    return _leaky(h)


if __name__ == "__main__":
    # Bottleneck(inplanes=16, planes=4) -> out channels = planes*4 = 16.
    N, H, W = 2, 16, 16
    inplanes, planes = 16, 4
    cout = planes * 4

    key = jax.random.PRNGKey(0)
    keys = jax.random.split(key, 16)

    x = jax.random.normal(keys[0], (N, H, W, inplanes), dtype=jnp.float32)

    # Conv weights (no bias): w1 (Cin,P), w2 (3,3,P,P) HWIO, w3 (P,4P).
    w1 = 0.1 * jax.random.normal(keys[1], (inplanes, planes), jnp.float32)
    w2 = 0.1 * jax.random.normal(keys[2], (3, 3, planes, planes), jnp.float32)
    w3 = 0.1 * jax.random.normal(keys[3], (planes, cout), jnp.float32)

    def make_bn(kg, kb, km, kv, c):
        gamma = 0.5 + jax.random.uniform(kg, (c,), jnp.float32)
        beta = 0.1 * jax.random.normal(kb, (c,), jnp.float32)
        mean = 0.1 * jax.random.normal(km, (c,), jnp.float32)
        var = 0.5 + jax.random.uniform(kv, (c,), jnp.float32)
        return gamma, beta, mean, var

    bn1 = make_bn(keys[4], keys[5], keys[6], keys[7], planes)
    bn2 = make_bn(keys[8], keys[9], keys[10], keys[11], planes)
    bn3 = make_bn(keys[12], keys[13], keys[14], keys[15], cout)

    out = bottleneck_forward(x, w1, w2, w3, bn1, bn2, bn3)
    out = jax.block_until_ready(out)

    ref = reference_forward(x, w1, w2, w3, bn1, bn2, bn3)
    ref = jax.block_until_ready(ref)

    assert out.shape == (N, H, W, cout), out.shape
    # bf16 MXU operands (f32 accumulation) vs an f32 HIGHEST reference:
    # loosened tolerance per the performance review.
    err = float(jnp.max(jnp.abs(out - ref)))
    assert err < 8e-2, err

    print("KERNEL_OK")
</pallas_src>

<mosaic_0001>
module attributes {stable_mosaic.version = 11 : i64} {
  func.func @bottleneck_kernel(%arg0: i32, %arg1: memref<1x256x16xf32, #tpu.memory_space<vmem>>, %arg2: memref<16x128xbf16, #tpu.memory_space<vmem>>, %arg3: memref<1152x128xbf16, #tpu.memory_space<vmem>>, %arg4: memref<128x16xbf16, #tpu.memory_space<vmem>>, %arg5: memref<1x128xf32, #tpu.memory_space<vmem>>, %arg6: memref<1x128xf32, #tpu.memory_space<vmem>>, %arg7: memref<1x16xf32, #tpu.memory_space<vmem>>, %arg8: memref<1x256x16xf32, #tpu.memory_space<vmem>>, %arg9: memref<1x18x24x128xf32, #tpu.memory_space<vmem>>) attributes {dimension_semantics = [#tpu.dimension_semantics<parallel>], iteration_bounds = array<i64: 2>, scalar_prefetch = 0 : i64, scratch_operands = 1 : i64, tpu.core_type = #tpu.core_type<tc>, window_params = [{transform_indices = @transform_0, window_bounds = array<i64: 1, 256, 16>}, {pipeline_mode = #tpu.pipeline_mode<synchronous>, transform_indices = @transform_1, window_bounds = array<i64: 16, 128>}, {pipeline_mode = #tpu.pipeline_mode<synchronous>, transform_indices = @transform_2, window_bounds = array<i64: 1152, 128>}, {pipeline_mode = #tpu.pipeline_mode<synchronous>, transform_indices = @transform_3, window_bounds = array<i64: 128, 16>}, {pipeline_mode = #tpu.pipeline_mode<synchronous>, transform_indices = @transform_4, window_bounds = array<i64: 1, 128>}, {pipeline_mode = #tpu.pipeline_mode<synchronous>, transform_indices = @transform_5, window_bounds = array<i64: 1, 128>}, {pipeline_mode = #tpu.pipeline_mode<synchronous>, transform_indices = @transform_6, window_bounds = array<i64: 1, 16>}, {transform_indices = @transform_7, window_bounds = array<i64: 1, 256, 16>}]} {
    %c0 = arith.constant 0 : index
    %c0_0 = arith.constant 0 : index
    %c0_1 = arith.constant 0 : index
    %0 = vector.load %arg1[%c0, %c0_0, %c0_1] : memref<1x256x16xf32, #tpu.memory_space<vmem>>, vector<1x256x16xf32>
    %1 = vector.shape_cast %0 : vector<1x256x16xf32> to vector<256x16xf32>
    %2 = arith.truncf %1 : vector<256x16xf32> to vector<256x16xbf16>
    %c0_2 = arith.constant 0 : index
    %c0_3 = arith.constant 0 : index
    %3 = vector.load %arg2[%c0_2, %c0_3] : memref<16x128xbf16, #tpu.memory_space<vmem>>, vector<16x128xbf16>
    %cst = arith.constant dense<0.000000e+00> : vector<256x128xf32>
    %4 = tpu.matmul %2, %3, %cst {dimension_numbers = #tpu.dot_dimension_numbers<[1], [0], [0], [1], [0, 0, 1, 1], [], []>} : vector<256x16xbf16>, vector<16x128xbf16>, vector<256x128xf32> -> vector<256x128xf32>
    %c0_4 = arith.constant 0 : index
    %c0_5 = arith.constant 0 : index
    %5 = vector.load %arg5[%c0_4, %c0_5] : memref<1x128xf32, #tpu.memory_space<vmem>>, vector<1x128xf32>
    %6 = vector.broadcast %5 : vector<1x128xf32> to vector<256x128xf32>
    %7 = arith.addf %4, %6 : vector<256x128xf32>
    %cst_6 = arith.constant 0.000000e+00 : f32
    %8 = vector.broadcast %cst_6 : f32 to vector<256x128xf32>
    %9 = arith.cmpf ogt, %7, %8 : vector<256x128xf32>
    %cst_7 = arith.constant 1.000000e-01 : f32
    %10 = vector.broadcast %cst_7 : f32 to vector<256x128xf32>
    %11 = arith.mulf %10, %7 : vector<256x128xf32>
    %12 = arith.select %9, %7, %11 : vector<256x128xi1>, vector<256x128xf32>
    %cst_8 = arith.constant 0.000000e+00 : f32
    %13 = vector.broadcast %cst_8 : f32 to vector<1x1x24x128xf32>
    %c0_9 = arith.constant 0 : index
    %c0_10 = arith.constant 0 : index
    %c0_11 = arith.constant 0 : index
    %c0_12 = arith.constant 0 : index
    %14 = vector.load %arg9[%c0_9, %c0_10, %c0_11, %c0_12] : memref<1x18x24x128xf32, #tpu.memory_space<vmem>>, vector<1x1x24x128xf32>
    tpu.vector_store %arg9[%c0_9, %c0_10, %c0_11, %c0_12], %13 {strides = array<i32>} : memref<1x18x24x128xf32, #tpu.memory_space<vmem>>, vector<1x1x24x128xf32>,
    %cst_13 = arith.constant 0.000000e+00 : f32
    %15 = vector.broadcast %cst_13 : f32 to vector<1x1x24x128xf32>
    %c0_14 = arith.constant 0 : index
    %c17 = arith.constant 17 : index
    %c0_15 = arith.constant 0 : index
    %c0_16 = arith.constant 0 : index
    %16 = vector.load %arg9[%c0_14, %c17, %c0_15, %c0_16] : memref<1x18x24x128xf32, #tpu.memory_space<vmem>>, vector<1x1x24x128xf32>
    tpu.vector_store %arg9[%c0_14, %c17, %c0_15, %c0_16], %15 {strides = array<i32>} : memref<1x18x24x128xf32, #tpu.memory_space<vmem>>, vector<1x1x24x128xf32>,
    %cst_17 = arith.constant 0.000000e+00 : f32
    %17 = vector.broadcast %cst_17 : f32 to vector<1x16x1x128xf32>
    %c0_18 = arith.constant 0 : index
    %c1 = arith.constant 1 : index
    %c0_19 = arith.constant 0 : index
    %c0_20 = arith.constant 0 : index
    %18 = vector.load %arg9[%c0_18, %c1, %c0_19, %c0_20] : memref<1x18x24x128xf32, #tpu.memory_space<vmem>>, vector<1x16x1x128xf32>
    tpu.vector_store %arg9[%c0_18, %c1, %c0_19, %c0_20], %17 {strides = array<i32>} : memref<1x18x24x128xf32, #tpu.memory_space<vmem>>, vector<1x16x1x128xf32>,
    %cst_21 = arith.constant 0.000000e+00 : f32
    %19 = vector.broadcast %cst_21 : f32 to vector<1x16x1x128xf32>
    %c0_22 = arith.constant 0 : index
    %c1_23 = arith.constant 1 : index
    %c17_24 = arith.constant 17 : index
    %c0_25 = arith.constant 0 : index
    %20 = vector.load %arg9[%c0_22, %c1_23, %c17_24, %c0_25] : memref<1x18x24x128xf32, #tpu.memory_space<vmem>>, vector<1x16x1x128xf32>
    tpu.vector_store %arg9[%c0_22, %c1_23, %c17_24, %c0_25], %19 {strides = array<i32>} : memref<1x18x24x128xf32, #tpu.memory_space<vmem>>, vector<1x16x1x128xf32>,
    %21 = vector.shape_cast %12 : vector<256x128xf32> to vector<1x16x16x128xf32>
    %c0_26 = arith.constant 0 : index
    %c1_27 = arith.constant 1 : index
    %c1_28 = arith.constant 1 : index
    %c0_29 = arith.constant 0 : index
    %22 = vector.load %arg9[%c0_26, %c1_27, %c1_28, %c0_29] : memref<1x18x24x128xf32, #tpu.memory_space<vmem>>, vector<1x16x16x128xf32>
    tpu.vector_store %arg9[%c0_26, %c1_27, %c1_28, %c0_29], %21 {strides = array<i32>} : memref<1x18x24x128xf32, #tpu.memory_space<vmem>>, vector<1x16x16x128xf32>,
    %cst_30 = arith.constant 0.000000e+00 : f32
    %23 = vector.broadcast %cst_30 : f32 to vector<256x128xf32>
    %c0_31 = arith.constant 0 : index
    %c0_32 = arith.constant 0 : index
    %c0_33 = arith.constant 0 : index
    %c0_34 = arith.constant 0 : index
    %24 = vector.load %arg9[%c0_31, %c0_32, %c0_33, %c0_34] : memref<1x18x24x128xf32, #tpu.memory_space<vmem>>, vector<1x16x16x128xf32>
    %25 = vector.shape_cast %24 : vector<1x16x16x128xf32> to vector<256x128xf32>
    %26 = arith.truncf %25 : vector<256x128xf32> to vector<256x128xbf16>
    %c0_35 = arith.constant 0 : index
    %c0_36 = arith.constant 0 : index
    %27 = vector.load %arg3[%c0_35, %c0_36] : memref<1152x128xbf16, #tpu.memory_space<vmem>>, vector<128x128xbf16>
    %cst_37 = arith.constant dense<0.000000e+00> : vector<256x128xf32>
    %28 = tpu.matmul %26, %27, %cst_37 {dimension_numbers = #tpu.dot_dimension_numbers<[1], [0], [0], [1], [0, 0, 1, 1], [], []>} : vector<256x128xbf16>, vector<128x128xbf16>, vector<256x128xf32> -> vector<256x128xf32>
    %29 = arith.addf %23, %28 : vector<256x128xf32>
    %c0_38 = arith.constant 0 : index
    %c0_39 = arith.constant 0 : index
    %c1_40 = arith.constant 1 : index
    %c0_41 = arith.constant 0 : index
    %30 = vector.load %arg9[%c0_38, %c0_39, %c1_40, %c0_41] : memref<1x18x24x128xf32, #tpu.memory_space<vmem>>, vector<1x16x16x128xf32>
    %31 = vector.shape_cast %30 : vector<1x16x16x128xf32> to vector<256x128xf32>
    %32 = arith.truncf %31 : vector<256x128xf32> to vector<256x128xbf16>
    %c128 = arith.constant 128 : index
    %c0_42 = arith.constant 0 : index
    %33 = vector.load %arg3[%c128, %c0_42] : memref<1152x128xbf16, #tpu.memory_space<vmem>>, vector<128x128xbf16>
    %cst_43 = arith.constant dense<0.000000e+00> : vector<256x128xf32>
    %34 = tpu.matmul %32, %33, %cst_43 {dimension_numbers = #tpu.dot_dimension_numbers<[1], [0], [0], [1], [0, 0, 1, 1], [], []>} : vector<256x128xbf16>, vector<128x128xbf16>, vector<256x128xf32> -> vector<256x128xf32>
    %35 = arith.addf %29, %34 : vector<256x128xf32>
    %c0_44 = arith.constant 0 : index
    %c0_45 = arith.constant 0 : index
    %c2 = arith.constant 2 : index
    %c0_46 = arith.constant 0 : index
    %36 = vector.load %arg9[%c0_44, %c0_45, %c2, %c0_46] : memref<1x18x24x128xf32, #tpu.memory_space<vmem>>, vector<1x16x16x128xf32>
    %37 = vector.shape_cast %36 : vector<1x16x16x128xf32> to vector<256x128xf32>
    %38 = arith.truncf %37 : vector<256x128xf32> to vector<256x128xbf16>
    %c256 = arith.constant 256 : index
    %c0_47 = arith.constant 0 : index
    %39 = vector.load %arg3[%c256, %c0_47] : memref<1152x128xbf16, #tpu.memory_space<vmem>>, vector<128x128xbf16>
    %cst_48 = arith.constant dense<0.000000e+00> : vector<256x128xf32>
    %40 = tpu.matmul %38, %39, %cst_48 {dimension_numbers = #tpu.dot_dimension_numbers<[1], [0], [0], [1], [0, 0, 1, 1], [], []>} : vector<256x128xbf16>, vector<128x128xbf16>, vector<256x128xf32> -> vector<256x128xf32>
    %41 = arith.addf %35, %40 : vector<256x128xf32>
    %c0_49 = arith.constant 0 : index
    %c1_50 = arith.constant 1 : index
    %c0_51 = arith.constant 0 : index
    %c0_52 = arith.constant 0 : index
    %42 = vector.load %arg9[%c0_49, %c1_50, %c0_51, %c0_52] : memref<1x18x24x128xf32, #tpu.memory_space<vmem>>, vector<1x16x16x128xf32>
    %43 = vector.shape_cast %42 : vector<1x16x16x128xf32> to vector<256x128xf32>
    %44 = arith.truncf %43 : vector<256x128xf32> to vector<256x128xbf16>
    %c384 = arith.constant 384 : index
    %c0_53 = arith.constant 0 : index
    %45 = vector.load %arg3[%c384, %c0_53] : memref<1152x128xbf16, #tpu.memory_space<vmem>>, vector<128x128xbf16>
    %cst_54 = arith.constant dense<0.000000e+00> : vector<256x128xf32>
    %46 = tpu.matmul %44, %45, %cst_54 {dimension_numbers = #tpu.dot_dimension_numbers<[1], [0], [0], [1], [0, 0, 1, 1], [], []>} : vector<256x128xbf16>, vector<128x128xbf16>, vector<256x128xf32> -> vector<256x128xf32>
    %47 = arith.addf %41, %46 : vector<256x128xf32>
    %c0_55 = arith.constant 0 : index
    %c1_56 = arith.constant 1 : index
    %c1_57 = arith.constant 1 : index
    %c0_58 = arith.constant 0 : index
    %48 = vector.load %arg9[%c0_55, %c1_56, %c1_57, %c0_58] : memref<1x18x24x128xf32, #tpu.memory_space<vmem>>, vector<1x16x16x128xf32>
    %49 = vector.shape_cast %48 : vector<1x16x16x128xf32> to vector<256x128xf32>
    %50 = arith.truncf %49 : vector<256x128xf32> to vector<256x128xbf16>
    %c512 = arith.constant 512 : index
    %c0_59 = arith.constant 0 : index
    %51 = vector.load %arg3[%c512, %c0_59] : memref<1152x128xbf16, #tpu.memory_space<vmem>>, vector<128x128xbf16>
    %cst_60 = arith.constant dense<0.000000e+00> : vector<256x128xf32>
    %52 = tpu.matmul %50, %51, %cst_60 {dimension_numbers = #tpu.dot_dimension_numbers<[1], [0], [0], [1], [0, 0, 1, 1], [], []>} : vector<256x128xbf16>, vector<128x128xbf16>, vector<256x128xf32> -> vector<256x128xf32>
    %53 = arith.addf %47, %52 : vector<256x128xf32>
    %c0_61 = arith.constant 0 : index
    %c1_62 = arith.constant 1 : index
    %c2_63 = arith.constant 2 : index
    %c0_64 = arith.constant 0 : index
    %54 = vector.load %arg9[%c0_61, %c1_62, %c2_63, %c0_64] : memref<1x18x24x128xf32, #tpu.memory_space<vmem>>, vector<1x16x16x128xf32>
    %55 = vector.shape_cast %54 : vector<1x16x16x128xf32> to vector<256x128xf32>
    %56 = arith.truncf %55 : vector<256x128xf32> to vector<256x128xbf16>
    %c640 = arith.constant 640 : index
    %c0_65 = arith.constant 0 : index
    %57 = vector.load %arg3[%c640, %c0_65] : memref<1152x128xbf16, #tpu.memory_space<vmem>>, vector<128x128xbf16>
    %cst_66 = arith.constant dense<0.000000e+00> : vector<256x128xf32>
    %58 = tpu.matmul %56, %57, %cst_66 {dimension_numbers = #tpu.dot_dimension_numbers<[1], [0], [0], [1], [0, 0, 1, 1], [], []>} : vector<256x128xbf16>, vector<128x128xbf16>, vector<256x128xf32> -> vector<256x128xf32>
    %59 = arith.addf %53, %58 : vector<256x128xf32>
    %c0_67 = arith.constant 0 : index
    %c2_68 = arith.constant 2 : index
    %c0_69 = arith.constant 0 : index
    %c0_70 = arith.constant 0 : index
    %60 = vector.load %arg9[%c0_67, %c2_68, %c0_69, %c0_70] : memref<1x18x24x128xf32, #tpu.memory_space<vmem>>, vector<1x16x16x128xf32>
    %61 = vector.shape_cast %60 : vector<1x16x16x128xf32> to vector<256x128xf32>
    %62 = arith.truncf %61 : vector<256x128xf32> to vector<256x128xbf16>
    %c768 = arith.constant 768 : index
    %c0_71 = arith.constant 0 : index
    %63 = vector.load %arg3[%c768, %c0_71] : memref<1152x128xbf16, #tpu.memory_space<vmem>>, vector<128x128xbf16>
    %cst_72 = arith.constant dense<0.000000e+00> : vector<256x128xf32>
    %64 = tpu.matmul %62, %63, %cst_72 {dimension_numbers = #tpu.dot_dimension_numbers<[1], [0], [0], [1], [0, 0, 1, 1], [], []>} : vector<256x128xbf16>, vector<128x128xbf16>, vector<256x128xf32> -> vector<256x128xf32>
    %65 = arith.addf %59, %64 : vector<256x128xf32>
    %c0_73 = arith.constant 0 : index
    %c2_74 = arith.constant 2 : index
    %c1_75 = arith.constant 1 : index
    %c0_76 = arith.constant 0 : index
    %66 = vector.load %arg9[%c0_73, %c2_74, %c1_75, %c0_76] : memref<1x18x24x128xf32, #tpu.memory_space<vmem>>, vector<1x16x16x128xf32>
    %67 = vector.shape_cast %66 : vector<1x16x16x128xf32> to vector<256x128xf32>
    %68 = arith.truncf %67 : vector<256x128xf32> to vector<256x128xbf16>
    %c896 = arith.constant 896 : index
    %c0_77 = arith.constant 0 : index
    %69 = vector.load %arg3[%c896, %c0_77] : memref<1152x128xbf16, #tpu.memory_space<vmem>>, vector<128x128xbf16>
    %cst_78 = arith.constant dense<0.000000e+00> : vector<256x128xf32>
    %70 = tpu.matmul %68, %69, %cst_78 {dimension_numbers = #tpu.dot_dimension_numbers<[1], [0], [0], [1], [0, 0, 1, 1], [], []>} : vector<256x128xbf16>, vector<128x128xbf16>, vector<256x128xf32> -> vector<256x128xf32>
    %71 = arith.addf %65, %70 : vector<256x128xf32>
    %c0_79 = arith.constant 0 : index
    %c2_80 = arith.constant 2 : index
    %c2_81 = arith.constant 2 : index
    %c0_82 = arith.constant 0 : index
    %72 = vector.load %arg9[%c0_79, %c2_80, %c2_81, %c0_82] : memref<1x18x24x128xf32, #tpu.memory_space<vmem>>, vector<1x16x16x128xf32>
    %73 = vector.shape_cast %72 : vector<1x16x16x128xf32> to vector<256x128xf32>
    %74 = arith.truncf %73 : vector<256x128xf32> to vector<256x128xbf16>
    %c1024 = arith.constant 1024 : index
    %c0_83 = arith.constant 0 : index
    %75 = vector.load %arg3[%c1024, %c0_83] : memref<1152x128xbf16, #tpu.memory_space<vmem>>, vector<128x128xbf16>
    %cst_84 = arith.constant dense<0.000000e+00> : vector<256x128xf32>
    %76 = tpu.matmul %74, %75, %cst_84 {dimension_numbers = #tpu.dot_dimension_numbers<[1], [0], [0], [1], [0, 0, 1, 1], [], []>} : vector<256x128xbf16>, vector<128x128xbf16>, vector<256x128xf32> -> vector<256x128xf32>
    %77 = arith.addf %71, %76 : vector<256x128xf32>
    %c0_85 = arith.constant 0 : index
    %c0_86 = arith.constant 0 : index
    %78 = vector.load %arg6[%c0_85, %c0_86] : memref<1x128xf32, #tpu.memory_space<vmem>>, vector<1x128xf32>
    %79 = vector.broadcast %78 : vector<1x128xf32> to vector<256x128xf32>
    %80 = arith.addf %77, %79 : vector<256x128xf32>
    %cst_87 = arith.constant 0.000000e+00 : f32
    %81 = vector.broadcast %cst_87 : f32 to vector<256x128xf32>
    %82 = arith.cmpf ogt, %80, %81 : vector<256x128xf32>
    %cst_88 = arith.constant 1.000000e-01 : f32
    %83 = vector.broadcast %cst_88 : f32 to vector<256x128xf32>
    %84 = arith.mulf %83, %80 : vector<256x128xf32>
    %85 = arith.select %82, %80, %84 : vector<256x128xi1>, vector<256x128xf32>
    %86 = arith.truncf %85 : vector<256x128xf32> to vector<256x128xbf16>
    %c0_89 = arith.constant 0 : index
    %c0_90 = arith.constant 0 : index
    %87 = vector.load %arg4[%c0_89, %c0_90] : memref<128x16xbf16, #tpu.memory_space<vmem>>, vector<128x16xbf16>
    %cst_91 = arith.constant dense<0.000000e+00> : vector<256x16xf32>
    %88 = tpu.matmul %86, %87, %cst_91 {dimension_numbers = #tpu.dot_dimension_numbers<[1], [0], [0], [1], [0, 0, 1, 1], [], []>} : vector<256x128xbf16>, vector<128x16xbf16>, vector<256x16xf32> -> vector<256x16xf32>
    %c0_92 = arith.constant 0 : index
    %c0_93 = arith.constant 0 : index
    %89 = vector.load %arg7[%c0_92, %c0_93] : memref<1x16xf32, #tpu.memory_space<vmem>>, vector<1x16xf32>
    %90 = vector.broadcast %89 : vector<1x16xf32> to vector<256x16xf32>
    %91 = arith.addf %88, %90 : vector<256x16xf32>
    %92 = arith.addf %91, %1 : vector<256x16xf32>
    %cst_94 = arith.constant 0.000000e+00 : f32
    %93 = vector.broadcast %cst_94 : f32 to vector<256x16xf32>
    %94 = arith.cmpf ogt, %92, %93 : vector<256x16xf32>
    %cst_95 = arith.constant 1.000000e-01 : f32
    %95 = vector.broadcast %cst_95 : f32 to vector<256x16xf32>
    %96 = arith.mulf %95, %92 : vector<256x16xf32>
    %97 = arith.select %94, %92, %96 : vector<256x16xi1>, vector<256x16xf32>
    %98 = vector.shape_cast %97 : vector<256x16xf32> to vector<1x256x16xf32>
    %c0_96 = arith.constant 0 : index
    %c0_97 = arith.constant 0 : index
    %c0_98 = arith.constant 0 : index
    %99 = vector.load %arg8[%c0_96, %c0_97, %c0_98] : memref<1x256x16xf32, #tpu.memory_space<vmem>>, vector<1x256x16xf32>
    tpu.vector_store %arg8[%c0_96, %c0_97, %c0_98], %98 {strides = array<i32>} : memref<1x256x16xf32, #tpu.memory_space<vmem>>, vector<1x256x16xf32>,
    return
  }
  func.func @transform_0(%arg0: i32) -> (i32, i32, i32) {
    %c0_i32 = arith.constant 0 : i32
    %c0_i32_0 = arith.constant 0 : i32
    %c0_i32_1 = arith.constant 0 : i32
    return %arg0, %c0_i32, %c0_i32_0 : i32, i32, i32
  }
  func.func @transform_1(%arg0: i32) -> (i32, i32) {
    %c0_i32 = arith.constant 0 : i32
    %c0_i32_0 = arith.constant 0 : i32
    %c0_i32_1 = arith.constant 0 : i32
    return %c0_i32, %c0_i32_0 : i32, i32
  }
  func.func @transform_2(%arg0: i32) -> (i32, i32) {
    %c0_i32 = arith.constant 0 : i32
    %c0_i32_0 = arith.constant 0 : i32
    %c0_i32_1 = arith.constant 0 : i32
    return %c0_i32, %c0_i32_0 : i32, i32
  }
  func.func @transform_3(%arg0: i32) -> (i32, i32) {
    %c0_i32 = arith.constant 0 : i32
    %c0_i32_0 = arith.constant 0 : i32
    %c0_i32_1 = arith.constant 0 : i32
    return %c0_i32, %c0_i32_0 : i32, i32
  }
  func.func @transform_4(%arg0: i32) -> (i32, i32) {
    %c0_i32 = arith.constant 0 : i32
    %c0_i32_0 = arith.constant 0 : i32
    %c0_i32_1 = arith.constant 0 : i32
    return %c0_i32, %c0_i32_0 : i32, i32
  }
  func.func @transform_5(%arg0: i32) -> (i32, i32) {
    %c0_i32 = arith.constant 0 : i32
    %c0_i32_0 = arith.constant 0 : i32
    %c0_i32_1 = arith.constant 0 : i32
    return %c0_i32, %c0_i32_0 : i32, i32
  }
  func.func @transform_6(%arg0: i32) -> (i32, i32) {
    %c0_i32 = arith.constant 0 : i32
    %c0_i32_0 = arith.constant 0 : i32
    %c0_i32_1 = arith.constant 0 : i32
    return %c0_i32, %c0_i32_0 : i32, i32
  }
  func.func @transform_7(%arg0: i32) -> (i32, i32, i32) {
    %c0_i32 = arith.constant 0 : i32
    %c0_i32_0 = arith.constant 0 : i32
    %c0_i32_1 = arith.constant 0 : i32
    return %arg0, %c0_i32, %c0_i32_0 : i32, i32, i32
  }
}

</mosaic_0001>

<bundles_post_ra>
// kernel: tpu_custom_call.1
= control target key start
LH: loop header
LB: loop body
LE: loop exit
PB: predicated region body
PF: predicated region fallthrough
CT: control target
= control target key end

     0   :  { %12 = vsyncpa [#allocation4], 0  ;;  %s5374_s0 = inlined_call_operand.vmem [shape: f32[2,256,16], index: 0, kind: input, shape index: {}]   ;;  %s5375_s1 = inlined_call_operand.vmem [shape: bf16[16,128], index: 1, kind: input, shape index: {}]   ;;  %s5376_s2 = inlined_call_operand.vmem [shape: bf16[1152,128], index: 2, kind: input, shape index: {}]   ;;  %s5377_s3 = inlined_call_operand.vmem [shape: bf16[128,16], index: 3, kind: input, shape index: {}]   ;;  %s5378_s4 = inlined_call_operand.hbm [shape: f32[1,128], index: 4, kind: input, shape index: {}]   ;;  %s5379_s5 = inlined_call_operand.hbm [shape: f32[1,128], index: 5, kind: input, shape index: {}]   ;;  %s5380_s6 = inlined_call_operand.hbm [shape: f32[1,16], index: 6, kind: input, shape index: {}]   ;;  %s5381_s7 = inlined_call_operand.vmem [shape: f32[2,256,16], index: 7, kind: output, shape index: {}]  }
   0x1   :  { %13 = vsyncpa [#allocation6], 0  ;;  %s3960_s24 = smov 0  }
   0x2 LB: > { %s235_s27 = sshll.u32 %s5379_s5, 4  ;;  %s3275_s28 = sadd.s32 4294967295, %s3913_s24   ;;  %s3913_s24 = sphi %s3960_s24, %s19_s24   ;;  %s236_s27 = int_to_ptr.hbm [resolvable:$true] %s235_s27 }
   0x3   : > { %p3277_p0 = scmp.ge.s32.totalorder %s3913_s24, 1  ;;  %p202_p1 = scmp.lt.s32.totalorder %s3913_s24, 3 }
   0x4   : > { %p3754_p2 = scmp.eq.s32.totalorder %s3275_s28, 0  ;;  %s3915_s30 = smov [#allocation5]  }
   0x5   : > { %p3971_p3 = pnand %p3277_p0, %p202_p1  ;;  %s237_s8 = sshll.u32 %s3915_s30, 4  ;;  %s238_s8 = int_to_ptr.vmem [resolvable:$true] %s237_s8 }
   0x6   : > { %s223_s11 = sshll.u32 %s5378_s4, 4  ;;  %s247_s14 = sshll.u32 %s5380_s6, 4  ;;  %s224_s11 = int_to_ptr.hbm [resolvable:$true] %s223_s11  ;;  %s248_s14 = int_to_ptr.hbm [resolvable:$true] %s247_s14 }
   0x7   : > { %p3744_p4 = pneg %p3971_p3  ;;  %s3916_s15 = smov [#allocation3]  }
   0x8   : > { %s225_s16 = sshll.u32 %s3916_s15, 4  ;;  %s3917_s17 = smov [#allocation7]   ;;  %s226_s16 = int_to_ptr.vmem [resolvable:$true] %s225_s16 }
   0x9   : > { %p3745_p5 = pnand %p3754_p2, %p3744_p4  ;;  %s249_s18 = sshll.u32 %s3917_s17, 4  ;;  %s250_s18 = int_to_ptr.vmem [resolvable:$true] %s249_s18 }
   0xa   : > { %270 = sbr.rel (%p3971_p3) target bundleno = 1268 (0x4f4), region = 48 }
   0xb   : > { %3750 = dma.hbm_to_vmem [thread:$0]  (!%p3745_p5), %s236_s27, 16, %s238_s8, [#allocation6]  }
   0xc   : > { %3747 = dma.hbm_to_vmem [thread:$0]  (!%p3745_p5), %s224_s11, 16, %s226_s16, [#allocation4]  }
   0xd   : > { %3753 = dma.hbm_to_vmem [thread:$0]  (!%p3745_p5), %s248_s14, 16, %s250_s18, [#allocation6]  }
   0xf   : > { %3904 = dma.done.wait (%p3754_p2), [#allocation4], 16  }
  0x10   : > { %3906 = vsyncadd (%p3754_p2), [#allocation4], 4294967280 }
  0x11   : > { %3908 = dma.done.wait (%p3754_p2), [#allocation6], 32  }
  0x12   : > { %3910 = vsyncadd (%p3754_p2), [#allocation6], 4294967264  ;;  %p313_p6 = scmp.lt.s32.totalorder %s3275_s28, 1  ;;  %v3634_v0 = vld [vmem:[%s5375_s1] sm:$0xff]  ;;  %vm384_vm0 = vcmask 130048   ;;  %v3650_v16 = vld [vmem:[%s5376_s2 + $0x78] sm:$0xff] }
  0x13   : > { %440 = vmatpush.bf16.msra.mxu0 %v3634_v0  ;;  %3715 = vmatpush.bf16.msra.mxu3 %v3634_v0  ;;  %v4024_v17 = vld [vmem:[%s5376_s2 + $0x38] sm:$0xff]  ;;  %v3649_v18 = vld [vmem:[%s5376_s2 + $0x70] sm:$0xff]  ;;  %v3648_v20 = vld [vmem:[%s5376_s2 + $0x68] sm:$0xff]  ;;  %v3918_v30 = vmov 0.0   ;;  %v3919_v42 = vmov 0.0|0.0  }
  0x14   : > { %s5545_s28 = smov (!%p313_p6, %s3275_s28), 1  ;;  %866 = vmatpush.bf16.msra.mxu1 %v3650_v16  ;;  %1003 = vmatpush.bf16.msra.mxu2 %v4024_v17  ;;  %v4033_v19 = vld [vmem:[%s5376_s2 + $0x30] sm:$0xff]  ;;  %v4042_v21 = vld [vmem:[%s5376_s2 + $0x28] sm:$0xff]  ;;  %v3647_v22 = vld [vmem:[%s5376_s2 + $0x60] sm:$0xff]  ;;  %618 = vst [vmem:[#allocation2] sm:$0xff] %v3918_v30 }
  0x15   : > { %s3632_s19 = sshll.u32 %s5545_s28, 8  ;;  %v3646_v26 = vld [vmem:[%s5376_s2 + $0x58] sm:$0xff]  ;;  %v4057_v27 = vld [vmem:[%s5376_s2 + $0x20] sm:$0xff]  ;;  %v3645_v28 = vld [vmem:[%s5376_s2 + $0x50] sm:$0xff]  ;;  %619 = vst [vmem:[#allocation2 + $0x8] sm:$0xff] %v3918_v30 }
  0x16   : > { %s3998_s22 = scalar_lea.vmem %s5374_s0, %s3632_s19  ;;  %v4066_v29 = vld [vmem:[%s5376_s2 + $0x18] sm:$0xff]  ;;  %v3644_v31 = vld [vmem:[%s5376_s2 + $0x48] sm:$0xff]  ;;  %620 = vst [vmem:[#allocation2 + $0x10] sm:$0xff] %v3918_v30  ;;  %v4078_v32 = vld [vmem:[%s5376_s2 + $0x10] sm:$0xff]  ;;  %s5188_s14 = scalar_lea.vmem %s5381_s7, %s3632_s19 }
  0x17   : > { %v324_v1 = vld [vmem:[%s3998_s22] sm:$0xff]  ;;  %v325_v2 = vld [vmem:[%s3998_s22 + $0x8] sm:$0xff]  ;;  %v326_v4 = vld [vmem:[%s3998_s22 + $0x10] sm:$0xff]  ;;  %3716 = vmatpush.bf16.msrb.mxu3 %v3650_v16  ;;  %622 = vst [vmem:[#allocation2 + $0x198] sm:$0xff] %v3918_v30 }
  0x18   : > { %v356_v3 = vpack.c.bf16 %v325_v2, %v324_v1  ;;  %v327_v5 = vld [vmem:[%s3998_s22 + $0x18] sm:$0xff]  ;;  %v328_v7 = vld [vmem:[%s3998_s22 + $0x20] sm:$0xff]  ;;  %v329_v8 = vld [vmem:[%s3998_s22 + $0x28] sm:$0xff]  ;;  %867 = vmatpush.bf16.msra.mxu1 %v3649_v18  ;;  %1004 = vmatpush.bf16.msra.mxu2 %v4033_v19  ;;  %623 = vst [vmem:[#allocation2 + $0x1a0] sm:$0xff] %v3918_v30 }
  0x19   : > { %v357_v6 = vpack.c.bf16 %v327_v5, %v326_v4  ;;  %v358_v9 = vpack.c.bf16 %v329_v8, %v328_v7  ;;  %v330_v10 = vld [vmem:[%s3998_s22 + $0x30] sm:$0xff]  ;;  %v331_v11 = vld [vmem:[%s3998_s22 + $0x38] sm:$0xff]  ;;  %v332_v13 = vld [vmem:[%s3998_s22 + $0x40] sm:$0xff]  ;;  %624 = vst [vmem:[#allocation2 + $0x1a8] sm:$0xff] %v3918_v30 }
  0x1a   : > { %3294 = vmatmul.msk.bf16.vlgmr.msra.gmra.mxu0 %vm384_vm0, %v356_v3  ;;  %v359_v12 = vpack.c.bf16 %v331_v11, %v330_v10  ;;  %v333_v14 = vld [vmem:[%s3998_s22 + $0x48] sm:$0xff]  ;;  %v334_v23 = vld [vmem:[%s3998_s22 + $0x50] sm:$0xff]  ;;  %v335_v24 = vld [vmem:[%s3998_s22 + $0x58] sm:$0xff]  ;;  %626 = vst [vmem:[#allocation2 + $0x18] sm:$0x1] %v3918_v30 }
  0x1b   : > { %v360_v15 = vpack.c.bf16 %v333_v14, %v332_v13  ;;  %3717 = vmatpush.bf16.msrb.mxu3 %v3649_v18  ;;  %v361_v25 = vpack.c.bf16 %v335_v24, %v334_v23  ;;  %v3643_v33 = vld [vmem:[%s5376_s2 + $0x40] sm:$0xff]  ;;  %v337_v35 = vld [vmem:[%s3998_s22 + $0x68] sm:$0xff]  ;;  %627 = vst [vmem:[#allocation2 + $0x30] sm:$0x1] %v3918_v30  ;;  %v338_v43 = vld [vmem:[%s3998_s22 + $0x70] sm:$0xff] }
  0x1c   : > { %868 = vmatpush.bf16.msra.mxu1 %v3648_v20  ;;  %1005 = vmatpush.bf16.msra.mxu2 %v4042_v21  ;;  %v336_v34 = vld [vmem:[%s3998_s22 + $0x60] sm:$0xff]  ;;  %628 = vst [vmem:[#allocation2 + $0x48] sm:$0x1] %v3918_v30  ;;  %v4095_v38 = vld [vmem:[%s5376_s2 + $0x8] sm:$0xff]  ;;  %v339_v44 = vld [vmem:[%s3998_s22 + $0x78] sm:$0xff] }
  0x1d   : > { %v754_v36 = vld [vmem:[#allocation2 + $0x1] sm:$0xff]  ;;  %v362_v37 = vpack.c.bf16 %v337_v35, %v336_v34  ;;  %v755_v39 = vld [vmem:[#allocation2 + $0x9] sm:$0xff]  ;;  %629 = vst [vmem:[#allocation2 + $0x60] sm:$0x1] %v3918_v30  ;;  %v363_v45 = vpack.c.bf16 %v339_v44, %v338_v43  ;;  %v343_v58 = vld [vmem:[%s3998_s22 + $0x98] sm:$0xff] }
  0x1e   : > { %v786_v40 = vpack.c.bf16 %v755_v39, %v754_v36  ;;  %630 = vst [vmem:[#allocation2 + $0x78] sm:$0x1] %v3918_v30  ;;  %v4106_v41 = vld [vmem:[%s5376_s2] sm:$0xff]  ;;  %v341_v47 = vld [vmem:[%s3998_s22 + $0x88] sm:$0xff]  ;;  %v4139_v48 = vld [vmem:[#allocation3] ss:$0 sm:$0xff] }
  0x1f   : > { %3718 = vmatpush.bf16.msrb.mxu3 %v3648_v20  ;;  %631 = vst [vmem:[#allocation2 + $0x90] sm:$0x1] %v3918_v30  ;;  %v340_v46 = vld [vmem:[%s3998_s22 + $0x80] sm:$0xff]  ;;  %v342_v57 = vld [vmem:[%s3998_s22 + $0x90] sm:$0xff]  ;;  %v3666_v0 = vld [vmem:[%s5376_s2 + $0xf8] sm:$0xff] }
  0x20   : > { %869 = vmatpush.bf16.msra.mxu1 %v3647_v22  ;;  %1006 = vmatpush.bf16.msra.mxu2 %v4057_v27  ;;  %632 = vst [vmem:[#allocation2 + $0xa8] sm:$0x1] %v3918_v30  ;;  %v364_v49 = vpack.c.bf16 %v341_v47, %v340_v46  ;;  %v365_v61 = vpack.c.bf16 %v343_v58, %v342_v57  ;;  %v344_v11 = vld [vmem:[%s3998_s22 + $0xa0] sm:$0xff]  ;;  %v350_v20 = vld [vmem:[%s3998_s22 + $0xd0] sm:$0xff]  ;;  %v351_v23 = vld [vmem:[%s3998_s22 + $0xd8] sm:$0xff] }
  0x21   : > { %633 = vst [vmem:[#allocation2 + $0xc0] sm:$0x1] %v3918_v30  ;;  %1437 = vmatpush.bf16.msrb.mxu0 %v3666_v0  ;;  %v369_v24 = vpack.c.bf16 %v351_v23, %v350_v20  ;;  %v3661_v34 = vld [vmem:[%s5376_s2 + $0xd0] sm:$0xff]  ;;  %v352_v46 = vld [vmem:[%s3998_s22 + $0xe0] sm:$0xff]  ;;  %v353_v47 = vld [vmem:[%s3998_s22 + $0xe8] sm:$0xff] }
  0x22   : > { %634 = vst [vmem:[#allocation2 + $0xd8] sm:$0x1] %v3918_v30  ;;  %v346_v39 = vld [vmem:[%s3998_s22 + $0xb0] sm:$0xff]  ;;  %v348_v57 = vld [vmem:[%s3998_s22 + $0xc0] sm:$0xff]  ;;  %v349_v58 = vld [vmem:[%s3998_s22 + $0xc8] sm:$0xff] }
  0x23   : > { %3719 = vmatpush.bf16.msrb.mxu3 %v3647_v22  ;;  %635 = vst [vmem:[#allocation2 + $0xf0] sm:$0x1] %v3918_v30 }
  0x24   : > { %870 = vmatpush.bf16.msra.mxu1 %v3646_v26  ;;  %1007 = vmatpush.bf16.msra.mxu2 %v4066_v29  ;;  %636 = vst [vmem:[#allocation2 + $0x108] sm:$0x1] %v3918_v30 }
  0x25   : > { %637 = vst [vmem:[#allocation2 + $0x120] sm:$0x1] %v3918_v30  ;;  %3307 = vmatmul.msk.bf16.vlgmr.msra.gmra.mxu3 %vm384_vm0, %v369_v24 }
  0x26   : > { %638 = vst [vmem:[#allocation2 + $0x138] sm:$0x1] %v3918_v30 }
  0x27   : > { %3720 = vmatpush.bf16.msrb.mxu3 %v3646_v26  ;;  %639 = vst [vmem:[#allocation2 + $0x150] sm:$0x1] %v3918_v30 }
  0x28   : > { %871 = vmatpush.bf16.msra.mxu1 %v3645_v28  ;;  %1008 = vmatpush.bf16.msra.mxu2 %v4078_v32  ;;  %640 = vst [vmem:[#allocation2 + $0x168] sm:$0x1] %v3918_v30 }
  0x29   : > { %641 = vst [vmem:[#allocation2 + $0x180] sm:$0x1] %v3918_v30 }
  0x2a   : > { %3295 = vmatmul.msk.bf16.gmra.mxu0 %vm384_vm0, %v357_v6  ;;  %642 = vst [vmem:[#allocation2 + $0x29] sm:$0x1] %v3918_v30  ;;  %v3665_v6 = vld [vmem:[%s5376_s2 + $0xf0] sm:$0xff] }
  0x2b   : > { %3721 = vmatpush.bf16.msrb.mxu3 %v3645_v28  ;;  %643 = vst [vmem:[#allocation2 + $0x41] sm:$0x1] %v3918_v30  ;;  %1438 = vmatpush.bf16.msrb.mxu0 %v3665_v6 }
  0x2c   : > { %872 = vmatpush.bf16.msra.mxu1 %v3644_v31  ;;  %1009 = vmatpush.bf16.msra.mxu2 %v4095_v38  ;;  %644 = vst [vmem:[#allocation2 + $0x59] sm:$0x1] %v3918_v30 }
  0x2d   : > { %645 = vst [vmem:[#allocation2 + $0x71] sm:$0x1] %v3918_v30 }
  0x2e   : > { %646 = vst [vmem:[#allocation2 + $0x89] sm:$0x1] %v3918_v30 }
  0x2f   : > { %3722 = vmatpush.bf16.msrb.mxu3 %v3644_v31  ;;  %647 = vst [vmem:[#allocation2 + $0xa1] sm:$0x1] %v3918_v30 }
  0x30   : > { %873 = vmatpush.bf16.msra.mxu1 %v3643_v33  ;;  %1010 = vmatpush.bf16.msra.mxu2 %v4106_v41  ;;  %648 = vst [vmem:[#allocation2 + $0xb9] sm:$0x1] %v3918_v30 }
  0x31   : > { %649 = vst [vmem:[#allocation2 + $0xd1] sm:$0x1] %v3918_v30 }
  0x32   : > { %650 = vst [vmem:[#allocation2 + $0xe9] sm:$0x1] %v3918_v30 }
  0x33   : > { %3723 = vmatpush.bf16.msrb.mxu3 %v3643_v33  ;;  %874 = vmatmul.bf16.vlgmr.msra.gmra.mxu1 %v786_v40  ;;  %651 = vst [vmem:[#allocation2 + $0x101] sm:$0x1] %v3918_v30  ;;  %v347_v40 = vld [vmem:[%s3998_s22 + $0xb8] sm:$0xff] }
  0x34   : > { %1011 = vmatmul.bf16.vlgmr.msra.gmra.mxu2 %v3919_v42  ;;  %652 = vst [vmem:[#allocation2 + $0x119] sm:$0x1] %v3918_v30  ;;  %v367_v44 = vpack.c.bf16 %v347_v40, %v346_v39 }
  0x35   : > { %653 = vst [vmem:[#allocation2 + $0x131] sm:$0x1] %v3918_v30 }
  0x36   : > { %654 = vst [vmem:[#allocation2 + $0x149] sm:$0x1] %v3918_v30 }
  0x37   : > { %655 = vst [vmem:[#allocation2 + $0x161] sm:$0x1] %v3918_v30  ;;  %3724 = vmatpush.bf16.msra.mxu3 %v4024_v17  ;;  %v3660_v17 = vld [vmem:[%s5376_s2 + $0xc8] sm:$0xff] }
  0x38   : > { %656 = vst [vmem:[#allocation2 + $0x179] sm:$0x1] %v3918_v30 }
  0x39   : > { %657 = vst [vmem:[#allocation2 + $0x191] sm:$0x1] %v3918_v30 }
  0x3a   : > { %3296 = vmatmul.msk.bf16.gmra.mxu0 %vm384_vm0, %v358_v9  ;;  %v3664_v9 = vld [vmem:[%s5376_s2 + $0xe8] sm:$0xff] }
  0x3b   : > { %1439 = vmatpush.bf16.msrb.mxu0 %v3664_v9  ;;  %3725 = vmatpush.bf16.msra.mxu3 %v4033_v19  ;;  %v3659_v19 = vld [vmem:[%s5376_s2 + $0xc0] sm:$0xff] }
  0x3f   : > { %3726 = vmatpush.bf16.msra.mxu3 %v4042_v21 }
  0x43   : > { %3727 = vmatpush.bf16.msra.mxu3 %v4057_v27 }
  0x47   : > { %3728 = vmatpush.bf16.msra.mxu3 %v4066_v29  ;;  %v368_v29 = vpack.c.bf16 %v349_v58, %v348_v57  ;;  %v354_v58 = vld [vmem:[%s3998_s22 + $0xf0] sm:$0xff] }
  0x4a   : > { %3297 = vmatmul.msk.bf16.gmra.mxu0 %vm384_vm0, %v359_v12  ;;  %v345_v12 = vld [vmem:[%s3998_s22 + $0xa8] sm:$0xff] }
  0x4b   : > { %v366_v16 = vpack.c.bf16 %v345_v12, %v344_v11  ;;  %3729 = vmatpush.bf16.msra.mxu3 %v4078_v32 }
  0x4f   : > { %3730 = vmatpush.bf16.msra.mxu3 %v4095_v38 }
  0x53   : > { %3731 = vmatpush.bf16.msra.mxu3 %v4106_v41 }
  0x5a   : > { %3298 = vmatmul.msk.bf16.gmra.mxu0 %vm384_vm0, %v360_v15  ;;  %v3663_v15 = vld [vmem:[%s5376_s2 + $0xe0] sm:$0xff] }
  0x5b   : > { %1440 = vmatpush.bf16.msrb.mxu0 %v3663_v15 }
  0x6a   : > { %3299 = vmatmul.msk.bf16.gmra.mxu0 %vm384_vm0, %v361_v25  ;;  %v3662_v25 = vld [vmem:[%s5376_s2 + $0xd8] sm:$0xff] }
  0x6b   : > { %1441 = vmatpush.bf16.msrb.mxu0 %v3662_v25 }
  0x6f   : > { %1442 = vmatpush.bf16.msrb.mxu0 %v3661_v34 }
  0x73   : > { %1443 = vmatpush.bf16.msrb.mxu0 %v3660_v17 }
  0x77   : > { %1444 = vmatpush.bf16.msrb.mxu0 %v3659_v19 }
  0x7a   : > { %3300 = vmatmul.msk.bf16.gmra.mxu0 %vm384_vm0, %v362_v37 }
  0x8a   : > { %3301 = vmatmul.msk.bf16.gmra.mxu0 %vm384_vm0, %v363_v45 }
  0x97   : > { %v442_v50 = vpop.f32.mrf.mxu0 }
  0x98   : > { %v443_v51 = vadd.f32 %v4139_v48, %v442_v50  ;;  %v370_v50 = vpack.c.bf16 %v353_v47, %v352_v46 }
  0x9a   : > { %vm522_vm1 = vcmp.gt.f32.partialorder %v443_v51, 0.0  ;;  %v554_v52 = vmul.f32 0.1, %v443_v51  ;;  %3302 = vmatmul.msk.bf16.gmra.mxu0 %vm384_vm0, %v364_v49  ;;  %3308 = vmatmul.msk.bf16.gmra.mxu3 %vm384_vm0, %v370_v50  ;;  %v3674_v50 = vld [vmem:[%s5376_s2 + $0x138] sm:$0xff] }
  0x9b   : > { %1670 = vmatpush.bf16.msrb.mxu1 %v3674_v50  ;;  %v3676_v50 = vld [vmem:[%s5376_s2 + $0x148] sm:$0xff] }
  0x9c   : > { %v586_v53 = vsel %vm522_vm1, %v443_v51, %v554_v52 }
  0x9d   : > { %658 = vst [vmem:[#allocation2 + $0x19] sm:$0xff] %v586_v53 }
  0x9f   : > { %v444_v54 = vpop.f32.mrf.mxu0 }
  0xa0   : > { %v445_v55 = vadd.f32 %v4139_v48, %v444_v54 }
  0xa2   : > { %vm523_vm2 = vcmp.gt.f32.partialorder %v445_v55, 0.0  ;;  %v555_v56 = vmul.f32 0.1, %v445_v55 }
  0xa4   : > { %v587_v59 = vsel %vm523_vm2, %v445_v55, %v555_v56  ;;  %v692_v3 = vld [vmem:[#allocation2 + $0x18] sm:$0xff] }
  0xa5   : > { %659 = vst [vmem:[#allocation2 + $0x21] sm:$0xff] %v587_v59  ;;  %v4146_v60 = vpack.c.bf16 %v587_v59, %v586_v53 }
  0xa7   : > { %v447_v62 = vpop.f32.mrf.mxu0  ;;  %879 = vmatmul.bf16.gmra.mxu1 %v4146_v60 }
  0xa8   : > { %v448_v63 = vadd.f32 %v4139_v48, %v447_v62 }
  0xaa   : > { %vm524_vm3 = vcmp.gt.f32.partialorder %v448_v63, 0.0  ;;  %v556_v1 = vmul.f32 0.1, %v448_v63  ;;  %3303 = vmatmul.msk.bf16.gmra.mxu0 %vm384_vm0, %v365_v61 }
  0xac   : > { %v588_v2 = vsel %vm524_vm3, %v448_v63, %v556_v1  ;;  %v693_v4 = vld [vmem:[#allocation2 + $0x20] sm:$0xff] }
  0xad   : > { %660 = vst [vmem:[#allocation2 + $0x31] sm:$0xff] %v588_v2  ;;  %v4154_v5 = vpack.c.bf16 %v693_v4, %v692_v3 }
  0xaf   : > { %v449_v7 = vpop.f32.mrf.mxu0  ;;  %1016 = vmatmul.bf16.gmra.mxu2 %v4154_v5 }
  0xb0   : > { %v450_v8 = vadd.f32 %v4139_v48, %v449_v7 }
  0xb2   : > { %vm525_vm4 = vcmp.gt.f32.partialorder %v450_v8, 0.0  ;;  %v557_v10 = vmul.f32 0.1, %v450_v8 }
  0xb4   : > { %v589_v13 = vsel %vm525_vm4, %v450_v8, %v557_v10  ;;  %v694_v30 = vld [vmem:[#allocation2 + $0x30] sm:$0xff] }
  0xb5   : > { %661 = vst [vmem:[#allocation2 + $0x39] sm:$0xff] %v589_v13  ;;  %v4166_v14 = vpack.c.bf16 %v589_v13, %v588_v2 }
  0xb7   : > { %v452_v18 = vpop.f32.mrf.mxu0  ;;  %884 = vmatmul.bf16.gmra.mxu1 %v4166_v14  ;;  %v1012_v39 = vpop.f32.mrf.mxu2 }
  0xb8   : > { %v453_v22 = vadd.f32 %v4139_v48, %v452_v18 }
  0xba   : > { %vm526_vm5 = vcmp.gt.f32.partialorder %v453_v22, 0.0  ;;  %v558_v26 = vmul.f32 0.1, %v453_v22  ;;  %3304 = vmatmul.msk.bf16.gmra.mxu0 %vm384_vm0, %v366_v16 }
  0xbc   : > { %v590_v28 = vsel %vm526_vm5, %v453_v22, %v558_v26  ;;  %v695_v31 = vld [vmem:[#allocation2 + $0x38] sm:$0xff] }
  0xbd   : > { %662 = vst [vmem:[#allocation2 + $0x49] sm:$0xff] %v590_v28  ;;  %v4181_v33 = vpack.c.bf16 %v695_v31, %v694_v30 }
  0xbf   : > { %v454_v35 = vpop.f32.mrf.mxu0  ;;  %1021 = vmatmul.bf16.gmra.mxu2 %v4181_v33 }
  0xc0   : > { %v455_v36 = vadd.f32 %v4139_v48, %v454_v35 }
  0xc2   : > { %vm527_vm6 = vcmp.gt.f32.partialorder %v455_v36, 0.0  ;;  %v559_v37 = vmul.f32 0.1, %v455_v36 }
  0xc4   : > { %v591_v42 = vsel %vm527_vm6, %v455_v36, %v559_v37  ;;  %v696_v52 = vld [vmem:[#allocation2 + $0x48] sm:$0xff]  ;;  %v875_v37 = vpop.f32.mrf.mxu1 }
  0xc5   : > { %663 = vst [vmem:[#allocation2 + $0x51] sm:$0xff] %v591_v42  ;;  %v4195_v43 = vpack.c.bf16 %v591_v42, %v590_v28 }
  0xc7   : > { %v457_v45 = vpop.f32.mrf.mxu0  ;;  %889 = vmatmul.bf16.gmra.mxu1 %v4195_v43 }
  0xc8   : > { %v458_v49 = vadd.f32 %v4139_v48, %v457_v45 }
  0xca   : > { %vm528_vm7 = vcmp.gt.f32.partialorder %v458_v49, 0.0  ;;  %v560_v21 = vmul.f32 0.1, %v458_v49  ;;  %3305 = vmatmul.msk.bf16.gmra.mxu0 %vm384_vm0, %v367_v44 }
  0xcc   : > { %v592_v51 = vsel %vm528_vm7, %v458_v49, %v560_v21  ;;  %v697_v53 = vld [vmem:[#allocation2 + $0x50] sm:$0xff]  ;;  %v4263_v57 = vpop.f32.mrf.mxu1 }
  0xcd   : > { %664 = vst [vmem:[#allocation2 + $0x61] sm:$0xff] %v592_v51  ;;  %v4208_v54 = vpack.c.bf16 %v697_v53, %v696_v52 }
  0xcf   : > { %v459_v55 = vpop.f32.mrf.mxu0  ;;  %1026 = vmatmul.bf16.gmra.mxu2 %v4208_v54 }
  0xd0   : > { %v460_v27 = vadd.f32 %v4139_v48, %v459_v55 }
  0xd2   : > { %vm529_vm8 = vcmp.gt.f32.partialorder %v460_v27, 0.0  ;;  %v561_v56 = vmul.f32 0.1, %v460_v27 }
  0xd4   : > { %v593_v59 = vsel %vm529_vm8, %v460_v27, %v561_v56  ;;  %v698_v1 = vld [vmem:[#allocation2 + $0x60] sm:$0xff] }
  0xd5   : > { %665 = vst [vmem:[#allocation2 + $0x69] sm:$0xff] %v593_v59  ;;  %v4216_v61 = vpack.c.bf16 %v593_v59, %v592_v51  ;;  %v355_v59 = vld [vmem:[%s3998_s22 + $0xf8] sm:$0xff] }
  0xd7   : > { %v462_v62 = vpop.f32.mrf.mxu0  ;;  %894 = vmatmul.bf16.gmra.mxu1 %v4216_v61 }
  0xd8   : > { %v463_v63 = vadd.f32 %v4139_v48, %v462_v62  ;;  %v371_v62 = vpack.c.bf16 %v355_v59, %v354_v58 }
  0xda   : > { %vm530_vm9 = vcmp.gt.f32.partialorder %v463_v63, 0.0  ;;  %v562_v32 = vmul.f32 0.1, %v463_v63  ;;  %3306 = vmatmul.msk.bf16.gmra.mxu0 %vm384_vm0, %v368_v29  ;;  %v3673_v29 = vld [vmem:[%s5376_s2 + $0x130] sm:$0xff]  ;;  %3309 = vmatmul.msk.bf16.gmra.mxu3 %vm384_vm0, %v371_v62 }
  0xdb   : > { %1671 = vmatpush.bf16.msrb.mxu1 %v3673_v29 }
  0xdc   : > { %v594_v0 = vsel %vm530_vm9, %v463_v63, %v562_v32  ;;  %v699_v2 = vld [vmem:[#allocation2 + $0x68] sm:$0xff] }
  0xdd   : > { %666 = vst [vmem:[#allocation2 + $0x79] sm:$0xff] %v594_v0  ;;  %v4222_v38 = vpack.c.bf16 %v699_v2, %v698_v1  ;;  %v3682_v2 = vld [vmem:[%s5376_s2 + $0x178] sm:$0xff] }
  0xde   : > { %1903 = vmatpush.bf16.msrb.mxu2 %v3682_v2 }
  0xdf   : > { %v464_v3 = vpop.f32.mrf.mxu0  ;;  %1031 = vmatmul.bf16.gmra.mxu2 %v4222_v38 }
  0xe0   : > { %v465_v4 = vadd.f32 %v4139_v48, %v464_v3 }
  0xe2   : > { %vm531_vm10 = vcmp.gt.f32.partialorder %v465_v4, 0.0  ;;  %v563_v6 = vmul.f32 0.1, %v465_v4 }
  0xe4   : > { %v595_v7 = vsel %vm531_vm10, %v465_v4, %v563_v6  ;;  %v700_v12 = vld [vmem:[#allocation2 + $0x78] sm:$0xff] }
  0xe5   : > { %667 = vst [vmem:[#allocation2 + $0x81] sm:$0xff] %v595_v7  ;;  %v4226_v41 = vpack.c.bf16 %v595_v7, %v594_v0  ;;  %v3681_v7 = vld [vmem:[%s5376_s2 + $0x170] sm:$0xff] }
  0xe6   : > { %1904 = vmatpush.bf16.msrb.mxu2 %v3681_v7 }
  0xe7   : > { %v467_v8 = vpop.f32.mrf.mxu0  ;;  %899 = vmatmul.bf16.gmra.mxu1 %v4226_v41 }
  0xe8   : > { %v468_v9 = vadd.f32 %v4139_v48, %v467_v8  ;;  %v3671_v8 = vld [vmem:[%s5376_s2 + $0x120] sm:$0xff] }
  0xea   : > { %vm532_vm11 = vcmp.gt.f32.partialorder %v468_v9, 0.0  ;;  %v564_v10 = vmul.f32 0.1, %v468_v9  ;;  %1445 = vmatmul.bf16.vlgmr.msrb.gmra.mxu0 %v4154_v5 }
  0xec   : > { %v596_v11 = vsel %vm532_vm11, %v468_v9, %v564_v10  ;;  %v701_v13 = vld [vmem:[#allocation2 + $0x80] sm:$0xff] }
  0xed   : > { %668 = vst [vmem:[#allocation2 + $0x91] sm:$0xff] %v596_v11  ;;  %v4231_v15 = vpack.c.bf16 %v701_v13, %v700_v12  ;;  %v3680_v12 = vld [vmem:[%s5376_s2 + $0x168] sm:$0xff]  ;;  %v3670_v13 = vld [vmem:[%s5376_s2 + $0x118] sm:$0xff] }
  0xee   : > { %1905 = vmatpush.bf16.msrb.mxu2 %v3680_v12 }
  0xef   : > { %v469_v16 = vpop.f32.mrf.mxu0  ;;  %1036 = vmatmul.bf16.gmra.mxu2 %v4231_v15 }
  0xf0   : > { %v470_v18 = vadd.f32 %v4139_v48, %v469_v16 }
  0xf2   : > { %vm533_vm12 = vcmp.gt.f32.partialorder %v470_v18, 0.0  ;;  %v565_v20 = vmul.f32 0.1, %v470_v18 }
  0xf4   : > { %v597_v22 = vsel %vm533_vm12, %v470_v18, %v565_v20  ;;  %v702_v28 = vld [vmem:[#allocation2 + $0x90] sm:$0xff]  ;;  %v4297_v20 = vpop.f32.mrf.mxu2 }
  0xf5   : > { %669 = vst [vmem:[#allocation2 + $0x99] sm:$0xff] %v597_v22  ;;  %v4235_v23 = vpack.c.bf16 %v597_v22, %v596_v11 }
  0xf7   : > { %v472_v24 = vpop.f32.mrf.mxu0  ;;  %904 = vmatmul.bf16.gmra.mxu1 %v4235_v23 }
  0xf8   : > { %v473_v5 = vadd.f32 %v4139_v48, %v472_v24  ;;  %v3679_v24 = vld [vmem:[%s5376_s2 + $0x160] sm:$0xff] }
  0xf9   : > { %1906 = vmatpush.bf16.msrb.mxu2 %v3679_v24 }
  0xfa   : > { %vm534_vm13 = vcmp.gt.f32.partialorder %v473_v5, 0.0  ;;  %v566_v25 = vmul.f32 0.1, %v473_v5  ;;  %1450 = vmatmul.bf16.gmra.mxu0 %v4181_v33  ;;  %v4246_v33 = vadd.f32 %v1012_v39, %v875_v37 }
  0xfc   : > { %v598_v26 = vsel %vm534_vm13, %v473_v5, %v566_v25  ;;  %v703_v30 = vld [vmem:[#allocation2 + $0x98] sm:$0xff]  ;;  %v3669_v5 = vld [vmem:[%s5376_s2 + $0x110] sm:$0xff] }
  0xfd   : > { %670 = vst [vmem:[#allocation2 + $0xa9] sm:$0xff] %v598_v26  ;;  %v4240_v31 = vpack.c.bf16 %v703_v30, %v702_v28 }
  0xff   : > { %v474_v34 = vpop.f32.mrf.mxu0  ;;  %1041 = vmatmul.bf16.gmra.mxu2 %v4240_v31 }
 0x100   : > { %v475_v35 = vadd.f32 %v4139_v48, %v474_v34 }
 0x102   : > { %vm535_vm14 = vcmp.gt.f32.partialorder %v475_v35, 0.0  ;;  %v567_v36 = vmul.f32 0.1, %v475_v35 }
 0x104   : > { %v599_v17 = vsel %vm535_vm14, %v475_v35, %v567_v36  ;;  %v704_v46 = vld [vmem:[#allocation2 + $0xa8] sm:$0xff] }
 0x105   : > { %671 = vst [vmem:[#allocation2 + $0xb1] sm:$0xff] %v599_v17  ;;  %v4244_v40 = vpack.c.bf16 %v599_v17, %v598_v26  ;;  %v3668_v35 = vld [vmem:[%s5376_s2 + $0x108] sm:$0xff] }
 0x107   : > { %v477_v42 = vpop.f32.mrf.mxu0  ;;  %909 = vmatmul.bf16.gmra.mxu1 %v4244_v40 }
 0x108   : > { %v478_v19 = vadd.f32 %v4139_v48, %v477_v42  ;;  %v3677_v42 = vld [vmem:[%s5376_s2 + $0x150] sm:$0xff] }
 0x10a   : > { %vm536_vm15 = vcmp.gt.f32.partialorder %v478_v19, 0.0  ;;  %v568_v44 = vmul.f32 0.1, %v478_v19  ;;  %1455 = vmatmul.bf16.gmra.mxu0 %v4208_v54 }
 0x10c   : > { %v600_v45 = vsel %vm536_vm15, %v478_v19, %v568_v44  ;;  %v705_v47 = vld [vmem:[#allocation2 + $0xb0] sm:$0xff]  ;;  %v3667_v19 = vld [vmem:[%s5376_s2 + $0x100] sm:$0xff] }
 0x10d   : > { %672 = vst [vmem:[#allocation2 + $0xc1] sm:$0xff] %v600_v45  ;;  %v4251_v49 = vpack.c.bf16 %v705_v47, %v704_v46 }
 0x10f   : > { %v479_v21 = vpop.f32.mrf.mxu0  ;;  %1046 = vmatmul.bf16.gmra.mxu2 %v4251_v49 }
 0x110   : > { %v480_v51 = vadd.f32 %v4139_v48, %v479_v21 }
 0x112   : > { %vm537_vm1 = vcmp.gt.f32.partialorder %v480_v51, 0.0  ;;  %v569_v52 = vmul.f32 0.1, %v480_v51 }
 0x114   : > { %v601_v53 = vsel %vm537_vm1, %v480_v51, %v569_v52  ;;  %v706_v32 = vld [vmem:[#allocation2 + $0xc0] sm:$0xff] }
 0x115   : > { %673 = vst [vmem:[#allocation2 + $0xc9] sm:$0xff] %v601_v53  ;;  %v4258_v54 = vpack.c.bf16 %v601_v53, %v600_v45 }
 0x117   : > { %v482_v55 = vpop.f32.mrf.mxu0  ;;  %914 = vmatmul.bf16.gmra.mxu1 %v4258_v54 }
 0x118   : > { %v483_v27 = vadd.f32 %v4139_v48, %v482_v55  ;;  %v3675_v55 = vld [vmem:[%s5376_s2 + $0x140] sm:$0xff] }
 0x11a   : > { %vm538_vm2 = vcmp.gt.f32.partialorder %v483_v27, 0.0  ;;  %v570_v56 = vmul.f32 0.1, %v483_v27  ;;  %1460 = vmatmul.bf16.gmra.mxu0 %v4222_v38  ;;  %v3672_v38 = vld [vmem:[%s5376_s2 + $0x128] sm:$0xff] }
 0x11b   : > { %1672 = vmatpush.bf16.msrb.mxu1 %v3672_v38 }
 0x11c   : > { %v602_v63 = vsel %vm538_vm2, %v483_v27, %v570_v56  ;;  %v707_v0 = vld [vmem:[#allocation2 + $0xc8] sm:$0xff] }
 0x11d   : > { %674 = vst [vmem:[#allocation2 + $0xd9] sm:$0xff] %v602_v63  ;;  %v4270_v1 = vpack.c.bf16 %v707_v0, %v706_v32 }
 0x11f   : > { %v484_v3 = vpop.f32.mrf.mxu0  ;;  %1051 = vmatmul.bf16.gmra.mxu2 %v4270_v1  ;;  %1673 = vmatpush.bf16.msrb.mxu1 %v3671_v8 }
 0x120   : > { %v485_v4 = vadd.f32 %v4139_v48, %v484_v3 }
 0x122   : > { %vm539_vm3 = vcmp.gt.f32.partialorder %v485_v4, 0.0  ;;  %v571_v6 = vmul.f32 0.1, %v485_v4 }
 0x123   : > { %1674 = vmatpush.bf16.msrb.mxu1 %v3670_v13 }
 0x124   : > { %v603_v9 = vsel %vm539_vm3, %v485_v4, %v571_v6  ;;  %v880_v10 = vpop.f32.mrf.mxu1  ;;  %v708_v26 = vld [vmem:[#allocation2 + $0xd8] sm:$0xff] }
 0x125   : > { %675 = vst [vmem:[#allocation2 + $0xe1] sm:$0xff] %v603_v9  ;;  %v4287_v11 = vpack.c.bf16 %v603_v9, %v602_v63  ;;  %v507_v63 = vpop.f32.mrf.mxu3 }
 0x127   : > { %v487_v16 = vpop.f32.mrf.mxu0  ;;  %919 = vmatmul.bf16.gmra.mxu1 %v4287_v11 }
 0x128   : > { %v488_v18 = vadd.f32 %v4139_v48, %v487_v16  ;;  %1675 = vmatpush.bf16.msrb.mxu1 %v3669_v5 }
 0x12a   : > { %vm540_vm4 = vcmp.gt.f32.partialorder %v488_v18, 0.0  ;;  %v572_v22 = vmul.f32 0.1, %v488_v18  ;;  %1465 = vmatmul.bf16.gmra.mxu0 %v4231_v15  ;;  %v3678_v15 = vld [vmem:[%s5376_s2 + $0x158] sm:$0xff] }
 0x12b   : > { %1907 = vmatpush.bf16.msrb.mxu2 %v3678_v15 }
 0x12c   : > { %v604_v25 = vsel %vm540_vm4, %v488_v18, %v572_v22  ;;  %v709_v28 = vld [vmem:[#allocation2 + $0xe0] sm:$0xff]  ;;  %v882_v30 = vpop.f32.mrf.mxu1  ;;  %1676 = vmatpush.bf16.msrb.mxu1 %v3668_v35 }
 0x12d   : > { %676 = vst [vmem:[#allocation2 + $0xf1] sm:$0xff] %v604_v25  ;;  %v4306_v34 = vpack.c.bf16 %v709_v28, %v708_v26 }
 0x12f   : > { %v489_v36 = vpop.f32.mrf.mxu0  ;;  %1056 = vmatmul.bf16.gmra.mxu2 %v4306_v34 }
 0x130   : > { %v490_v17 = vadd.f32 %v4139_v48, %v489_v36  ;;  %1908 = vmatpush.bf16.msrb.mxu2 %v3677_v42  ;;  %1677 = vmatpush.bf16.msrb.mxu1 %v3667_v19 }
 0x132   : > { %vm541_vm5 = vcmp.gt.f32.partialorder %v490_v17, 0.0  ;;  %v573_v37 = vmul.f32 0.1, %v490_v17  ;;  %v1017_v39 = vpop.f32.mrf.mxu2 }
 0x133   : > { %v4322_v44 = vadd.f32 %v1017_v39, %v880_v10  ;;  %v509_v10 = vpop.f32.mrf.mxu3 }
 0x134   : > { %v4324_v45 = vsel %vm541_vm5, %v490_v17, %v573_v37  ;;  %v885_v46 = vpop.f32.mrf.mxu1  ;;  %1909 = vmatpush.bf16.msrb.mxu2 %v3676_v50  ;;  %v710_v58 = vld [vmem:[#allocation2 + $0xf0] sm:$0xff]  ;;  %v510_v13 = vadd.f32 %v4139_v48, %v509_v10 }
 0x135   : > { %677 = vst [vmem:[#allocation2 + $0xf9] sm:$0xff] %v4324_v45  ;;  %v796_v47 = vpack.c.bf16 %v4324_v45, %v604_v25 }
 0x136   : > { %vm549_vm9 = vcmp.gt.f32.partialorder %v510_v13, 0.0  ;;  %v581_v18 = vmul.f32 0.1, %v510_v13 }
 0x137   : > { %v492_v21 = vpop.f32.mrf.mxu0  ;;  %924 = vmatmul.bf16.gmra.mxu1 %v796_v47 }
 0x138   : > { %v493_v51 = vadd.f32 %v4139_v48, %v492_v21  ;;  %1910 = vmatpush.bf16.msrb.mxu2 %v3675_v55  ;;  %v4356_v25 = vsel %vm549_vm9, %v510_v13, %v581_v18 }
 0x139   : > { %685 = vst [vmem:[#allocation2 + $0x159] sm:$0xff] %v4356_v25 }
 0x13a   : > { %vm542_vm6 = vcmp.gt.f32.partialorder %v493_v51, 0.0  ;;  %v574_v52 = vmul.f32 0.1, %v493_v51  ;;  %v1019_v53 = vpop.f32.mrf.mxu2  ;;  %1470 = vmatmul.bf16.gmra.mxu0 %v4240_v31  ;;  %v508_v31 = vadd.f32 %v4139_v48, %v507_v63  ;;  %v1791_v63 = vld [vmem:[#allocation2 + $0x1a] sm:$0xff] }
 0x13b   : > { %v4336_v27 = vadd.f32 %v1019_v53, %v882_v30  ;;  %v512_v36 = vpop.f32.mrf.mxu3 }
 0x13c   : > { %v606_v56 = vsel %vm542_vm6, %v493_v51, %v574_v52  ;;  %v711_v59 = vld [vmem:[#allocation2 + $0xf8] sm:$0xff]  ;;  %v887_v29 = vpop.f32.mrf.mxu1  ;;  %vm548_vm7 = vcmp.gt.f32.partialorder %v508_v31, 0.0  ;;  %v580_v2 = vmul.f32 0.1, %v508_v31  ;;  %v513_v37 = vadd.f32 %v4139_v48, %v512_v36 }
 0x13d   : > { %678 = vst [vmem:[#allocation2 + $0x109] sm:$0xff] %v606_v56  ;;  %v4338_v62 = vpack.c.bf16 %v711_v59, %v710_v58 }
 0x13e   : > { %v4345_v6 = vsel %vm548_vm7, %v508_v31, %v580_v2  ;;  %vm550_vm11 = vcmp.gt.f32.partialorder %v513_v37, 0.0  ;;  %v582_v39 = vmul.f32 0.1, %v513_v37 }
 0x13f   : > { %v494_v32 = vpop.f32.mrf.mxu0  ;;  %1061 = vmatmul.bf16.gmra.mxu2 %v4338_v62  ;;  %684 = vst [vmem:[#allocation2 + $0x151] sm:$0xff] %v4345_v6 }
 0x140   : > { %v495_v0 = vadd.f32 %v4139_v48, %v494_v32  ;;  %v4366_v47 = vsel %vm550_vm11, %v513_v37, %v582_v39  ;;  %v1792_v32 = vld [vmem:[#allocation2 + $0x22] sm:$0xff] }
 0x141   : > { %686 = vst [vmem:[#allocation2 + $0x169] sm:$0xff] %v4366_v47 }
 0x142   : > { %vm543_vm8 = vcmp.gt.f32.partialorder %v495_v0, 0.0  ;;  %v575_v38 = vmul.f32 0.1, %v495_v0  ;;  %v1022_v3 = vpop.f32.mrf.mxu2 }
 0x143   : > { %v4343_v4 = vadd.f32 %v1022_v3, %v885_v46  ;;  %v514_v52 = vpop.f32.mrf.mxu3 }
 0x144   : > { %v607_v7 = vsel %vm543_vm8, %v495_v0, %v575_v38  ;;  %v890_v8 = vpop.f32.mrf.mxu1  ;;  %v712_v28 = vld [vmem:[#allocation2 + $0x108] sm:$0xff]  ;;  %v515_v55 = vadd.f32 %v4139_v48, %v514_v52 }
 0x145   : > { %679 = vst [vmem:[#allocation2 + $0x111] sm:$0xff] %v607_v7  ;;  %v4348_v9 = vpack.c.bf16 %v607_v7, %v606_v56 }
 0x146   : > { %vm551_vm13 = vcmp.gt.f32.partialorder %v515_v55, 0.0  ;;  %v583_v58 = vmul.f32 0.1, %v515_v55 }
 0x147   : > { %v497_v12 = vpop.f32.mrf.mxu0  ;;  %929 = vmatmul.bf16.gmra.mxu1 %v4348_v9 }
 0x148   : > { %v498_v16 = vadd.f32 %v4139_v48, %v497_v12  ;;  %v615_v0 = vsel %vm551_vm13, %v515_v55, %v583_v58 }
 0x149   : > { %687 = vst [vmem:[#allocation2 + $0x171] sm:$0xff] %v615_v0 }
 0x14a   : > { %vm544_vm10 = vcmp.gt.f32.partialorder %v498_v16, 0.0  ;;  %v576_v22 = vmul.f32 0.1, %v498_v16  ;;  %v1024_v24 = vpop.f32.mrf.mxu2  ;;  %1475 = vmatmul.bf16.gmra.mxu0 %v4251_v49 }
 0x14b   : > { %v4354_v5 = vadd.f32 %v1024_v24, %v887_v29  ;;  %v1793_v24 = vld [vmem:[#allocation2 + $0x32] sm:$0xff] }
 0x14c   : > { %v608_v26 = vsel %vm544_vm10, %v498_v16, %v576_v22  ;;  %v713_v30 = vld [vmem:[#allocation2 + $0x110] sm:$0xff]  ;;  %v892_v15 = vpop.f32.mrf.mxu1 }
 0x14d   : > { %680 = vst [vmem:[#allocation2 + $0x121] sm:$0xff] %v608_v26  ;;  %v4359_v35 = vpack.c.bf16 %v713_v30, %v712_v28 }
 0x14f   : > { %v499_v17 = vpop.f32.mrf.mxu0  ;;  %1066 = vmatmul.bf16.gmra.mxu2 %v4359_v35 }
 0x150   : > { %v500_v49 = vadd.f32 %v4139_v48, %v499_v17 }
 0x152   : > { %vm545_vm12 = vcmp.gt.f32.partialorder %v500_v49, 0.0  ;;  %v577_v42 = vmul.f32 0.1, %v500_v49  ;;  %v1027_v19 = vpop.f32.mrf.mxu2 }
 0x153   : > { %v4364_v46 = vadd.f32 %v1027_v19, %v890_v8  ;;  %v1796_v19 = vld [vmem:[#allocation2 + $0x52] sm:$0xff] }
 0x154   : > { %v609_v50 = vsel %vm545_vm12, %v500_v49, %v577_v42  ;;  %v895_v21 = vpop.f32.mrf.mxu1  ;;  %v1795_v42 = vld [vmem:[#allocation2 + $0x4a] sm:$0xff] }
 0x155   : > { %681 = vst [vmem:[#allocation2 + $0x129] sm:$0xff] %v609_v50  ;;  %v4369_v51 = vpack.c.bf16 %v609_v50, %v608_v26  ;;  %v1794_v26 = vld [vmem:[#allocation2 + $0x3a] sm:$0xff] }
 0x157   : > { %v502_v53 = vpop.f32.mrf.mxu0  ;;  %934 = vmatmul.bf16.vlgmr.msrb.gmra.mxu3 %v4369_v51  ;;  %1678 = vmatmul.bf16.vlgmr.msrb.gmra.mxu1 %v4146_v60  ;;  %v4378_v60 = vpack.c.bf16 %v1792_v32, %v1791_v63  ;;  %v1798_v63 = vld [vmem:[#allocation2 + $0x6a] sm:$0xff] }
 0x158   : > { %v503_v56 = vadd.f32 %v4139_v48, %v502_v53 }
 0x15a   : > { %vm546_vm14 = vcmp.gt.f32.partialorder %v503_v56, 0.0  ;;  %v578_v59 = vmul.f32 0.1, %v503_v56  ;;  %v1029_v29 = vpop.f32.mrf.mxu2  ;;  %1480 = vmatmul.bf16.gmra.mxu0 %v4270_v1 }
 0x15b   : > { %v4376_v31 = vadd.f32 %v1029_v29, %v892_v15  ;;  %v4393_v15 = vpack.c.bf16 %v1794_v26, %v1793_v24  ;;  %v1797_v29 = vld [vmem:[#allocation2 + $0x62] sm:$0xff]  ;;  %v1799_v24 = vld [vmem:[#allocation2 + $0x7a] sm:$0xff] }
 0x15c   : > { %v610_v2 = vsel %vm546_vm14, %v503_v56, %v578_v59  ;;  %v897_v38 = vpop.f32.mrf.mxu1  ;;  %v4425_v56 = vpack.c.bf16 %v615_v0, %v4366_v47  ;;  %v4437_v0 = vpack.c.bf16 %v1798_v63, %v1797_v29  ;;  %v1800_v26 = vld [vmem:[#allocation2 + $0x82] sm:$0xff] }
 0x15d   : > { %682 = vst [vmem:[#allocation2 + $0x139] sm:$0xff] %v610_v2 }
 0x15f   : > { %v504_v3 = vpop.f32.mrf.mxu0  ;;  %1911 = vmatmul.bf16.vlgmr.msrb.gmra.mxu2 %v4378_v60 }
 0x160   : > { %v505_v7 = vadd.f32 %v4139_v48, %v504_v3  ;;  %v1348_v3 = vld [vmem:[#allocation2 + $0x128] sm:$0xff] }
 0x162   : > { %vm547_vm15 = vcmp.gt.f32.partialorder %v505_v7, 0.0  ;;  %v579_v8 = vmul.f32 0.1, %v505_v7  ;;  %v1032_v10 = vpop.f32.mrf.mxu2 }
 0x163   : > { %v4382_v1 = vadd.f32 %v1032_v10, %v895_v21  ;;  %v3658_v21 = vld [vmem:[%s5376_s2 + $0xb8] sm:$0xff] }
 0x164   : > { %v611_v12 = vsel %vm547_vm15, %v505_v7, %v579_v8  ;;  %v900_v13 = vpop.f32.mrf.mxu1  ;;  %1204 = vmatpush.bf16.msrb.mxu3 %v3658_v21  ;;  %v1347_v8 = vld [vmem:[#allocation2 + $0x120] sm:$0xff] }
 0x165   : > { %683 = vst [vmem:[#allocation2 + $0x141] sm:$0xff] %v611_v12  ;;  %v4384_v16 = vpack.c.bf16 %v611_v12, %v610_v2  ;;  %v3656_v2 = vld [vmem:[%s5376_s2 + $0xa8] sm:$0xff]  ;;  %v1368_v12 = vpack.c.bf16 %v1348_v3, %v1347_v8 }
 0x167   : > { %v4386_v18 = vpop.f32.mrf.mxu0  ;;  %939 = vmatmul.bf16.gmra.mxu3 %v4384_v16  ;;  %1683 = vmatmul.bf16.gmra.mxu1 %v4166_v14  ;;  %v4402_v14 = vpack.c.bf16 %v4356_v25, %v4345_v6  ;;  %v4414_v6 = vpack.c.bf16 %v1796_v19, %v1795_v42  ;;  %v517_v19 = vpop.f32.mrf.mxu3 }
 0x16a   : > { %v1034_v22 = vpop.f32.mrf.mxu2  ;;  %1485 = vmatmul.bf16.gmra.mxu0 %v4306_v34 }
 0x16b   : > { %v4391_v28 = vadd.f32 %v1034_v22, %v897_v38 }
 0x16c   : > { %v902_v30 = vpop.f32.mrf.mxu1 }
 0x16f   : > { %v4395_v36 = vpop.f32.mrf.mxu0  ;;  %1916 = vmatmul.bf16.gmra.mxu2 %v4393_v15 }
 0x170   : > { %5383 = vst [vmem:[#allocation10_spill] sm:$0xff] %v4395_v36 }
 0x172   : > { %v1037_v17 = vpop.f32.mrf.mxu2 }
 0x173   : > { %v4398_v37 = vadd.f32 %v1037_v17, %v900_v13  ;;  %v3654_v17 = vld [vmem:[%s5376_s2 + $0x98] sm:$0xff] }
 0x174   : > { %v905_v49 = vpop.f32.mrf.mxu1 }
 0x177   : > { %v4404_v34 = vpop.f32.mrf.mxu0  ;;  %944 = vmatmul.bf16.gmra.mxu3 %v4402_v14  ;;  %1688 = vmatmul.bf16.gmra.mxu1 %v4195_v43 }
 0x178   : > { %5384 = vst [vmem:[#allocation11_spill] sm:$0xff] %v4404_v34 }
 0x17a   : > { %v1039_v39 = vpop.f32.mrf.mxu2  ;;  %1490 = vmatmul.bf16.gmra.mxu0 %v4338_v62  ;;  %v3657_v62 = vld [vmem:[%s5376_s2 + $0xb0] sm:$0xff] }
 0x17b   : > { %v4409_v50 = vadd.f32 %v1039_v39, %v902_v30  ;;  %1205 = vmatpush.bf16.msrb.mxu3 %v3657_v62  ;;  %v4455_v39 = vpack.c.bf16 %v1800_v26, %v1799_v24 }
 0x17c   : > { %v907_v52 = vpop.f32.mrf.mxu1 }
 0x17f   : > { %v4416_v25 = vpop.f32.mrf.mxu0  ;;  %1921 = vmatmul.bf16.gmra.mxu2 %v4414_v6  ;;  %1206 = vmatpush.bf16.msrb.mxu3 %v3656_v2 }
 0x180   : > { %5385 = vst [vmem:[#allocation12_spill] sm:$0xff] %v4416_v25 }
 0x182   : > { %v1042_v43 = vpop.f32.mrf.mxu2 }
 0x183   : > { %v4419_v53 = vadd.f32 %v1042_v43, %v905_v49 }
 0x184   : > { %v910_v55 = vpop.f32.mrf.mxu1 }
 0x187   : > { %v4427_v58 = vpop.f32.mrf.mxu0  ;;  %949 = vmatmul.bf16.gmra.mxu3 %v4425_v56  ;;  %1693 = vmatmul.bf16.gmra.mxu1 %v4216_v61 }
 0x188   : > { %5386 = vst [vmem:[#allocation13_spill] sm:$0xff] %v4427_v58 }
 0x18a   : > { %v1044_v59 = vpop.f32.mrf.mxu2  ;;  %1495 = vmatmul.bf16.gmra.mxu0 %v4359_v35  ;;  %v3655_v35 = vld [vmem:[%s5376_s2 + $0xa0] sm:$0xff] }
 0x18b   : > { %v4432_v32 = vadd.f32 %v1044_v59, %v907_v52  ;;  %1207 = vmatpush.bf16.msrb.mxu3 %v3655_v35  ;;  %v1350_v52 = vld [vmem:[#allocation2 + $0x140] sm:$0xff]  ;;  %v1349_v59 = vld [vmem:[#allocation2 + $0x138] sm:$0xff] }
 0x18c   : > { %v912_v47 = vpop.f32.mrf.mxu1  ;;  %v1369_v63 = vpack.c.bf16 %v1350_v52, %v1349_v59  ;;  %v3698_v35 = vld [vmem:[%s5376_s2 + $0x1f8] sm:$0xff]  ;;  %v3651_v59 = vld [vmem:[%s5376_s2 + $0x80] sm:$0xff] }
 0x18d   : > { %2370 = vmatpush.bf16.msra.mxu0 %v3698_v35  ;;  %v3695_v35 = vld [vmem:[%s5376_s2 + $0x1e0] sm:$0xff] }
 0x18f   : > { %v4439_v38 = vpop.f32.mrf.mxu0  ;;  %1926 = vmatmul.bf16.gmra.mxu2 %v4437_v0  ;;  %1208 = vmatpush.bf16.msrb.mxu3 %v3654_v17 }
 0x190   : > { %5387 = vst [vmem:[#allocation14_spill] sm:$0xff] %v4439_v38  ;;  %v2261_v38 = vld [vmem:[#allocation2 + $0x51] sm:$0xff] }
 0x192   : > { %v1047_v61 = vpop.f32.mrf.mxu2 }
 0x193   : > { %v4442_v7 = vadd.f32 %v1047_v61, %v910_v55  ;;  %v3653_v55 = vld [vmem:[%s5376_s2 + $0x90] sm:$0xff]  ;;  %v519_v61 = vpop.f32.mrf.mxu3 }
 0x194   : > { %v915_v10 = vpop.f32.mrf.mxu1  ;;  %1209 = vmatpush.bf16.msrb.mxu3 %v3653_v55  ;;  %v520_v3 = vadd.f32 %v4139_v48, %v519_v61  ;;  %v1352_v55 = vld [vmem:[#allocation2 + $0x158] sm:$0xff] }
 0x196   : > { %vm553_vm2 = vcmp.gt.f32.partialorder %v520_v3, 0.0  ;;  %v585_v24 = vmul.f32 0.1, %v520_v3 }
 0x197   : > { %v4447_v13 = vpop.f32.mrf.mxu0  ;;  %1071 = vmatmul.bf16.vlgmr.msra.gmra.mxu3 %v1368_v12  ;;  %1698 = vmatmul.bf16.gmra.mxu1 %v4226_v41  ;;  %v518_v41 = vadd.f32 %v4139_v48, %v517_v19  ;;  %v3697_v19 = vld [vmem:[%s5376_s2 + $0x1f0] sm:$0xff] }
 0x198   : > { %5388 = vst [vmem:[#allocation15_spill] sm:$0xff] %v4447_v13  ;;  %v4483_v48 = vsel %vm553_vm2, %v520_v3, %v585_v24  ;;  %2371 = vmatpush.bf16.msra.mxu0 %v3697_v19 }
 0x199   : > { %vm552_vm1 = vcmp.gt.f32.partialorder %v518_v41, 0.0  ;;  %v584_v62 = vmul.f32 0.1, %v518_v41  ;;  %689 = vst [vmem:[#allocation2 + $0x189] sm:$0xff] %v4483_v48 }
 0x19a   : > { %v1049_v22 = vpop.f32.mrf.mxu2  ;;  %1500 = vmatmul.bf16.gmra.mxu0 %v1368_v12  ;;  %v1802_v12 = vld [vmem:[#allocation2 + $0x9a] sm:$0xff] }
 0x19b   : > { %v4450_v30 = vadd.f32 %v1049_v22, %v912_v47  ;;  %v4466_v2 = vsel %vm552_vm1, %v518_v41, %v584_v62  ;;  %v1351_v62 = vld [vmem:[#allocation2 + $0x150] sm:$0xff] }
 0x19c   : > { %v917_v49 = vpop.f32.mrf.mxu1  ;;  %688 = vst [vmem:[#allocation2 + $0x181] sm:$0xff] %v4466_v2  ;;  %v1370_v3 = vpack.c.bf16 %v1352_v55, %v1351_v62  ;;  %v1353_v55 = vld [vmem:[#allocation2 + $0x168] sm:$0xff] }
 0x19f   : > { %v4457_v42 = vpop.f32.mrf.mxu0  ;;  %1931 = vmatmul.bf16.gmra.mxu2 %v4455_v39 }
 0x1a0   : > { %5389 = vst [vmem:[#allocation16_spill] sm:$0xff] %v4457_v42 }
 0x1a2   : > { %v1052_v21 = vpop.f32.mrf.mxu2 }
 0x1a3   : > { %v4461_v43 = vadd.f32 %v1052_v21, %v915_v10  ;;  %v1801_v10 = vld [vmem:[#allocation2 + $0x92] sm:$0xff]  ;;  %v3696_v21 = vld [vmem:[%s5376_s2 + $0x1e8] sm:$0xff] }
 0x1a4   : > { %v920_v29 = vpop.f32.mrf.mxu1  ;;  %v4481_v17 = vpack.c.bf16 %v1802_v12, %v1801_v10  ;;  %2372 = vmatpush.bf16.msra.mxu0 %v3696_v21  ;;  %v1804_v12 = vld [vmem:[#allocation2 + $0xb2] sm:$0xff] }
 0x1a7   : > { %v4469_v47 = vpop.f32.mrf.mxu0  ;;  %1076 = vmatmul.bf16.gmra.mxu3 %v1369_v63  ;;  %1703 = vmatmul.bf16.gmra.mxu1 %v4235_v23  ;;  %v3652_v23 = vld [vmem:[%s5376_s2 + $0x88] sm:$0xff] }
 0x1a8   : > { %5390 = vst [vmem:[#allocation17_spill] sm:$0xff] %v4469_v47  ;;  %1210 = vmatpush.bf16.msrb.mxu3 %v3652_v23  ;;  %2373 = vmatpush.bf16.msra.mxu0 %v3695_v35 }
 0x1aa   : > { %v1054_v8 = vpop.f32.mrf.mxu2  ;;  %1505 = vmatmul.bf16.gmra.mxu0 %v1369_v63 }
 0x1ab   : > { %v4476_v22 = vadd.f32 %v1054_v8, %v917_v49  ;;  %v3694_v8 = vld [vmem:[%s5376_s2 + $0x1d8] sm:$0xff]  ;;  %v1093_v49 = vld [vmem:[#allocation2 + $0xa] sm:$0xff] }
 0x1ac   : > { %v922_v26 = vpop.f32.mrf.mxu1  ;;  %1211 = vmatpush.bf16.msrb.mxu3 %v3651_v59  ;;  %2374 = vmatpush.bf16.msra.mxu0 %v3694_v8  ;;  %v1354_v59 = vld [vmem:[#allocation2 + $0x170] sm:$0xff] }
 0x1af   : > { %1936 = vmatmul.bf16.gmra.mxu2 %v4481_v17  ;;  %v4492_v41 = vpop.f32.mrf.mxu0 }
 0x1b0   : > { %5391 = vst [vmem:[#allocation18_spill] sm:$0xff] %v4492_v41  ;;  %v1356_v41 = vld [vmem:[#allocation2 + $0x188] sm:$0xff] }
 0x1b2   : > { %v1057_v52 = vpop.f32.mrf.mxu2 }
 0x1b3   : > { %v4500_v63 = vadd.f32 %v1057_v52, %v920_v29  ;;  %v1803_v29 = vld [vmem:[#allocation2 + $0xaa] sm:$0xff]  ;;  %v3690_v52 = vld [vmem:[%s5376_s2 + $0x1b8] sm:$0xff] }
 0x1b4   : > { %v925_v61 = vpop.f32.mrf.mxu1  ;;  %v4513_v21 = vpack.c.bf16 %v1804_v12, %v1803_v29  ;;  %2137 = vmatpush.bf16.msra.mxu3 %v3690_v52  ;;  %v3691_v29 = vld [vmem:[%s5376_s2 + $0x1c0] sm:$0xff]  ;;  %v3706_v12 = vld [vmem:[%s5376_s2 + $0x238] sm:$0xff]  ;;  %v1806_v52 = vld [vmem:[#allocation2 + $0xca] sm:$0xff] }
 0x1b5   : > { %2603 = vmatpush.bf16.msra.mxu1 %v3706_v12 }
 0x1b7   : > { %1081 = vmatmul.bf16.gmra.mxu3 %v1370_v3  ;;  %1708 = vmatmul.bf16.gmra.mxu1 %v4244_v40  ;;  %v4509_v24 = vpop.f32.mrf.mxu0  ;;  %v3693_v40 = vld [vmem:[%s5376_s2 + $0x1d0] sm:$0xff] }
 0x1b8   : > { %5392 = vst [vmem:[#allocation19_spill] sm:$0xff] %v4509_v24  ;;  %2375 = vmatpush.bf16.msra.mxu0 %v3693_v40  ;;  %v1805_v40 = vld [vmem:[#allocation2 + $0xc2] sm:$0xff] }
 0x1ba   : > { %v1059_v10 = vpop.f32.mrf.mxu2  ;;  %1510 = vmatmul.bf16.gmra.mxu0 %v1370_v3 }
 0x1bb   : > { %v4511_v23 = vadd.f32 %v1059_v10, %v922_v26  ;;  %v3692_v26 = vld [vmem:[%s5376_s2 + $0x1c8] sm:$0xff]  ;;  %v1371_v10 = vpack.c.bf16 %v1354_v59, %v1353_v55  ;;  %v4538_v55 = vpack.c.bf16 %v1806_v52, %v1805_v40  ;;  %v1807_v52 = vld [vmem:[#allocation2 + $0xda] sm:$0xff] }
 0x1bc   : > { %v927_v19 = vpop.f32.mrf.mxu1  ;;  %2376 = vmatpush.bf16.msra.mxu0 %v3692_v26 }
 0x1bf   : > { %1941 = vmatmul.bf16.gmra.mxu2 %v4513_v21  ;;  %v4527_v8 = vpop.f32.mrf.mxu0 }
 0x1c0   : > { %5393 = vst [vmem:[#allocation20_spill] sm:$0xff] %v4527_v8  ;;  %2377 = vmatpush.bf16.msra.mxu0 %v3691_v29 }
 0x1c2   : > { %v1062_v62 = vpop.f32.mrf.mxu2 }
 0x1c3   : > { %v4525_v3 = vadd.f32 %v1062_v62, %v925_v61 }
 0x1c4   : > { %v930_v35 = vpop.f32.mrf.mxu1 }
 0x1c7   : > { %1086 = vmatmul.bf16.gmra.mxu3 %v1371_v10  ;;  %1713 = vmatmul.bf16.gmra.mxu1 %v4258_v54  ;;  %v4540_v59 = vpop.f32.mrf.mxu0  ;;  %v1092_v54 = vld [vmem:[#allocation2 + $0x2] sm:$0xff] }
 0x1c8   : > { %5394 = vst [vmem:[#allocation21_spill] sm:$0xff] %v4540_v59  ;;  %v1124_v29 = vpack.c.bf16 %v1093_v49, %v1092_v54  ;;  %v1808_v59 = vld [vmem:[#allocation2 + $0xe2] sm:$0xff] }
 0x1c9   : > { %v4556_v49 = vpack.c.bf16 %v1808_v59, %v1807_v52  ;;  %v1809_v52 = vld [vmem:[#allocation2 + $0xf2] sm:$0xff] }
 0x1ca   : > { %v1064_v61 = vpop.f32.mrf.mxu2  ;;  %1515 = vmatmul.bf16.gmra.mxu0 %v1371_v10  ;;  %v1355_v10 = vld [vmem:[#allocation2 + $0x180] sm:$0xff] }
 0x1cb   : > { %v4536_v26 = vadd.f32 %v1064_v61, %v927_v19  ;;  %v1372_v19 = vpack.c.bf16 %v1356_v41, %v1355_v10  ;;  %v2258_v10 = vld [vmem:[#allocation2 + $0x31] sm:$0xff] }
 0x1cc   : > { %v932_v62 = vpop.f32.mrf.mxu1 }
 0x1cf   : > { %1946 = vmatmul.bf16.gmra.mxu2 %v4538_v55  ;;  %v4548_v61 = vpop.f32.mrf.mxu0 }
 0x1d0   : > { %5395 = vst [vmem:[#allocation22_spill] sm:$0xff] %v4548_v61 }
 0x1d2   : > { %v1067_v8 = vpop.f32.mrf.mxu2 }
 0x1d3   : > { %v4543_v24 = vadd.f32 %v1067_v8, %v930_v35  ;;  %v4564_v8 = vld [vmem:[#allocation2 + $0xf1] sm:$0xff] }
 0x1d4   : > { %v4545_v12 = vpop.f32.mrf.mxu1  ;;  %v1599_v59 = vpack.c.bf16 %v4324_v45, %v4564_v8 }
 0x1d7   : > { %1212 = vmatmul.bf16.vlgmr.msrb.gmra.mxu3 %v1124_v29  ;;  %1718 = vmatmul.bf16.gmra.mxu1 %v4287_v11  ;;  %v3689_v11 = vld [vmem:[%s5376_s2 + $0x1b0] sm:$0xff]  ;;  %v4566_v54 = vpop.f32.mrf.mxu0 }
 0x1d8   : > { %2138 = vmatpush.bf16.msra.mxu3 %v3689_v11  ;;  %5397 = vst [vmem:[#allocation24_spill] sm:$0xff] %v4566_v54  ;;  %v1810_v11 = vld [vmem:[#allocation2 + $0xfa] sm:$0xff] }
 0x1d9   : > { %v4580_v13 = vpack.c.bf16 %v1810_v11, %v1809_v52  ;;  %v1812_v52 = vld [vmem:[#allocation2 + $0x112] sm:$0xff] }
 0x1da   : > { %v1069_v40 = vpop.f32.mrf.mxu2  ;;  %1520 = vmatmul.bf16.gmra.mxu0 %v1372_v19  ;;  %v4550_v47 = vpop.f32.mrf.mxu3  ;;  %v3705_v19 = vld [vmem:[%s5376_s2 + $0x230] sm:$0xff] }
 0x1db   : > { %v4552_v42 = vadd.f32 %v1069_v40, %v932_v62  ;;  %v2259_v62 = vld [vmem:[#allocation2 + $0x39] sm:$0xff]  ;;  %2604 = vmatpush.bf16.msra.mxu1 %v3705_v19 }
 0x1dc   : > { %v4554_v35 = vpop.f32.mrf.mxu1  ;;  %v2290_v40 = vpack.c.bf16 %v2259_v62, %v2258_v10  ;;  %v2260_v62 = vld [vmem:[#allocation2 + $0x49] sm:$0xff] }
 0x1dd   : > { %5396 = vst [vmem:[#allocation23_spill] sm:$0xff] %v4554_v35  ;;  %v2291_v19 = vpack.c.bf16 %v2261_v38, %v2260_v62  ;;  %v2263_v62 = vld [vmem:[#allocation2 + $0x69] sm:$0xff] }
 0x1df   : > { %1951 = vmatmul.bf16.gmra.mxu2 %v4556_v49  ;;  %v4582_v45 = vpop.f32.mrf.mxu0 }
 0x1e0   : > { %5400 = vst [vmem:[#allocation27_spill] sm:$0xff] %v4582_v45 }
 0x1e2   : > { %v4562_v41 = vpop.f32.mrf.mxu3 }
 0x1e4   : > { %v4568_v29 = vpop.f32.mrf.mxu1 }
 0x1e5   : > { %5398 = vst [vmem:[#allocation25_spill] sm:$0xff] %v4568_v29 }
 0x1e7   : > { %1217 = vmatmul.bf16.gmra.mxu3 %v4378_v60  ;;  %1723 = vmatmul.bf16.gmra.mxu1 %v1599_v59  ;;  %v4591_v10 = vpop.f32.mrf.mxu0 }
 0x1e8   : > { %5402 = vst [vmem:[#allocation29_spill] sm:$0xff] %v4591_v10 }
 0x1ea   : > { %2378 = vmatmul.bf16.vlgmr.msra.gmra.mxu0 %v2290_v40  ;;  %v4576_v54 = vpop.f32.mrf.mxu3  ;;  %v1811_v40 = vld [vmem:[#allocation2 + $0x10a] sm:$0xff] }
 0x1eb   : > { %v4597_v58 = vpack.c.bf16 %v1812_v52, %v1811_v40  ;;  %v3704_v40 = vld [vmem:[%s5376_s2 + $0x228] sm:$0xff] }
 0x1ec   : > { %v4578_v61 = vpop.f32.mrf.mxu1  ;;  %2605 = vmatpush.bf16.msra.mxu1 %v3704_v40 }
 0x1ed   : > { %5399 = vst [vmem:[#allocation26_spill] sm:$0xff] %v4578_v61 }
 0x1ef   : > { %1956 = vmatmul.bf16.gmra.mxu2 %v4580_v13 }
 0x1f2   : > { %v4585_v60 = vpop.f32.mrf.mxu3 }
 0x1f4   : > { %v4587_v59 = vpop.f32.mrf.mxu1 }
 0x1f5   : > { %5401 = vst [vmem:[#allocation28_spill] sm:$0xff] %v4587_v59  ;;  %v3688_v59 = vld [vmem:[%s5376_s2 + $0x1a8] sm:$0xff] }
 0x1f6   : > { %2139 = vmatpush.bf16.msra.mxu3 %v3688_v59  ;;  %v1813_v59 = vld [vmem:[#allocation2 + $0x122] sm:$0xff] }
 0x1f7   : > { %1222 = vmatmul.bf16.gmra.mxu3 %v4393_v15  ;;  %1728 = vmatmul.bf16.gmra.mxu1 %v4348_v9  ;;  %v4603_v9 = vpop.f32.mrf.mxu0 }
 0x1f8   : > { %5404 = vst [vmem:[#allocation31_spill] sm:$0xff] %v4603_v9  ;;  %v1814_v9 = vld [vmem:[#allocation2 + $0x12a] sm:$0xff] }
 0x1f9   : > { %v4622_v29 = vpack.c.bf16 %v1814_v9, %v1813_v59  ;;  %v1815_v9 = vld [vmem:[#allocation2 + $0x13a] sm:$0xff]  ;;  %v1816_v59 = vld [vmem:[#allocation2 + $0x142] sm:$0xff] }
 0x1fa   : > { %2383 = vmatmul.bf16.gmra.mxu0 %v2291_v19  ;;  %v4593_v11 = vpop.f32.mrf.mxu3  ;;  %v2262_v19 = vld [vmem:[#allocation2 + $0x61] sm:$0xff] }
 0x1fb   : > { %v2292_v52 = vpack.c.bf16 %v2263_v62, %v2262_v19  ;;  %v2265_v62 = vld [vmem:[#allocation2 + $0x81] sm:$0xff] }
 0x1fc   : > { %v4595_v45 = vpop.f32.mrf.mxu1 }
 0x1fd   : > { %5403 = vst [vmem:[#allocation30_spill] sm:$0xff] %v4595_v45  ;;  %v4614_v45 = vpop.f32.mrf.mxu2 }
 0x1fe   : > { %5406 = vst [vmem:[#allocation33_spill] sm:$0xff] %v4614_v45 }
 0x1ff   : > { %1961 = vmatmul.bf16.gmra.mxu2 %v4597_v58 }
 0x202   : > { %v4605_v10 = vpop.f32.mrf.mxu3 }
 0x204   : > { %v4607_v38 = vpop.f32.mrf.mxu1 }
 0x205   : > { %5405 = vst [vmem:[#allocation32_spill] sm:$0xff] %v4607_v38  ;;  %v4618_v38 = vpop.f32.mrf.mxu0  ;;  %v4627_v34 = vpop.f32.mrf.mxu2 }
 0x206   : > { %5407 = vst [vmem:[#allocation34_spill] sm:$0xff] %v4618_v38 }
 0x207   : > { %1227 = vmatmul.bf16.gmra.mxu3 %v4414_v6  ;;  %1733 = vmatmul.bf16.gmra.mxu1 %v4369_v51  ;;  %5409 = vst [vmem:[#allocation36_spill] sm:$0xff] %v4627_v34  ;;  %v4640_v34 = vpack.c.bf16 %v1816_v59, %v1815_v9  ;;  %v2266_v59 = vld [vmem:[#allocation2 + $0x91] sm:$0xff] }
 0x20a   : > { %2388 = vmatmul.bf16.gmra.mxu0 %v2292_v52  ;;  %v4616_v61 = vpop.f32.mrf.mxu3  ;;  %v2264_v52 = vld [vmem:[#allocation2 + $0x79] sm:$0xff] }
 0x20b   : > { %v2293_v38 = vpack.c.bf16 %v2265_v62, %v2264_v52 }
 0x20c   : > { %v4620_v25 = vpop.f32.mrf.mxu1 }
 0x20d   : > { %5408 = vst [vmem:[#allocation35_spill] sm:$0xff] %v4620_v25  ;;  %v4631_v40 = vpop.f32.mrf.mxu0  ;;  %v4638_v45 = vpop.f32.mrf.mxu2 }
 0x20e   : > { %5411 = vst [vmem:[#allocation38_spill] sm:$0xff] %v4631_v40 }
 0x20f   : > { %1966 = vmatmul.bf16.gmra.mxu2 %v4622_v29  ;;  %5412 = vst [vmem:[#allocation39_spill] sm:$0xff] %v4638_v45 }
 0x212   : > { %v4625_v51 = vpop.f32.mrf.mxu3 }
 0x214   : > { %v4629_v19 = vpop.f32.mrf.mxu1 }
 0x215   : > { %5410 = vst [vmem:[#allocation37_spill] sm:$0xff] %v4629_v19  ;;  %v4648_v62 = vpop.f32.mrf.mxu0  ;;  %v4656_v9 = vpop.f32.mrf.mxu2 }
 0x216   : > { %5414 = vst [vmem:[#allocation41_spill] sm:$0xff] %v4648_v62 }
 0x217   : > { %1232 = vmatmul.bf16.gmra.mxu3 %v4437_v0  ;;  %1738 = vmatmul.bf16.gmra.mxu1 %v4384_v16  ;;  %v3687_v16 = vld [vmem:[%s5376_s2 + $0x1a0] sm:$0xff]  ;;  %5415 = vst [vmem:[#allocation42_spill] sm:$0xff] %v4656_v9 }
 0x218   : > { %2140 = vmatpush.bf16.msra.mxu3 %v3687_v16  ;;  %v3702_v16 = vld [vmem:[%s5376_s2 + $0x218] sm:$0xff] }
 0x21a   : > { %2393 = vmatmul.bf16.gmra.mxu0 %v2293_v38  ;;  %v1072_v25 = vpop.f32.mrf.mxu3 }
 0x21b   : > { %v4636_v35 = vadd.f32 %v1072_v25, %v4550_v47  ;;  %v3703_v25 = vld [vmem:[%s5376_s2 + $0x220] sm:$0xff] }
 0x21c   : > { %v4643_v40 = vpop.f32.mrf.mxu1  ;;  %v2267_v47 = vld [vmem:[#allocation2 + $0x99] sm:$0xff]  ;;  %2606 = vmatpush.bf16.msra.mxu1 %v3703_v25 }
 0x21d   : > { %5413 = vst [vmem:[#allocation40_spill] sm:$0xff] %v4643_v40  ;;  %v2294_v62 = vpack.c.bf16 %v2267_v47, %v2266_v59  ;;  %v1817_v40 = vld [vmem:[#allocation2 + $0x152] sm:$0xff]  ;;  %v1818_v25 = vld [vmem:[#allocation2 + $0x15a] sm:$0xff]  ;;  %v3700_v47 = vld [vmem:[%s5376_s2 + $0x208] sm:$0xff] }
 0x21e   : > { %v4673_v45 = vpack.c.bf16 %v1818_v25, %v1817_v40  ;;  %v2269_v25 = vld [vmem:[#allocation2 + $0xb1] sm:$0xff] }
 0x21f   : > { %1971 = vmatmul.bf16.gmra.mxu2 %v4640_v34 }
 0x220   : > { %2607 = vmatpush.bf16.msra.mxu1 %v3702_v16 }
 0x222   : > { %v1074_v38 = vpop.f32.mrf.mxu3 }
 0x223   : > { %v4651_v52 = vadd.f32 %v1074_v38, %v4562_v41  ;;  %v4665_v38 = vpop.f32.mrf.mxu0 }
 0x224   : > { %v4663_v41 = vpop.f32.mrf.mxu1  ;;  %5417 = vst [vmem:[#allocation44_spill] sm:$0xff] %v4665_v38  ;;  %v1819_v38 = vld [vmem:[#allocation2 + $0x16a] sm:$0xff] }
 0x225   : > { %5416 = vst [vmem:[#allocation43_spill] sm:$0xff] %v4663_v41 }
 0x227   : > { %1237 = vmatmul.bf16.gmra.mxu3 %v4455_v39  ;;  %1743 = vmatmul.bf16.gmra.mxu1 %v4402_v14  ;;  %v3701_v14 = vld [vmem:[%s5376_s2 + $0x210] sm:$0xff] }
 0x228   : > { %2608 = vmatpush.bf16.msra.mxu1 %v3701_v14  ;;  %v2268_v14 = vld [vmem:[#allocation2 + $0xa9] sm:$0xff] }
 0x22a   : > { %2398 = vmatmul.bf16.gmra.mxu0 %v2294_v62  ;;  %v1077_v19 = vpop.f32.mrf.mxu3  ;;  %v4679_v62 = vpop.f32.mrf.mxu2 }
 0x22b   : > { %v4668_v9 = vadd.f32 %v1077_v19, %v4576_v54  ;;  %5418 = vst [vmem:[#allocation45_spill] sm:$0xff] %v4679_v62  ;;  %v3699_v19 = vld [vmem:[%s5376_s2 + $0x200] sm:$0xff]  ;;  %v4689_v40 = vpop.f32.mrf.mxu0 }
 0x22c   : > { %2609 = vmatpush.bf16.msra.mxu1 %v3700_v47  ;;  %v4681_v16 = vpop.f32.mrf.mxu1  ;;  %5420 = vst [vmem:[#allocation47_spill] sm:$0xff] %v4689_v40  ;;  %v2295_v47 = vpack.c.bf16 %v2269_v25, %v2268_v14 }
 0x22d   : > { %5419 = vst [vmem:[#allocation46_spill] sm:$0xff] %v4681_v16  ;;  %v1820_v16 = vld [vmem:[#allocation2 + $0x172] sm:$0xff] }
 0x22e   : > { %v4700_v40 = vpack.c.bf16 %v1820_v16, %v1819_v38  ;;  %v2270_v38 = vld [vmem:[#allocation2 + $0xc1] sm:$0xff]  ;;  %v5426_v16 = vpack.c.bf16 %v4483_v48, %v4466_v2 }
 0x22f   : > { %1976 = vmatmul.bf16.gmra.mxu2 %v4673_v45 }
 0x230   : > { %2610 = vmatpush.bf16.msra.mxu1 %v3699_v19 }
 0x232   : > { %v1079_v59 = vpop.f32.mrf.mxu3 }
 0x233   : > { %v4684_v54 = vadd.f32 %v1079_v59, %v4585_v60  ;;  %v4693_v60 = vpop.f32.mrf.mxu2  ;;  %v4702_v19 = vpop.f32.mrf.mxu0 }
 0x234   : > { %5421 = vst [vmem:[#allocation48_spill] sm:$0xff] %v4693_v60  ;;  %v4698_v62 = vpop.f32.mrf.mxu1  ;;  %v1822_v60 = vld [vmem:[#allocation2 + $0x18a] sm:$0xff] }
 0x235   : > { %5422 = vst [vmem:[#allocation49_spill] sm:$0xff] %v4698_v62 }
 0x236   : > { %5423 = vst [vmem:[#allocation50_spill] sm:$0xff] %v4702_v19 }
 0x237   : > { %1242 = vmatmul.bf16.gmra.mxu3 %v4481_v17  ;;  %1748 = vmatmul.bf16.gmra.mxu1 %v4425_v56  ;;  %v3686_v56 = vld [vmem:[%s5376_s2 + $0x198] sm:$0xff] }
 0x238   : > { %2141 = vmatpush.bf16.msra.mxu3 %v3686_v56  ;;  %v1821_v56 = vld [vmem:[#allocation2 + $0x182] sm:$0xff] }
 0x23a   : > { %2403 = vmatmul.bf16.gmra.mxu0 %v2295_v47  ;;  %v1082_v41 = vpop.f32.mrf.mxu3 }
 0x23b   : > { %v4696_v59 = vadd.f32 %v1082_v41, %v4593_v11  ;;  %v4711_v47 = vpop.f32.mrf.mxu2  ;;  %v2271_v11 = vld [vmem:[#allocation2 + $0xc9] sm:$0xff]  ;;  %v4719_v19 = vpop.f32.mrf.mxu0 }
 0x23c   : > { %5424 = vst [vmem:[#allocation51_spill] sm:$0xff] %v4711_v47  ;;  %v4713_v41 = vpop.f32.mrf.mxu1  ;;  %v2296_v62 = vpack.c.bf16 %v2271_v11, %v2270_v38  ;;  %v4724_v47 = vpack.c.bf16 %v1822_v60, %v1821_v56  ;;  %v2272_v38 = vld [vmem:[#allocation2 + $0xd9] sm:$0xff] }
 0x23d   : > { %5425 = vst [vmem:[#allocation52_spill] sm:$0xff] %v4713_v41 }
 0x23e   : > { %5427 = vst [vmem:[#allocation53_spill] sm:$0xff] %v4719_v19 }
 0x23f   : > { %1981 = vmatmul.bf16.gmra.mxu2 %v4700_v40 }
 0x242   : > { %v1084_v25 = vpop.f32.mrf.mxu3 }
 0x243   : > { %v4709_v14 = vadd.f32 %v1084_v25, %v4605_v10  ;;  %v4726_v41 = vpop.f32.mrf.mxu2  ;;  %v4731_v2 = vpop.f32.mrf.mxu0 }
 0x244   : > { %v4729_v36 = vpop.f32.mrf.mxu1  ;;  %5428 = vst [vmem:[#allocation54_spill] sm:$0xff] %v4731_v2 }
 0x247   : > { %1247 = vmatmul.bf16.gmra.mxu3 %v4513_v21  ;;  %1753 = vmatmul.bf16.gmra.mxu1 %v5426_v16 }
 0x24a   : > { %2408 = vmatmul.bf16.gmra.mxu0 %v2296_v62  ;;  %v1087_v10 = vpop.f32.mrf.mxu3  ;;  %v2273_v62 = vld [vmem:[#allocation2 + $0xe1] sm:$0xff] }
 0x24b   : > { %v4722_v25 = vadd.f32 %v1087_v10, %v4616_v61  ;;  %v3714_v61 = vld [vmem:[%s5377_s3 + $0x38] sm:$0xff]  ;;  %v2297_v60 = vpack.c.bf16 %v2273_v62, %v2272_v38  ;;  %v3685_v10 = vld [vmem:[%s5376_s2 + $0x190] sm:$0xff]  ;;  %v4749_v2 = vpop.f32.mrf.mxu0 }
 0x24c   : > { %2940 = vmatpush.bf16.msra.mxu2 %v3714_v61  ;;  %5430 = vst [vmem:[#allocation56_spill] sm:$0xff] %v4749_v2  ;;  %2142 = vmatpush.bf16.msra.mxu3 %v3685_v10  ;;  %v2275_v62 = vld [vmem:[#allocation2 + $0xf9] sm:$0xff] }
 0x24d   : > { %v2298_v61 = vpack.c.bf16 %v2275_v62, %v4564_v8 }
 0x24f   : > { %1986 = vmatmul.bf16.gmra.mxu2 %v4724_v47 }
 0x252   : > { %v1089_v16 = vpop.f32.mrf.mxu3 }
 0x253   : > { %v4734_v11 = vadd.f32 %v1089_v16, %v4625_v51  ;;  %v4744_v51 = vpop.f32.mrf.mxu1  ;;  %v4755_v38 = vpop.f32.mrf.mxu0 }
 0x254   : > { %5429 = vst [vmem:[#allocation55_spill] sm:$0xff] %v4744_v51  ;;  %v2276_v51 = vld [vmem:[#allocation2 + $0x109] sm:$0xff] }
 0x255   : > { %5432 = vst [vmem:[#allocation58_spill] sm:$0xff] %v4755_v38  ;;  %v2277_v38 = vld [vmem:[#allocation2 + $0x111] sm:$0xff] }
 0x257   : > { %1252 = vmatmul.bf16.gmra.mxu3 %v4538_v55  ;;  %2611 = vmatmul.bf16.vlgmr.msra.gmra.mxu1 %v4393_v15 }
 0x25a   : > { %2413 = vmatmul.bf16.gmra.mxu0 %v2297_v60  ;;  %v1213_v56 = vpop.f32.mrf.mxu3 }
 0x25b   : > { %v4747_v16 = vadd.f32 %v1213_v56, %v4246_v33  ;;  %v4753_v19 = vpop.f32.mrf.mxu1  ;;  %v4765_v10 = vpop.f32.mrf.mxu0 }
 0x25c   : > { %5431 = vst [vmem:[#allocation57_spill] sm:$0xff] %v4753_v19 }
 0x25d   : > { %5434 = vst [vmem:[#allocation60_spill] sm:$0xff] %v4765_v10 }
 0x262   : > { %v4751_v15 = vpop.f32.mrf.mxu3 }
 0x263   : > { %v4763_v56 = vpop.f32.mrf.mxu1  ;;  %v4777_v62 = vpop.f32.mrf.mxu0 }
 0x264   : > { %5433 = vst [vmem:[#allocation59_spill] sm:$0xff] %v4763_v56 }
 0x265   : > { %5436 = vst [vmem:[#allocation62_spill] sm:$0xff] %v4777_v62  ;;  %v2278_v62 = vld [vmem:[#allocation2 + $0x121] sm:$0xff] }
 0x267   : > { %1257 = vmatmul.bf16.gmra.mxu3 %v4556_v49  ;;  %2616 = vmatmul.bf16.gmra.mxu1 %v4414_v6  ;;  %v3713_v6 = vld [vmem:[%s5377_s3 + $0x30] sm:$0xff] }
 0x268   : > { %2941 = vmatpush.bf16.msra.mxu2 %v3713_v6  ;;  %v2279_v6 = vld [vmem:[#allocation2 + $0x129] sm:$0xff] }
 0x26a   : > { %2418 = vmatmul.bf16.gmra.mxu0 %v2298_v61  ;;  %v1218_v60 = vpop.f32.mrf.mxu3 }
 0x26b   : > { %v4761_v33 = vadd.f32 %v1218_v60, %v4322_v44  ;;  %v2299_v44 = vpack.c.bf16 %v2277_v38, %v2276_v51  ;;  %v4775_v8 = vpop.f32.mrf.mxu1  ;;  %v4790_v38 = vpop.f32.mrf.mxu0 }
 0x26c   : > { %5435 = vst [vmem:[#allocation61_spill] sm:$0xff] %v4775_v8  ;;  %v2280_v8 = vld [vmem:[#allocation2 + $0x139] sm:$0xff] }
 0x26d   : > { %5438 = vst [vmem:[#allocation64_spill] sm:$0xff] %v4790_v38  ;;  %v2281_v38 = vld [vmem:[#allocation2 + $0x141] sm:$0xff] }
 0x272   : > { %v1220_v2 = vpop.f32.mrf.mxu3 }
 0x273   : > { %v4768_v19 = vadd.f32 %v1220_v2, %v4336_v27  ;;  %v3684_v27 = vld [vmem:[%s5376_s2 + $0x188] sm:$0xff]  ;;  %v4785_v60 = vpop.f32.mrf.mxu1 }
 0x274   : > { %2143 = vmatpush.bf16.msra.mxu3 %v3684_v27  ;;  %5437 = vst [vmem:[#allocation63_spill] sm:$0xff] %v4785_v60  ;;  %v4799_v27 = vpop.f32.mrf.mxu0 }
 0x275   : > { %5440 = vst [vmem:[#allocation66_spill] sm:$0xff] %v4799_v27 }
 0x277   : > { %1262 = vmatmul.bf16.gmra.mxu3 %v4580_v13  ;;  %2621 = vmatmul.bf16.gmra.mxu1 %v4437_v0 }
 0x27a   : > { %2423 = vmatmul.bf16.gmra.mxu0 %v2299_v44  ;;  %v1223_v61 = vpop.f32.mrf.mxu3  ;;  %v2300_v44 = vpack.c.bf16 %v2279_v6, %v2278_v62 }
 0x27b   : > { %v4783_v2 = vadd.f32 %v1223_v61, %v4343_v4  ;;  %v4797_v61 = vpop.f32.mrf.mxu1 }
 0x27c   : > { %5439 = vst [vmem:[#allocation65_spill] sm:$0xff] %v4797_v61  ;;  %v2285_v61 = vld [vmem:[#allocation2 + $0x171] sm:$0xff] }
 0x282   : > { %v1225_v0 = vpop.f32.mrf.mxu3 }
 0x283   : > { %v4788_v51 = vadd.f32 %v1225_v0, %v4354_v5  ;;  %v4804_v60 = vpop.f32.mrf.mxu1 }
 0x284   : > { %5441 = vst [vmem:[#allocation67_spill] sm:$0xff] %v4804_v60  ;;  %v2284_v60 = vld [vmem:[#allocation2 + $0x169] sm:$0xff] }
 0x287   : > { %1267 = vmatmul.bf16.gmra.mxu3 %v4597_v58  ;;  %2626 = vmatmul.bf16.gmra.mxu1 %v4455_v39  ;;  %v4811_v39 = vpop.f32.mrf.mxu0 }
 0x28a   : > { %2428 = vmatmul.bf16.gmra.mxu0 %v2300_v44  ;;  %v1228_v10 = vpop.f32.mrf.mxu3 }
 0x28b   : > { %v4795_v4 = vadd.f32 %v1228_v10, %v4364_v46  ;;  %v3712_v46 = vld [vmem:[%s5377_s3 + $0x28] sm:$0xff]  ;;  %v2301_v10 = vpack.c.bf16 %v2281_v38, %v2280_v8  ;;  %v4819_v44 = vpop.f32.mrf.mxu1  ;;  %v2282_v8 = vld [vmem:[#allocation2 + $0x151] sm:$0xff]  ;;  %v2283_v38 = vld [vmem:[#allocation2 + $0x159] sm:$0xff] }
 0x28c   : > { %2942 = vmatpush.bf16.msra.mxu2 %v3712_v46  ;;  %5442 = vst [vmem:[#allocation68_spill] sm:$0xff] %v4819_v44  ;;  %v2302_v46 = vpack.c.bf16 %v2283_v38, %v2282_v8 }
 0x292   : > { %v1230_v5 = vpop.f32.mrf.mxu3 }
 0x293   : > { %v4802_v0 = vadd.f32 %v1230_v5, %v4376_v31  ;;  %v3683_v31 = vld [vmem:[%s5376_s2 + $0x180] sm:$0xff] }
 0x294   : > { %2144 = vmatpush.bf16.msra.mxu3 %v3683_v31 }
 0x297   : > { %1272 = vmatmul.bf16.gmra.mxu3 %v4622_v29  ;;  %2631 = vmatmul.bf16.gmra.mxu1 %v4481_v17  ;;  %v4821_v17 = vpop.f32.mrf.mxu0 }
 0x29a   : > { %2433 = vmatmul.bf16.gmra.mxu0 %v2301_v10  ;;  %v1233_v62 = vpop.f32.mrf.mxu3 }
 0x29b   : > { %v4817_v6 = vadd.f32 %v1233_v62, %v4382_v1  ;;  %v4828_v1 = vpop.f32.mrf.mxu1 }
 0x29c   : > { %5443 = vst [vmem:[#allocation69_spill] sm:$0xff] %v4828_v1  ;;  %v2040_v1 = vld [vmem:[#allocation2 + $0xe0] sm:$0xff] }
 0x29f   : > { %v4833_v31 = vpop.f32.mrf.mxu0 }
 0x2a2   : > { %v1235_v5 = vpop.f32.mrf.mxu3 }
 0x2a3   : > { %v4824_v27 = vadd.f32 %v1235_v5, %v4391_v28  ;;  %v4838_v5 = vpop.f32.mrf.mxu1 }
 0x2a4   : > { %5444 = vst [vmem:[#allocation70_spill] sm:$0xff] %v4838_v5  ;;  %v2025_v5 = vld [vmem:[#allocation2 + $0x30] sm:$0xff] }
 0x2a7   : > { %1277 = vmatmul.bf16.gmra.mxu3 %v4640_v34  ;;  %2636 = vmatmul.bf16.gmra.mxu1 %v4513_v21  ;;  %v4840_v56 = vpop.f32.mrf.mxu0  ;;  %v2303_v21 = vpack.c.bf16 %v2285_v61, %v2284_v60 }
 0x2aa   : > { %2438 = vmatmul.bf16.gmra.mxu0 %v2302_v46  ;;  %v1238_v10 = vpop.f32.mrf.mxu3 }
 0x2ab   : > { %v4831_v62 = vadd.f32 %v1238_v10, %v4398_v37  ;;  %v3711_v37 = vld [vmem:[%s5377_s3 + $0x20] sm:$0xff] }
 0x2ac   : > { %2943 = vmatpush.bf16.msra.mxu2 %v3711_v37 }
 0x2af   : > { %v4852_v38 = vpop.f32.mrf.mxu0 }
 0x2b2   : > { %v1240_v44 = vpop.f32.mrf.mxu3 }
 0x2b3   : > { %v4836_v28 = vadd.f32 %v1240_v44, %v4409_v50  ;;  %v4850_v44 = vpop.f32.mrf.mxu1 }
 0x2b4   : > { %5445 = vst [vmem:[#allocation71_spill] sm:$0xff] %v4850_v44  ;;  %v2026_v44 = vld [vmem:[#allocation2 + $0x38] sm:$0xff] }
 0x2b7   : > { %1282 = vmatmul.bf16.gmra.mxu3 %v4673_v45  ;;  %2641 = vmatmul.bf16.gmra.mxu1 %v4538_v55  ;;  %v2286_v55 = vld [vmem:[#allocation2 + $0x181] sm:$0xff]  ;;  %v4862_v37 = vpop.f32.mrf.mxu0 }
 0x2b8   : > { %v2304_v60 = vpack.c.bf16 %v4483_v48, %v2286_v55  ;;  %v3710_v48 = vld [vmem:[%s5377_s3 + $0x18] sm:$0xff] }
 0x2b9   : > { %2944 = vmatpush.bf16.msra.mxu2 %v3710_v48 }
 0x2ba   : > { %2443 = vmatmul.bf16.gmra.mxu0 %v2303_v21  ;;  %v1243_v8 = vpop.f32.mrf.mxu3 }
 0x2bb   : > { %v4848_v50 = vadd.f32 %v1243_v8, %v4419_v53  ;;  %v4860_v61 = vpop.f32.mrf.mxu1 }
 0x2bc   : > { %5446 = vst [vmem:[#allocation72_spill] sm:$0xff] %v4860_v61 }
 0x2c2   : > { %v1245_v46 = vpop.f32.mrf.mxu3 }
 0x2c3   : > { %v4855_v10 = vadd.f32 %v1245_v46, %v4432_v32  ;;  %v4867_v32 = vpop.f32.mrf.mxu1 }
 0x2c4   : > { %5447 = vst [vmem:[#allocation73_spill] sm:$0xff] %v4867_v32  ;;  %v2028_v32 = vld [vmem:[#allocation2 + $0x50] sm:$0xff] }
 0x2c7   : > { %1287 = vmatmul.bf16.gmra.mxu3 %v4700_v40  ;;  %2646 = vmatmul.bf16.gmra.mxu1 %v4556_v49  ;;  %v2057_v49 = vpack.c.bf16 %v2026_v44, %v2025_v5  ;;  %v2027_v5 = vld [vmem:[#allocation2 + $0x48] sm:$0xff] }
 0x2c8   : > { %v2058_v44 = vpack.c.bf16 %v2028_v32, %v2027_v5 }
 0x2ca   : > { %2448 = vmatmul.bf16.gmra.mxu0 %v2304_v60  ;;  %v1248_v53 = vpop.f32.mrf.mxu3 }
 0x2cb   : > { %v4865_v21 = vadd.f32 %v1248_v53, %v4442_v7  ;;  %v4879_v60 = vpop.f32.mrf.mxu1 }
 0x2cc   : > { %5448 = vst [vmem:[#allocation74_spill] sm:$0xff] %v4879_v60 }
 0x2d2   : > { %v1250_v8 = vpop.f32.mrf.mxu3 }
 0x2d3   : > { %v4870_v46 = vadd.f32 %v1250_v8, %v4450_v30  ;;  %v4884_v8 = vpop.f32.mrf.mxu1 }
 0x2d4   : > { %5449 = vst [vmem:[#allocation75_spill] sm:$0xff] %v4884_v8 }
 0x2d7   : > { %2145 = vmatmul.bf16.vlgmr.msra.gmra.mxu3 %v2057_v49  ;;  %2651 = vmatmul.bf16.gmra.mxu1 %v4580_v13 }
 0x2da   : > { %v1253_v55 = vpop.f32.mrf.mxu3 }
 0x2db   : > { %v4877_v7 = vadd.f32 %v1253_v55, %v4461_v43  ;;  %v4890_v43 = vpop.f32.mrf.mxu1  ;;  %v2030_v55 = vld [vmem:[#allocation2 + $0x68] sm:$0xff] }
 0x2dc   : > { %5450 = vst [vmem:[#allocation76_spill] sm:$0xff] %v4890_v43  ;;  %v2033_v43 = vld [vmem:[#allocation2 + $0x90] sm:$0xff] }
 0x2e2   : > { %v1255_v53 = vpop.f32.mrf.mxu3 }
 0x2e3   : > { %v4882_v30 = vadd.f32 %v1255_v53, %v4476_v22  ;;  %v2029_v22 = vld [vmem:[#allocation2 + $0x60] sm:$0xff] }
 0x2e4   : > { %v2059_v53 = vpack.c.bf16 %v2030_v55, %v2029_v22  ;;  %v4907_v55 = vpop.f32.mrf.mxu2 }
 0x2e7   : > { %2150 = vmatmul.bf16.gmra.mxu3 %v2058_v44  ;;  %2656 = vmatmul.bf16.gmra.mxu1 %v4597_v58  ;;  %v3709_v58 = vld [vmem:[%s5377_s3 + $0x10] sm:$0xff] }
 0x2e8   : > { %2945 = vmatpush.bf16.msra.mxu2 %v3709_v58 }
 0x2ea   : > { %v1258_v13 = vpop.f32.mrf.mxu3 }
 0x2eb   : > { %v4888_v49 = vadd.f32 %v1258_v13, %v4500_v63  ;;  %v4899_v63 = vpop.f32.mrf.mxu1  ;;  %v2032_v13 = vld [vmem:[#allocation2 + $0x80] sm:$0xff] }
 0x2ec   : > { %5451 = vst [vmem:[#allocation77_spill] sm:$0xff] %v4899_v63 }
 0x2f2   : > { %v1260_v48 = vpop.f32.mrf.mxu3 }
 0x2f3   : > { %v4893_v60 = vadd.f32 %v1260_v48, %v4511_v23  ;;  %v2031_v48 = vld [vmem:[#allocation2 + $0x78] sm:$0xff] }
 0x2f4   : > { %v2060_v22 = vpack.c.bf16 %v2032_v13, %v2031_v48 }
 0x2f7   : > { %2155 = vmatmul.bf16.gmra.mxu3 %v2059_v53  ;;  %2661 = vmatmul.bf16.gmra.mxu1 %v4622_v29  ;;  %v4909_v29 = vpop.f32.mrf.mxu1 }
 0x2fa   : > { %v1263_v32 = vpop.f32.mrf.mxu3 }
 0x2fb   : > { %v4902_v5 = vadd.f32 %v1263_v32, %v4525_v3  ;;  %v4915_v3 = vpop.f32.mrf.mxu2 }
 0x2ff   : > { %v4917_v32 = vpop.f32.mrf.mxu1 }
 0x302   : > { %v1265_v44 = vpop.f32.mrf.mxu3 }
 0x303   : > { %v4905_v23 = vadd.f32 %v1265_v44, %v4536_v26  ;;  %v2034_v26 = vld [vmem:[#allocation2 + $0x98] sm:$0xff] }
 0x304   : > { %v2061_v8 = vpack.c.bf16 %v2034_v26, %v2033_v43  ;;  %v2035_v43 = vld [vmem:[#allocation2 + $0xa8] sm:$0xff] }
 0x305   : > { %5452 = vst [vmem:[#allocation78_spill] sm:$0xff] %v4905_v23 }
 0x307   : > { %2160 = vmatmul.bf16.gmra.mxu3 %v2060_v22  ;;  %2666 = vmatmul.bf16.gmra.mxu1 %v4640_v34  ;;  %v3708_v34 = vld [vmem:[%s5377_s3 + $0x8] sm:$0xff]  ;;  %v4928_v13 = vpop.f32.mrf.mxu1 }
 0x308   : > { %2946 = vmatpush.bf16.msra.mxu2 %v3708_v34 }
 0x30a   : > { %v1268_v53 = vpop.f32.mrf.mxu3 }
 0x30b   : > { %v4913_v58 = vadd.f32 %v1268_v53, %v4543_v24  ;;  %v4926_v24 = vpop.f32.mrf.mxu2 }
 0x30d   : > { %5453 = vst [vmem:[#allocation79_spill] sm:$0xff] %v4913_v58  ;;  %v4985_v58 = vpop.f32.mrf.mxu0 }
 0x312   : > { %v1270_v63 = vpop.f32.mrf.mxu3 }
 0x313   : > { %v4920_v44 = vadd.f32 %v1270_v63, %v4552_v42  ;;  %v2036_v63 = vld [vmem:[#allocation2 + $0xb0] sm:$0xff]  ;;  %v4933_v53 = vpop.f32.mrf.mxu2 }
 0x314   : > { %v2062_v26 = vpack.c.bf16 %v2036_v63, %v2035_v43  ;;  %v2037_v43 = vld [vmem:[#allocation2 + $0xc0] sm:$0xff] }
 0x315   : > { %5454 = vst [vmem:[#allocation80_spill] sm:$0xff] %v4920_v44 }
 0x317   : > { %2165 = vmatmul.bf16.gmra.mxu3 %v2061_v8  ;;  %2671 = vmatmul.bf16.gmra.mxu1 %v4673_v45  ;;  %v4935_v8 = vpop.f32.mrf.mxu1 }
 0x31a   : > { %v1273_v48 = vpop.f32.mrf.mxu3 }
 0x31b   : > { %v4931_v22 = vadd.f32 %v1273_v48, %v4636_v35  ;;  %v4944_v35 = vpop.f32.mrf.mxu2 }
 0x31d   : > { %5455 = vst [vmem:[#allocation81_spill] sm:$0xff] %v4931_v22  ;;  %v3707_v22 = vld [vmem:[%s5377_s3] sm:$0xff] }
 0x31e   : > { %2947 = vmatpush.bf16.msra.mxu2 %v3707_v22 }
 0x31f   : > { %v4946_v48 = vpop.f32.mrf.mxu1 }
 0x322   : > { %v1275_v42 = vpop.f32.mrf.mxu3 }
 0x323   : > { %v4938_v45 = vadd.f32 %v1275_v42, %v4651_v52  ;;  %v2038_v42 = vld [vmem:[#allocation2 + $0xc8] sm:$0xff] }
 0x325   : > { %5456 = vst [vmem:[#allocation82_spill] sm:$0xff] %v4938_v45 }
 0x327   : > { %2170 = vmatmul.bf16.gmra.mxu3 %v2062_v26  ;;  %2676 = vmatmul.bf16.gmra.mxu1 %v4700_v40  ;;  %v2063_v40 = vpack.c.bf16 %v2038_v42, %v2037_v43  ;;  %v4954_v26 = vpop.f32.mrf.mxu2 }
 0x32a   : > { %v1278_v61 = vpop.f32.mrf.mxu3 }
 0x32b   : > { %v4942_v34 = vadd.f32 %v1278_v61, %v4668_v9  ;;  %v4956_v9 = vpop.f32.mrf.mxu1 }
 0x32d   : > { %5457 = vst [vmem:[#allocation83_spill] sm:$0xff] %v4942_v34 }
 0x32f   : > { %v4962_v45 = vpop.f32.mrf.mxu2 }
 0x332   : > { %v1280_v52 = vpop.f32.mrf.mxu3 }
 0x333   : > { %v4952_v63 = vadd.f32 %v1280_v52, %v4684_v54  ;;  %v2039_v52 = vld [vmem:[#allocation2 + $0xd8] sm:$0xff] }
 0x334   : > { %v2064_v42 = vpack.c.bf16 %v2040_v1, %v2039_v52 }
 0x335   : > { %5458 = vst [vmem:[#allocation84_spill] sm:$0xff] %v4952_v63 }
 0x337   : > { %2175 = vmatmul.bf16.gmra.mxu3 %v2063_v40  ;;  %2681 = vmatmul.bf16.gmra.mxu1 %v4724_v47  ;;  %v4967_v63 = vpop.f32.mrf.mxu2 }
 0x33a   : > { %v1283_v61 = vpop.f32.mrf.mxu3 }
 0x33b   : > { %v4960_v34 = vadd.f32 %v1283_v61, %v4696_v59  ;;  %v1526_v59 = vadd.f32 %v4386_v18, %v4747_v16  ;;  %v2042_v61 = vld [vmem:[#allocation2 + $0xf8] sm:$0xff]  ;;  %v5464_v18 = vld [vmem:[#allocation33_spill] sm:$0xff] }
 0x33d   : > { %5459 = vst [vmem:[#allocation85_spill] sm:$0xff] %v4960_v34  ;;  %v1015_v34 = vadd.f32 %v4297_v20, %v4263_v57  ;;  %v5465_v20 = vld [vmem:[#allocation23_spill] sm:$0xff] }
 0x33f   : > { %v4979_v1 = vpop.f32.mrf.mxu2  ;;  %v1294_v52 = vadd.f32 %v4751_v15, %v1015_v34  ;;  %v5466_v15 = vld [vmem:[#allocation11_spill] sm:$0xff] }
 0x342   : > { %v1285_v22 = vpop.f32.mrf.mxu3 }
 0x343   : > { %v4965_v54 = vadd.f32 %v1285_v22, %v4709_v14  ;;  %v2041_v22 = vld [vmem:[#allocation2 + $0xf0] sm:$0xff] }
 0x345   : > { %5460 = vst [vmem:[#allocation86_spill] sm:$0xff] %v4965_v54 }
 0x347   : > { %2180 = vmatmul.bf16.gmra.mxu3 %v2064_v42  ;;  %v2065_v42 = vpack.c.bf16 %v2042_v61, %v2041_v22  ;;  %v5467_v61 = vld [vmem:[#allocation36_spill] sm:$0xff] }
 0x34a   : > { %v1288_v43 = vpop.f32.mrf.mxu3 }
 0x34b   : > { %v4970_v40 = vadd.f32 %v1288_v43, %v4722_v25  ;;  %v1759_v25 = vadd.f32 %v4545_v12, %v1526_v59  ;;  %v5463_v43 = vld [vmem:[#allocation10_spill] sm:$0xff]  ;;  %v1528_v12 = vadd.f32 %v5466_v15, %v4761_v33  ;;  %v4996_v59 = vld [vmem:[#allocation5] ss:$0 sm:$0xff] }
 0x34d   : > { %5461 = vst [vmem:[#allocation87_spill] sm:$0xff] %v4970_v40  ;;  %v1527_v40 = vadd.f32 %v5463_v43, %v1294_v52  ;;  %v1992_v16 = vadd.f32 %v5464_v18, %v1759_v25  ;;  %v2044_v52 = vld [vmem:[#allocation2 + $0x110] sm:$0xff]  ;;  %v2043_v25 = vld [vmem:[#allocation2 + $0x108] sm:$0xff] }
 0x34e   : > { %v5468_v43 = vld [vmem:[#allocation25_spill] sm:$0xff] }
 0x34f   : > { %v1761_v18 = vadd.f32 %v5468_v43, %v1528_v12 }
 0x352   : > { %v1290_v47 = vpop.f32.mrf.mxu3 }
 0x353   : > { %v4977_v14 = vadd.f32 %v1290_v47, %v4734_v11  ;;  %v1760_v11 = vadd.f32 %v5465_v20, %v1527_v40  ;;  %v4989_v47 = vpop.f32.mrf.mxu1  ;;  %v2066_v40 = vpack.c.bf16 %v2044_v52, %v2043_v25  ;;  %v5469_v20 = vld [vmem:[#allocation12_spill] sm:$0xff]  ;;  %v5471_v25 = vld [vmem:[#allocation26_spill] sm:$0xff] }
 0x355   : > { %5462 = vst [vmem:[#allocation88_spill] sm:$0xff] %v4977_v14  ;;  %v4991_v14 = vpop.f32.mrf.mxu2  ;;  %v1993_v22 = vadd.f32 %v5467_v61, %v1760_v11  ;;  %v1529_v11 = vadd.f32 %v5469_v20, %v4768_v19  ;;  %v5470_v61 = vld [vmem:[#allocation39_spill] sm:$0xff]  ;;  %v5472_v19 = vld [vmem:[#allocation13_spill] sm:$0xff]  ;;  %v5473_v20 = vld [vmem:[#allocation42_spill] sm:$0xff] }
 0x357   : > { %2185 = vmatmul.bf16.gmra.mxu3 %v2065_v42 }
 0x35a   : > { %v2146_v54 = vpop.f32.mrf.mxu3 }
 0x35b   : > { %v2226_v44 = vadd.f32 %v2146_v54, %v1992_v16  ;;  %v5002_v16 = vpop.f32.mrf.mxu0 }
 0x35d   : > { %v2459_v57 = vadd.f32 %v4811_v39, %v2226_v44 }
 0x35f   : > { %v2692_v34 = vadd.f32 %v4909_v29, %v2459_v57  ;;  %v5005_v29 = vpop.f32.mrf.mxu1  ;;  %v5007_v57 = vpop.f32.mrf.mxu2 }
 0x361   : > { %v2728_v39 = vadd.f32 %v4996_v59, %v2692_v34 }
 0x362   : > { %v2148_v54 = vpop.f32.mrf.mxu3 }
 0x363   : > { %v2227_v42 = vadd.f32 %v2148_v54, %v1993_v22  ;;  %v2792_v15 = vmul.f32 0.1, %v2728_v39  ;;  %vm2760_vm3 = vcmp.gt.f32.partialorder %v2728_v39, 0.0  ;;  %v5015_v43 = vpop.f32.mrf.mxu0 }
 0x365   : > { %v2460_v44 = vadd.f32 %v4821_v17, %v2227_v42  ;;  %v1994_v17 = vadd.f32 %v5470_v61, %v1761_v18  ;;  %v2824_v52 = vsel %vm2760_vm3, %v2728_v39, %v2792_v15  ;;  %v2046_v39 = vld [vmem:[#allocation2 + $0x128] sm:$0xff] }
 0x367   : > { %v2693_v33 = vadd.f32 %v4917_v32, %v2460_v44  ;;  %2190 = vmatmul.bf16.gmra.mxu3 %v2066_v40  ;;  %v1762_v44 = vadd.f32 %v5471_v25, %v1529_v11  ;;  %v5021_v23 = vpop.f32.mrf.mxu1  ;;  %v5023_v15 = vpop.f32.mrf.mxu2  ;;  %v5476_v25 = vld [vmem:[#allocation45_spill] sm:$0xff] }
 0x369   : > { %v2729_v34 = vadd.f32 %v4996_v59, %v2693_v33  ;;  %v1530_v33 = vadd.f32 %v5472_v19, %v4783_v2  ;;  %v1995_v61 = vadd.f32 %v5473_v20, %v1762_v44 }
 0x36a   : > { %v2151_v22 = vpop.f32.mrf.mxu3 }
 0x36b   : > { %vm2761_vm4 = vcmp.gt.f32.partialorder %v2729_v34, 0.0  ;;  %v2793_v12 = vmul.f32 0.1, %v2729_v34  ;;  %v2228_v54 = vadd.f32 %v2151_v22, %v1994_v17  ;;  %v5033_v19 = vpop.f32.mrf.mxu0 }
 0x36d   : > { %v2825_v32 = vsel %vm2761_vm4, %v2729_v34, %v2793_v12  ;;  %v2461_v42 = vadd.f32 %v4833_v31, %v2228_v54  ;;  %v2045_v34 = vld [vmem:[#allocation2 + $0x120] sm:$0xff] }
 0x36e   : > { %v2856_v40 = vpack.c.bf16 %v2825_v32, %v2824_v52  ;;  %v2067_v12 = vpack.c.bf16 %v2046_v39, %v2045_v34  ;;  %v5474_v54 = vld [vmem:[#allocation28_spill] sm:$0xff]  ;;  %v5478_v39 = vld [vmem:[#allocation30_spill] sm:$0xff] }
 0x36f   : > { %v2694_v18 = vadd.f32 %v4928_v13, %v2461_v42  ;;  %v1763_v52 = vadd.f32 %v5474_v54, %v1530_v33  ;;  %v5475_v13 = vld [vmem:[#allocation14_spill] sm:$0xff]  ;;  %v5037_v33 = vpop.f32.mrf.mxu2 }
 0x370   : > { %2948 = vmatmul.bf16.vlgmr.msra.gmra.mxu2 %v2856_v40  ;;  %v1531_v32 = vadd.f32 %v5475_v13, %v4788_v51  ;;  %5477 = vst [vmem:[#allocation10_spill] sm:$0xff] %v5037_v33  ;;  %v2047_v33 = vld [vmem:[#allocation2 + $0x138] sm:$0xff] }
 0x371   : > { %v2730_v11 = vadd.f32 %v4996_v59, %v2694_v18  ;;  %v1996_v44 = vadd.f32 %v5476_v25, %v1763_v52  ;;  %v5480_v52 = vld [vmem:[#allocation48_spill] sm:$0xff] }
 0x372   : > { %v2153_v17 = vpop.f32.mrf.mxu3  ;;  %v2048_v25 = vld [vmem:[#allocation2 + $0x140] sm:$0xff] }
 0x373   : > { %v2229_v31 = vadd.f32 %v2153_v17, %v1995_v61  ;;  %v2794_v40 = vmul.f32 0.1, %v2730_v11  ;;  %vm2762_vm5 = vcmp.gt.f32.partialorder %v2730_v11, 0.0  ;;  %v5035_v61 = vpop.f32.mrf.mxu1 }
 0x375   : > { %v2462_v22 = vadd.f32 %v4840_v56, %v2229_v31  ;;  %v2826_v17 = vsel %vm2762_vm5, %v2730_v11, %v2794_v40  ;;  %v1764_v31 = vadd.f32 %v5478_v39, %v1531_v32  ;;  %v2068_v32 = vpack.c.bf16 %v2048_v25, %v2047_v33 }
 0x377   : > { %v2695_v2 = vadd.f32 %v4935_v8, %v2462_v22  ;;  %2195 = vmatmul.bf16.gmra.mxu3 %v2067_v12  ;;  %v5479_v22 = vld [vmem:[#allocation15_spill] sm:$0xff] }
 0x378   : > { %v1532_v12 = vadd.f32 %v5479_v22, %v4795_v4  ;;  %v5052_v4 = vpop.f32.mrf.mxu2 }
 0x379   : > { %v2731_v42 = vadd.f32 %v4996_v59, %v2695_v2  ;;  %v1997_v2 = vadd.f32 %v5480_v52, %v1764_v31  ;;  %v5484_v52 = vld [vmem:[#allocation35_spill] sm:$0xff] }
 0x37a   : > { %v2156_v20 = vpop.f32.mrf.mxu3 }
 0x37b   : > { %v2230_v18 = vadd.f32 %v2156_v20, %v1996_v44  ;;  %vm2763_vm6 = vcmp.gt.f32.partialorder %v2731_v42, 0.0  ;;  %v2795_v56 = vmul.f32 0.1, %v2731_v42  ;;  %v5045_v20 = vpop.f32.mrf.mxu0 }
 0x37d   : > { %v2463_v8 = vadd.f32 %v4852_v38, %v2230_v18  ;;  %v2827_v51 = vsel %vm2763_vm6, %v2731_v42, %v2795_v56  ;;  %v5481_v42 = vld [vmem:[#allocation32_spill] sm:$0xff]  ;;  %v5050_v18 = vpop.f32.mrf.mxu1 }
 0x37e   : > { %v2857_v34 = vpack.c.bf16 %v2827_v51, %v2826_v17  ;;  %v1765_v40 = vadd.f32 %v5481_v42, %v1532_v12  ;;  %v5482_v56 = vld [vmem:[#allocation16_spill] sm:$0xff]  ;;  %v5483_v51 = vld [vmem:[#allocation51_spill] sm:$0xff] }
 0x37f   : > { %v2696_v54 = vadd.f32 %v4946_v48, %v2463_v8  ;;  %v1533_v8 = vadd.f32 %v5482_v56, %v4802_v0 }
 0x380   : > { %2953 = vmatmul.bf16.gmra.mxu2 %v2857_v34  ;;  %v1998_v39 = vadd.f32 %v5483_v51, %v1765_v40  ;;  %v5065_v25 = vpop.f32.mrf.mxu2  ;;  %v2050_v40 = vld [vmem:[#allocation2 + $0x158] sm:$0xff]  ;;  %v5486_v51 = vld [vmem:[#allocation37_spill] sm:$0xff] }
 0x381   : > { %v2732_v38 = vadd.f32 %v4996_v59, %v2696_v54 }
 0x382   : > { %v2158_v13 = vpop.f32.mrf.mxu3 }
 0x383   : > { %v2231_v44 = vadd.f32 %v2158_v13, %v1997_v2  ;;  %v2796_v31 = vmul.f32 0.1, %v2732_v38  ;;  %vm2764_vm7 = vcmp.gt.f32.partialorder %v2732_v38, 0.0  ;;  %v5061_v2 = vpop.f32.mrf.mxu0 }
 0x385   : > { %v2464_v11 = vadd.f32 %v4862_v37, %v2231_v44  ;;  %v2828_v12 = vsel %vm2764_vm7, %v2732_v38, %v2796_v31  ;;  %v5063_v0 = vpop.f32.mrf.mxu1  ;;  %v5485_v44 = vld [vmem:[#allocation17_spill] sm:$0xff] }
 0x386   : > { %v2049_v38 = vld [vmem:[#allocation2 + $0x150] sm:$0xff] }
 0x387   : > { %v2697_v48 = vadd.f32 %v4956_v9, %v2464_v11  ;;  %2200 = vmatmul.bf16.gmra.mxu3 %v2068_v32  ;;  %v1766_v9 = vadd.f32 %v5484_v52, %v1533_v8  ;;  %v1534_v11 = vadd.f32 %v5485_v44, %v4817_v6  ;;  %v5487_v6 = vld [vmem:[#allocation18_spill] sm:$0xff]  ;;  %v5488_v44 = vld [vmem:[#allocation40_spill] sm:$0xff] }
 0x389   : > { %v2733_v17 = vadd.f32 %v4996_v59, %v2697_v48  ;;  %v1999_v42 = vadd.f32 %v4726_v41, %v1766_v9 }
 0x38a   : > { %v2161_v34 = vpop.f32.mrf.mxu3 }
 0x38b   : > { %v2232_v37 = vadd.f32 %v2161_v34, %v1998_v39  ;;  %vm2765_vm8 = vcmp.gt.f32.partialorder %v2733_v17, 0.0  ;;  %v2797_v33 = vmul.f32 0.1, %v2733_v17  ;;  %v1767_v39 = vadd.f32 %v5486_v51, %v1534_v11  ;;  %v5075_v34 = vpop.f32.mrf.mxu0 }
 0x38d   : > { %v2465_v22 = vadd.f32 %v4985_v58, %v2232_v37  ;;  %v2829_v54 = vsel %vm2765_vm8, %v2733_v17, %v2797_v33  ;;  %v2069_v17 = vpack.c.bf16 %v2050_v40, %v2049_v38  ;;  %v2000_v37 = vadd.f32 %v4907_v55, %v1767_v39  ;;  %v5489_v55 = vld [vmem:[#allocation19_spill] sm:$0xff] }
 0x38e   : > { %v2858_v13 = vpack.c.bf16 %v2829_v54, %v2828_v12 }
 0x38f   : > { %v2698_v32 = vadd.f32 %v4989_v47, %v2465_v22  ;;  %v1535_v47 = vadd.f32 %v5487_v6, %v4824_v27  ;;  %v5081_v22 = vpop.f32.mrf.mxu1 }
 0x390   : > { %2958 = vmatmul.bf16.gmra.mxu2 %v2858_v13 }
 0x391   : > { %v2734_v56 = vadd.f32 %v4996_v59, %v2698_v32  ;;  %v1768_v27 = vadd.f32 %v5488_v44, %v1535_v47  ;;  %v1536_v32 = vadd.f32 %v5489_v55, %v4831_v62  ;;  %v5490_v62 = vld [vmem:[#allocation43_spill] sm:$0xff] }
 0x392   : > { %v2163_v58 = vpop.f32.mrf.mxu3  ;;  %v2289_v47 = vld [vmem:[#allocation2 + $0x1a1] sm:$0xff] }
 0x393   : > { %v2233_v48 = vadd.f32 %v2163_v58, %v1999_v42  ;;  %v2798_v33 = vmul.f32 0.1, %v2734_v56  ;;  %vm2766_vm9 = vcmp.gt.f32.partialorder %v2734_v56, 0.0  ;;  %v2001_v58 = vadd.f32 %v4915_v3, %v1768_v27  ;;  %v5091_v38 = vpop.f32.mrf.mxu0 }
 0x394   : > { %v1769_v6 = vadd.f32 %v5490_v62, %v1536_v32  ;;  %v2053_v62 = vld [vmem:[#allocation2 + $0x180] sm:$0xff] }
 0x395   : > { %v2466_v8 = vadd.f32 %v5002_v16, %v2233_v48  ;;  %v5083_v16 = vpop.f32.mrf.mxu2  ;;  %v2830_v9 = vsel %vm2766_vm9, %v2734_v56, %v2798_v33  ;;  %v2051_v48 = vld [vmem:[#allocation2 + $0x168] sm:$0xff] }
 0x396   : > { %v2522_v33 = vld [vmem:[#allocation2 + $0x1a2] sm:$0xff] }
 0x397   : > { %v2699_v31 = vadd.f32 %v5005_v29, %v2466_v8  ;;  %2205 = vmatmul.bf16.gmra.mxu3 %v2069_v17  ;;  %v2052_v8 = vld [vmem:[#allocation2 + $0x170] sm:$0xff] }
 0x399   : > { %v2735_v41 = vadd.f32 %v4996_v59, %v2699_v31  ;;  %v2070_v31 = vpack.c.bf16 %v2052_v8, %v2051_v48 }
 0x39a   : > { %v2166_v12 = vpop.f32.mrf.mxu3 }
 0x39b   : > { %v2234_v54 = vadd.f32 %v2166_v12, %v2000_v37  ;;  %vm2767_vm10 = vcmp.gt.f32.partialorder %v2735_v41, 0.0  ;;  %v2799_v29 = vmul.f32 0.1, %v2735_v41  ;;  %v2521_v37 = vld [vmem:[#allocation2 + $0x19a] sm:$0xff] }
 0x39c   : > { %v2538_v12 = vpack.c.bf16 %v2522_v33, %v2521_v37 }
 0x39d   : > { %v2467_v52 = vadd.f32 %v5015_v43, %v2234_v54  ;;  %v2831_v13 = vsel %vm2767_vm10, %v2735_v41, %v2799_v29  ;;  %v5093_v43 = vpop.f32.mrf.mxu1  ;;  %v5095_v56 = vpop.f32.mrf.mxu2  ;;  %v5491_v54 = vld [vmem:[#allocation20_spill] sm:$0xff] }
 0x39e   : > { %v2859_v11 = vpack.c.bf16 %v2831_v13, %v2830_v9  ;;  %v1537_v29 = vadd.f32 %v5491_v54, %v4836_v28  ;;  %2686 = vmatmul.bf16.gmra.mxu1 %v2538_v12 }
 0x39f   : > { %v2700_v42 = vadd.f32 %v5021_v23, %v2467_v52  ;;  %v2288_v23 = vld [vmem:[#allocation2 + $0x199] sm:$0xff] }
 0x3a0   : > { %2963 = vmatmul.bf16.gmra.mxu2 %v2859_v11  ;;  %v2305_v3 = vpack.c.bf16 %v2289_v47, %v2288_v23 }
 0x3a1   : > { %v2736_v51 = vadd.f32 %v4996_v59, %v2700_v42  ;;  %v5492_v42 = vld [vmem:[#allocation46_spill] sm:$0xff] }
 0x3a2   : > { %v2168_v40 = vpop.f32.mrf.mxu3  ;;  %2453 = vmatmul.bf16.gmra.mxu0 %v2305_v3  ;;  %v5494_v3 = vld [vmem:[#allocation49_spill] sm:$0xff] }
 0x3a3   : > { %v2235_v17 = vadd.f32 %v2168_v40, %v2001_v58  ;;  %v2800_v9 = vmul.f32 0.1, %v2736_v51  ;;  %vm2768_vm11 = vcmp.gt.f32.partialorder %v2736_v51, 0.0  ;;  %v1770_v58 = vadd.f32 %v5492_v42, %v1537_v29 }
 0x3a5   : > { %v2468_v39 = vadd.f32 %v5033_v19, %v2235_v17  ;;  %v2002_v19 = vadd.f32 %v4926_v24, %v1769_v6  ;;  %v2832_v55 = vsel %vm2768_vm11, %v2736_v51, %v2800_v9  ;;  %v5109_v28 = vpop.f32.mrf.mxu1  ;;  %v5111_v48 = vpop.f32.mrf.mxu2  ;;  %v5493_v24 = vld [vmem:[#allocation21_spill] sm:$0xff] }
 0x3a6   : > { %v1538_v8 = vadd.f32 %v5493_v24, %v4848_v50 }
 0x3a7   : > { %v2701_v41 = vadd.f32 %v5035_v61, %v2468_v39  ;;  %2210 = vmatmul.bf16.gmra.mxu3 %v2070_v31  ;;  %v5105_v61 = vpop.f32.mrf.mxu0  ;;  %v2003_v39 = vadd.f32 %v4933_v53, %v1770_v58  ;;  %v5495_v53 = vld [vmem:[#allocation22_spill] sm:$0xff] }
 0x3a9   : > { %v2737_v52 = vadd.f32 %v4996_v59, %v2701_v41  ;;  %v1771_v41 = vadd.f32 %v5494_v3, %v1538_v8 }
 0x3aa   : > { %v2171_v13 = vpop.f32.mrf.mxu3 }
 0x3ab   : > { %v2236_v44 = vadd.f32 %v2171_v13, %v2002_v19  ;;  %vm2769_vm12 = vcmp.gt.f32.partialorder %v2737_v52, 0.0  ;;  %v2801_v27 = vmul.f32 0.1, %v2737_v52  ;;  %v2004_v29 = vadd.f32 %v4944_v35, %v1771_v41 }
 0x3ad   : > { %v2469_v11 = vadd.f32 %v5045_v20, %v2236_v44  ;;  %v2833_v32 = vsel %vm2769_vm12, %v2737_v52, %v2801_v27  ;;  %v2054_v20 = vld [vmem:[#allocation2 + $0x188] sm:$0xff]  ;;  %v2649_v50 = vpop.f32.mrf.mxu1  ;;  %v5121_v12 = vpop.f32.mrf.mxu2 }
 0x3ae   : > { %v2860_v40 = vpack.c.bf16 %v2833_v32, %v2832_v55  ;;  %v2071_v47 = vpack.c.bf16 %v2054_v20, %v2053_v62  ;;  %v5496_v27 = vld [vmem:[#allocation52_spill] sm:$0xff] }
 0x3af   : > { %v2702_v17 = vadd.f32 %v5050_v18, %v2469_v11  ;;  %v2416_v37 = vpop.f32.mrf.mxu0  ;;  %v1539_v18 = vadd.f32 %v5495_v53, %v4855_v10  ;;  %v5497_v10 = vld [vmem:[#allocation24_spill] sm:$0xff] }
 0x3b0   : > { %2968 = vmatmul.bf16.gmra.mxu2 %v2860_v40  ;;  %v1540_v42 = vadd.f32 %v5497_v10, %v4865_v21  ;;  %v5498_v21 = vld [vmem:[#allocation27_spill] sm:$0xff] }
 0x3b1   : > { %v2738_v6 = vadd.f32 %v4996_v59, %v2702_v17  ;;  %v1772_v11 = vadd.f32 %v5496_v27, %v1539_v18 }
 0x3b2   : > { %v2173_v31 = vpop.f32.mrf.mxu3  ;;  %v1773_v20 = vadd.f32 %v4729_v36, %v1540_v42 }
 0x3b3   : > { %v2237_v51 = vadd.f32 %v2173_v31, %v2003_v39  ;;  %v2802_v52 = vmul.f32 0.1, %v2738_v6  ;;  %vm2770_vm13 = vcmp.gt.f32.partialorder %v2738_v6, 0.0  ;;  %v2005_v58 = vadd.f32 %v4954_v26, %v1772_v11 }
 0x3b5   : > { %v2470_v23 = vadd.f32 %v5061_v2, %v2237_v51  ;;  %v2652_v40 = vpop.f32.mrf.mxu1  ;;  %v5133_v8 = vpop.f32.mrf.mxu2 }
 0x3b7   : > { %v2703_v33 = vadd.f32 %v5063_v0, %v2470_v23  ;;  %2215 = vmatmul.bf16.gmra.mxu3 %v2071_v47  ;;  %v2834_v0 = vsel %vm2770_vm13, %v2738_v6, %v2802_v52  ;;  %v2419_v32 = vpop.f32.mrf.mxu0  ;;  %v2006_v6 = vadd.f32 %v4962_v45, %v1773_v20  ;;  %v5500_v45 = vld [vmem:[#allocation29_spill] sm:$0xff] }
 0x3b8   : > { %v1542_v52 = vadd.f32 %v5500_v45, %v4877_v7 }
 0x3b9   : > { %v2739_v54 = vadd.f32 %v4996_v59, %v2703_v33 }
 0x3ba   : > { %v2176_v19 = vpop.f32.mrf.mxu3 }
 0x3bb   : > { %v2238_v2 = vadd.f32 %v2176_v19, %v2004_v29  ;;  %vm2771_vm14 = vcmp.gt.f32.partialorder %v2739_v54, 0.0  ;;  %v2803_v9 = vmul.f32 0.1, %v2739_v54 }
 0x3bd   : > { %v2471_v13 = vadd.f32 %v5075_v34, %v2238_v2  ;;  %v2835_v44 = vsel %vm2771_vm14, %v2739_v54, %v2803_v9  ;;  %v3775_v34 = vld [vmem:[#allocation2] sm:$0xff]  ;;  %v5143_v53 = vpop.f32.mrf.mxu2 }
 0x3be   : > { %v2861_v55 = vpack.c.bf16 %v2835_v44, %v2834_v0  ;;  %v2072_v39 = vpack.c.bf16 %v3775_v34, %v3775_v34  ;;  %v5499_v54 = vld [vmem:[#allocation55_spill] sm:$0xff] }
 0x3bf   : > { %v2704_v35 = vadd.f32 %v5081_v22, %v2471_v13  ;;  %v1541_v22 = vadd.f32 %v5498_v21, %v4870_v46  ;;  %v2421_v47 = vpop.f32.mrf.mxu0 }
 0x3c0   : > { %2973 = vmatmul.bf16.gmra.mxu2 %v2861_v55 }
 0x3c1   : > { %v2740_v31 = vadd.f32 %v4996_v59, %v2704_v35  ;;  %v1774_v46 = vadd.f32 %v5499_v54, %v1541_v22  ;;  %v5502_v35 = vld [vmem:[#allocation31_spill] sm:$0xff]  ;;  %v5504_v22 = vld [vmem:[#allocation34_spill] sm:$0xff] }
 0x3c2   : > { %v2178_v24 = vpop.f32.mrf.mxu3  ;;  %v5506_v54 = vld [vmem:[#allocation38_spill] sm:$0xff] }
 0x3c3   : > { %v2239_v17 = vadd.f32 %v2178_v24, %v2005_v58  ;;  %v2804_v23 = vmul.f32 0.1, %v2740_v31  ;;  %vm2772_vm15 = vcmp.gt.f32.partialorder %v2740_v31, 0.0  ;;  %v2007_v2 = vadd.f32 %v4967_v63, %v1774_v46 }
 0x3c4   : > { %v1543_v58 = vadd.f32 %v5502_v35, %v4882_v30  ;;  %v1545_v46 = vadd.f32 %v5506_v54, %v4893_v60  ;;  %v5513_v54 = vld [vmem:[#allocation67_spill] sm:$0xff] }
 0x3c5   : > { %v2472_v62 = vadd.f32 %v5091_v38, %v2239_v17  ;;  %v2654_v38 = vpop.f32.mrf.mxu1  ;;  %v5153_v10 = vpop.f32.mrf.mxu2 }
 0x3c7   : > { %v2705_v51 = vadd.f32 %v5093_v43, %v2472_v62  ;;  %2220 = vmatmul.bf16.gmra.mxu3 %v2072_v39  ;;  %v2836_v43 = vsel %vm2772_vm15, %v2740_v31, %v2804_v23  ;;  %v2424_v0 = vpop.f32.mrf.mxu0  ;;  %v5503_v62 = vld [vmem:[#allocation59_spill] sm:$0xff] }
 0x3c8   : > { %v1776_v20 = vadd.f32 %v5503_v62, %v1543_v58 }
 0x3c9   : > { %v2741_v26 = vadd.f32 %v4996_v59, %v2705_v51 }
 0x3ca   : > { %v2181_v3 = vpop.f32.mrf.mxu3 }
 0x3cb   : > { %v2240_v41 = vadd.f32 %v2181_v3, %v2006_v6  ;;  %vm2773_vm1 = vcmp.gt.f32.partialorder %v2741_v26, 0.0  ;;  %v2805_v33 = vmul.f32 0.1, %v2741_v26  ;;  %v2009_v6 = vadd.f32 %v4991_v14, %v1776_v20 }
 0x3cd   : > { %v2473_v36 = vadd.f32 %v5105_v61, %v2240_v41  ;;  %v2837_v18 = vsel %vm2773_vm1, %v2741_v26, %v2805_v33  ;;  %v5501_v61 = vld [vmem:[#allocation57_spill] sm:$0xff]  ;;  %v2657_v55 = vpop.f32.mrf.mxu1  ;;  %v5160_v30 = vpop.f32.mrf.mxu2 }
 0x3ce   : > { %v2862_v29 = vpack.c.bf16 %v2837_v18, %v2836_v43  ;;  %v1775_v11 = vadd.f32 %v5501_v61, %v1542_v52  ;;  %v5505_v33 = vld [vmem:[#allocation61_spill] sm:$0xff] }
 0x3cf   : > { %v2706_v19 = vadd.f32 %v5109_v28, %v2473_v36  ;;  %v2426_v51 = vpop.f32.mrf.mxu0 }
 0x3d0   : > { %2978 = vmatmul.bf16.gmra.mxu2 %v2862_v29  ;;  %v2008_v28 = vadd.f32 %v4979_v1, %v1775_v11  ;;  %v1544_v1 = vadd.f32 %v5504_v22, %v4888_v49 }
 0x3d1   : > { %v2742_v44 = vadd.f32 %v4996_v59, %v2706_v19 }
 0x3d2   : > { %v2183_v9 = vpop.f32.mrf.mxu3  ;;  %v1777_v36 = vadd.f32 %v5505_v33, %v1544_v1 }
 0x3d3   : > { %v2241_v13 = vadd.f32 %v2183_v9, %v2007_v2  ;;  %v2806_v63 = vmul.f32 0.1, %v2742_v44  ;;  %vm2774_vm2 = vcmp.gt.f32.partialorder %v2742_v44, 0.0 }
 0x3d4   : > { %v2010_v45 = vadd.f32 %v5007_v57, %v1777_v36  ;;  %v5508_v57 = vld [vmem:[#allocation41_spill] sm:$0xff] }
 0x3d5   : > { %v2474_v27 = vadd.f32 %v2416_v37, %v2241_v13  ;;  %v2838_v39 = vsel %vm2774_vm2, %v2742_v44, %v2806_v63  ;;  %v2659_v21 = vpop.f32.mrf.mxu1  ;;  %v5171_v14 = vpop.f32.mrf.mxu2  ;;  %v5507_v13 = vld [vmem:[#allocation63_spill] sm:$0xff]  ;;  %v1546_v61 = vadd.f32 %v5508_v57, %v4902_v5 }
 0x3d6   : > { %v1778_v44 = vadd.f32 %v5507_v13, %v1545_v46 }
 0x3d7   : > { %v2707_v42 = vadd.f32 %v2649_v50, %v2474_v27  ;;  %v2429_v18 = vpop.f32.mrf.mxu0  ;;  %v5174_v27 = vld [vmem:[#allocation7] ss:$0 sm:$0xff] }
 0x3d9   : > { %v2743_v7 = vadd.f32 %v4996_v59, %v2707_v42  ;;  %v2011_v42 = vadd.f32 %v5023_v15, %v1778_v44  ;;  %v5510_v15 = vld [vmem:[#allocation78_spill] sm:$0xff] }
 0x3da   : > { %v2186_v24 = vpop.f32.mrf.mxu3 }
 0x3db   : > { %v2242_v17 = vadd.f32 %v2186_v24, %v2008_v28  ;;  %vm2775_vm3 = vcmp.gt.f32.partialorder %v2743_v7, 0.0  ;;  %v2807_v34 = vmul.f32 0.1, %v2743_v7 }
 0x3dd   : > { %v2475_v37 = vadd.f32 %v2419_v32, %v2242_v17  ;;  %v2839_v31 = vsel %vm2775_vm3, %v2743_v7, %v2807_v34  ;;  %v5509_v34 = vld [vmem:[#allocation65_spill] sm:$0xff] }
 0x3de   : > { %v2863_v50 = vpack.c.bf16 %v2839_v31, %v2838_v39  ;;  %v3776_v39 = vld [vmem:[%s3998_s22] sm:$0xff] }
 0x3df   : > { %v2708_v26 = vadd.f32 %v2652_v40, %v2475_v37  ;;  %v2662_v40 = vpop.f32.mrf.mxu1  ;;  %v2431_v35 = vpop.f32.mrf.mxu0  ;;  %v1779_v37 = vadd.f32 %v5509_v34, %v1546_v61  ;;  %v5517_v34 = vld [vmem:[#allocation80_spill] sm:$0xff] }
 0x3e0   : > { %2983 = vmatmul.bf16.gmra.mxu2 %v2863_v50 }
 0x3e1   : > { %v2744_v32 = vadd.f32 %v4996_v59, %v2708_v26 }
 0x3e2   : > { %v2188_v23 = vpop.f32.mrf.mxu3 }
 0x3e3   : > { %v2243_v3 = vadd.f32 %v2188_v23, %v2009_v6  ;;  %v2808_v49 = vmul.f32 0.1, %v2744_v32  ;;  %vm2776_vm4 = vcmp.gt.f32.partialorder %v2744_v32, 0.0 }
 0x3e5   : > { %v2476_v41 = vadd.f32 %v2421_v47, %v2243_v3  ;;  %v2840_v9 = vsel %vm2776_vm4, %v2744_v32, %v2808_v49 }
 0x3e7   : > { %v2709_v43 = vadd.f32 %v2654_v38, %v2476_v41  ;;  %v2664_v28 = vpop.f32.mrf.mxu1  ;;  %v2434_v32 = vpop.f32.mrf.mxu0 }
 0x3e9   : > { %v2745_v29 = vadd.f32 %v4996_v59, %v2709_v43 }
 0x3ea   : > { %v2191_v52 = vpop.f32.mrf.mxu3 }
 0x3eb   : > { %v2244_v19 = vadd.f32 %v2191_v52, %v2010_v45  ;;  %vm2777_vm5 = vcmp.gt.f32.partialorder %v2745_v29, 0.0  ;;  %v2809_v47 = vmul.f32 0.1, %v2745_v29  ;;  %v3777_v45 = vld [vmem:[%s3998_s22 + $0x8] sm:$0xff] }
 0x3ed   : > { %v2477_v2 = vadd.f32 %v2424_v0, %v2244_v19  ;;  %v2841_v38 = vsel %vm2777_vm5, %v2745_v29, %v2809_v47  ;;  %v5514_v47 = vld [vmem:[#allocation79_spill] sm:$0xff] }
 0x3ee   : > { %v2864_v60 = vpack.c.bf16 %v2841_v38, %v2840_v9 }
 0x3ef   : > { %v2710_v11 = vadd.f32 %v2657_v55, %v2477_v2  ;;  %v5511_v55 = vld [vmem:[#allocation44_spill] sm:$0xff]  ;;  %v2667_v29 = vpop.f32.mrf.mxu1  ;;  %v5515_v2 = vld [vmem:[#allocation47_spill] sm:$0xff] }
 0x3f0   : > { %2988 = vmatmul.bf16.gmra.mxu2 %v2864_v60  ;;  %v1547_v20 = vadd.f32 %v5511_v55, %v5510_v15  ;;  %v1548_v9 = vadd.f32 %v5515_v2, %v5514_v47 }
 0x3f1   : > { %v2746_v24 = vadd.f32 %v4996_v59, %v2710_v11 }
 0x3f2   : > { %v2193_v58 = vpop.f32.mrf.mxu3  ;;  %v1780_v46 = vadd.f32 %v5513_v54, %v1547_v20 }
 0x3f3   : > { %v2245_v7 = vadd.f32 %v2193_v58, %v2011_v42  ;;  %v2949_v0 = vpop.f32.mrf.mxu2  ;;  %v2810_v1 = vmul.f32 0.1, %v2746_v24  ;;  %vm2778_vm7 = vcmp.gt.f32.partialorder %v2746_v24, 0.0  ;;  %v5516_v58 = vld [vmem:[#allocation68_spill] sm:$0xff] }
 0x3f4   : > { %v2950_v63 = vadd.f32 %v5174_v27, %v2949_v0  ;;  %v2013_v13 = vadd.f32 %v5052_v4, %v1780_v46  ;;  %v2436_v0 = vpop.f32.mrf.mxu0 }
 0x3f5   : > { %v2478_v17 = vadd.f32 %v2426_v51, %v2245_v7  ;;  %v5512_v51 = vld [vmem:[#allocation10_spill] sm:$0xff]  ;;  %v2842_v36 = vsel %vm2778_vm7, %v2746_v24, %v2810_v1  ;;  %v1781_v7 = vadd.f32 %v5516_v58, %v1548_v9 }
 0x3f6   : > { %v3029_v31 = vadd.f32 %v3776_v39, %v2950_v63  ;;  %v2012_v22 = vadd.f32 %v5512_v51, %v1779_v37  ;;  %v3778_v63 = vld [vmem:[%s3998_s22 + $0x10] sm:$0xff] }
 0x3f7   : > { %v2711_v62 = vadd.f32 %v2659_v21, %v2478_v17  ;;  %v2669_v17 = vpop.f32.mrf.mxu1  ;;  %v5518_v37 = vld [vmem:[#allocation50_spill] sm:$0xff] }
 0x3f8   : > { %vm3061_vm6 = vcmp.gt.f32.partialorder %v3029_v31, 0.0  ;;  %v3093_v5 = vmul.f32 0.1, %v3029_v31  ;;  %v1549_v39 = vadd.f32 %v5518_v37, %v5517_v34 }
 0x3f9   : > { %v2747_v50 = vadd.f32 %v4996_v59, %v2711_v62  ;;  %v2014_v62 = vadd.f32 %v5065_v25, %v1781_v7 }
 0x3fa   : > { %v3125_v26 = vsel %vm3061_vm6, %v3029_v31, %v3093_v5  ;;  %v2196_v21 = vpop.f32.mrf.mxu3 }
 0x3fb   : > { %3157 = vst.msk [vmem:[%s5188_s14] sm:$0xff] %vm384_vm0, %v3125_v26  ;;  %v2246_v6 = vadd.f32 %v2196_v21, %v2012_v22  ;;  %v2951_v23 = vpop.f32.mrf.mxu2  ;;  %vm2779_vm8 = vcmp.gt.f32.partialorder %v2747_v50, 0.0  ;;  %v2811_v3 = vmul.f32 0.1, %v2747_v50  ;;  %v5519_v26 = vld [vmem:[#allocation69_spill] sm:$0xff] }
 0x3fc   : > { %v2952_v41 = vadd.f32 %v5174_v27, %v2951_v23  ;;  %v1782_v21 = vadd.f32 %v5519_v26, %v1549_v39 }
 0x3fd   : > { %v2479_v33 = vadd.f32 %v2429_v18, %v2246_v6  ;;  %v2843_v43 = vsel %vm2779_vm8, %v2747_v50, %v2811_v3  ;;  %v3779_v6 = vld [vmem:[%s3998_s22 + $0x18] sm:$0xff]  ;;  %v2439_v3 = vpop.f32.mrf.mxu0 }
 0x3fe   : > { %v3030_v49 = vadd.f32 %v3777_v45, %v2952_v41  ;;  %v2865_v52 = vpack.c.bf16 %v2843_v43, %v2842_v36  ;;  %v5521_v36 = vld [vmem:[#allocation53_spill] sm:$0xff]  ;;  %v2015_v46 = vadd.f32 %v5083_v16, %v1782_v21 }
 0x3ff   : > { %v2712_v38 = vadd.f32 %v2662_v40, %v2479_v33  ;;  %v5520_v33 = vld [vmem:[#allocation81_spill] sm:$0xff] }
 0x400   : > { %vm3062_vm9 = vcmp.gt.f32.partialorder %v3030_v49, 0.0  ;;  %v3094_v19 = vmul.f32 0.1, %v3030_v49  ;;  %2993 = vmatmul.bf16.gmra.mxu2 %v2865_v52  ;;  %v1550_v43 = vadd.f32 %v5521_v36, %v5520_v33  ;;  %v5528_v33 = vld [vmem:[#allocation72_spill] sm:$0xff] }
 0x401   : > { %v2748_v11 = vadd.f32 %v4996_v59, %v2712_v38  ;;  %v5522_v38 = vld [vmem:[#allocation70_spill] sm:$0xff] }
 0x402   : > { %v3126_v18 = vsel %vm3062_vm9, %v3030_v49, %v3094_v19  ;;  %v2198_v44 = vpop.f32.mrf.mxu3 }
 0x403   : > { %3158 = vst.msk [vmem:[%s5188_s14 + $0x8] sm:$0xff] %vm384_vm0, %v3126_v18  ;;  %v2247_v60 = vadd.f32 %v2198_v44, %v2013_v13  ;;  %v2954_v57 = vpop.f32.mrf.mxu2  ;;  %v2812_v5 = vmul.f32 0.1, %v2748_v11  ;;  %vm2780_vm11 = vcmp.gt.f32.partialorder %v2748_v11, 0.0  ;;  %v1783_v13 = vadd.f32 %v5522_v38, %v1550_v43  ;;  %v3780_v18 = vld [vmem:[%s3998_s22 + $0x20] sm:$0xff] }
 0x404   : > { %v2955_v61 = vadd.f32 %v5174_v27, %v2954_v57  ;;  %v5524_v57 = vld [vmem:[#allocation54_spill] sm:$0xff] }
 0x405   : > { %v2480_v42 = vadd.f32 %v2431_v35, %v2247_v60  ;;  %v2844_v22 = vsel %vm2780_vm11, %v2748_v11, %v2812_v5  ;;  %v5523_v60 = vld [vmem:[#allocation82_spill] sm:$0xff]  ;;  %v2441_v7 = vpop.f32.mrf.mxu0  ;;  %v3781_v5 = vld [vmem:[%s3998_s22 + $0x28] sm:$0xff] }
 0x406   : > { %v3031_v24 = vadd.f32 %v3778_v63, %v2955_v61  ;;  %v1551_v61 = vadd.f32 %v5524_v57, %v5523_v60 }
 0x407   : > { %v2713_v40 = vadd.f32 %v2664_v28, %v2480_v42  ;;  %v2016_v42 = vadd.f32 %v5095_v56, %v1783_v13  ;;  %v5525_v56 = vld [vmem:[#allocation71_spill] sm:$0xff] }
 0x408   : > { %vm3063_vm10 = vcmp.gt.f32.partialorder %v3031_v24, 0.0  ;;  %v3095_v4 = vmul.f32 0.1, %v3031_v24 }
 0x409   : > { %v2749_v31 = vadd.f32 %v4996_v59, %v2713_v40 }
 0x40a   : > { %v3127_v35 = vsel %vm3063_vm10, %v3031_v24, %v3095_v4  ;;  %v2201_v15 = vpop.f32.mrf.mxu3 }
 0x40b   : > { %3159 = vst.msk [vmem:[%s5188_s14 + $0x10] sm:$0xff] %vm384_vm0, %v3127_v35  ;;  %v2248_v55 = vadd.f32 %v2201_v15, %v2014_v62  ;;  %v2956_v20 = vpop.f32.mrf.mxu2  ;;  %vm2781_vm12 = vcmp.gt.f32.partialorder %v2749_v31, 0.0  ;;  %v2813_v28 = vmul.f32 0.1, %v2749_v31  ;;  %v1784_v62 = vadd.f32 %v5525_v56, %v1551_v61  ;;  %v5531_v61 = vld [vmem:[#allocation73_spill] sm:$0xff] }
 0x40c   : > { %v2957_v50 = vadd.f32 %v5174_v27, %v2956_v20  ;;  %v5526_v20 = vld [vmem:[#allocation83_spill] sm:$0xff] }
 0x40d   : > { %v2481_v51 = vadd.f32 %v2434_v32, %v2248_v55  ;;  %v2845_v1 = vsel %vm2781_vm12, %v2749_v31, %v2813_v28  ;;  %v2672_v32 = vpop.f32.mrf.mxu1  ;;  %v5527_v28 = vld [vmem:[#allocation56_spill] sm:$0xff] }
 0x40e   : > { %v3032_v25 = vadd.f32 %v3779_v6, %v2957_v50  ;;  %v2866_v23 = vpack.c.bf16 %v2845_v1, %v2844_v22  ;;  %v1552_v50 = vadd.f32 %v5527_v28, %v5526_v20  ;;  %v2017_v22 = vadd.f32 %v5111_v48, %v1784_v62  ;;  %v3784_v20 = vld [vmem:[%s3998_s22 + $0x40] sm:$0xff] }
 0x40f   : > { %v2714_v54 = vadd.f32 %v2667_v29, %v2481_v51 }
 0x410   : > { %vm3064_vm13 = vcmp.gt.f32.partialorder %v3032_v25, 0.0  ;;  %v3096_v41 = vmul.f32 0.1, %v3032_v25  ;;  %2998 = vmatmul.bf16.gmra.mxu2 %v2866_v23  ;;  %v1785_v36 = vadd.f32 %v5528_v33, %v1552_v50 }
 0x411   : > { %v2750_v2 = vadd.f32 %v4996_v59, %v2714_v54  ;;  %v3782_v54 = vld [vmem:[%s3998_s22 + $0x30] sm:$0xff] }
 0x412   : > { %v3128_v45 = vsel %vm3064_vm13, %v3032_v25, %v3096_v41  ;;  %v2203_v49 = vpop.f32.mrf.mxu3  ;;  %v2444_v25 = vpop.f32.mrf.mxu0 }
 0x413   : > { %3160 = vst.msk [vmem:[%s5188_s14 + $0x18] sm:$0xff] %vm384_vm0, %v3128_v45  ;;  %v2249_v52 = vadd.f32 %v2203_v49, %v2015_v46  ;;  %v2959_v19 = vpop.f32.mrf.mxu2  ;;  %v2814_v58 = vmul.f32 0.1, %v2750_v2  ;;  %vm2782_vm15 = vcmp.gt.f32.partialorder %v2750_v2, 0.0  ;;  %v5529_v45 = vld [vmem:[#allocation84_spill] sm:$0xff]  ;;  %v5530_v49 = vld [vmem:[#allocation58_spill] sm:$0xff] }
 0x414   : > { %v2960_v47 = vadd.f32 %v5174_v27, %v2959_v19 }
 0x415   : > { %v2482_v9 = vadd.f32 %v2436_v0, %v2249_v52  ;;  %v2674_v4 = vpop.f32.mrf.mxu1  ;;  %v2846_v39 = vsel %vm2782_vm15, %v2750_v2, %v2814_v58  ;;  %v1553_v52 = vadd.f32 %v5530_v49, %v5529_v45  ;;  %v5537_v45 = vld [vmem:[#allocation75_spill] sm:$0xff]  ;;  %v3785_v49 = vld [vmem:[%s3998_s22 + $0x48] sm:$0xff] }
 0x416   : > { %v3033_v44 = vadd.f32 %v3780_v18, %v2960_v47  ;;  %v2018_v47 = vadd.f32 %v5121_v12, %v1785_v36 }
 0x417   : > { %v2715_v29 = vadd.f32 %v2669_v17, %v2482_v9 }
 0x418   : > { %vm3065_vm14 = vcmp.gt.f32.partialorder %v3033_v44, 0.0  ;;  %v3097_v16 = vmul.f32 0.1, %v3033_v44 }
 0x419   : > { %v2751_v11 = vadd.f32 %v4996_v59, %v2715_v29 }
 0x41a   : > { %v3129_v63 = vsel %vm3065_vm14, %v3033_v44, %v3097_v16  ;;  %v2206_v24 = vpop.f32.mrf.mxu3  ;;  %v2446_v12 = vpop.f32.mrf.mxu0 }
 0x41b   : > { %3161 = vst.msk [vmem:[%s5188_s14 + $0x20] sm:$0xff] %vm384_vm0, %v3129_v63  ;;  %v2250_v0 = vadd.f32 %v2206_v24, %v2016_v42  ;;  %v2961_v40 = vpop.f32.mrf.mxu2  ;;  %vm2783_vm1 = vcmp.gt.f32.partialorder %v2751_v11, 0.0  ;;  %v2815_v17 = vmul.f32 0.1, %v2751_v11  ;;  %v3783_v42 = vld [vmem:[%s3998_s22 + $0x38] sm:$0xff] }
 0x41c   : > { %v2962_v34 = vadd.f32 %v5174_v27, %v2961_v40  ;;  %v5533_v40 = vld [vmem:[#allocation60_spill] sm:$0xff] }
 0x41d   : > { %v2483_v37 = vadd.f32 %v2439_v3, %v2250_v0  ;;  %v2847_v31 = vsel %vm2783_vm1, %v2751_v11, %v2815_v17  ;;  %v2677_v43 = vpop.f32.mrf.mxu1  ;;  %v1786_v11 = vadd.f32 %v5531_v61, %v1553_v52  ;;  %v5532_v0 = vld [vmem:[#allocation85_spill] sm:$0xff] }
 0x41e   : > { %v3034_v35 = vadd.f32 %v3781_v5, %v2962_v34  ;;  %v2867_v15 = vpack.c.bf16 %v2847_v31, %v2846_v39  ;;  %v1554_v17 = vadd.f32 %v5533_v40, %v5532_v0  ;;  %v5541_v40 = vld [vmem:[#allocation88_spill] sm:$0xff] }
 0x41f   : > { %v2716_v51 = vadd.f32 %v2672_v32, %v2483_v37  ;;  %v2019_v34 = vadd.f32 %v5133_v8, %v1786_v11 }
 0x420   : > { %vm3066_vm2 = vcmp.gt.f32.partialorder %v3034_v35, 0.0  ;;  %v3098_v55 = vmul.f32 0.1, %v3034_v35  ;;  %3003 = vmatmul.bf16.gmra.mxu2 %v2867_v15  ;;  %v5534_v15 = vld [vmem:[#allocation74_spill] sm:$0xff] }
 0x421   : > { %v2752_v3 = vadd.f32 %v4996_v59, %v2716_v51 }
 0x422   : > { %v3130_v1 = vsel %vm3066_vm2, %v3034_v35, %v3098_v55  ;;  %v2208_v26 = vpop.f32.mrf.mxu3  ;;  %v1787_v55 = vadd.f32 %v5534_v15, %v1554_v17  ;;  %v2449_v51 = vpop.f32.mrf.mxu0  ;;  %v5542_v17 = vld [vmem:[#allocation66_spill] sm:$0xff] }
 0x423   : > { %3162 = vst.msk [vmem:[%s5188_s14 + $0x28] sm:$0xff] %vm384_vm0, %v3130_v1  ;;  %v2251_v21 = vadd.f32 %v2208_v26, %v2017_v22  ;;  %v2964_v6 = vpop.f32.mrf.mxu2  ;;  %v2816_v2 = vmul.f32 0.1, %v2752_v3  ;;  %vm2784_vm4 = vcmp.gt.f32.partialorder %v2752_v3, 0.0  ;;  %v5535_v22 = vld [vmem:[#allocation86_spill] sm:$0xff] }
 0x424   : > { %v2965_v23 = vadd.f32 %v5174_v27, %v2964_v6  ;;  %v5536_v1 = vld [vmem:[#allocation62_spill] sm:$0xff]  ;;  %v2020_v6 = vadd.f32 %v5143_v53, %v1787_v55 }
 0x425   : > { %v2484_v41 = vadd.f32 %v2441_v7, %v2251_v21  ;;  %v2848_v60 = vsel %vm2784_vm4, %v2752_v3, %v2816_v2  ;;  %v2679_v63 = vpop.f32.mrf.mxu1  ;;  %v1555_v26 = vadd.f32 %v5536_v1, %v5535_v22  ;;  %v5538_v2 = vld [vmem:[#allocation87_spill] sm:$0xff] }
 0x426   : > { %v3035_v46 = vadd.f32 %v3782_v54, %v2965_v23  ;;  %v3788_v22 = vld [vmem:[%s3998_s22 + $0x58] sm:$0xff] }
 0x427   : > { %v2717_v32 = vadd.f32 %v2674_v4, %v2484_v41  ;;  %v1788_v53 = vadd.f32 %v5537_v45, %v1555_v26 }
 0x428   : > { %vm3067_vm3 = vcmp.gt.f32.partialorder %v3035_v46, 0.0  ;;  %v3099_v48 = vmul.f32 0.1, %v3035_v46 }
 0x429   : > { %v2753_v19 = vadd.f32 %v4996_v59, %v2717_v32 }
 0x42a   : > { %v3131_v9 = vsel %vm3067_vm3, %v3035_v46, %v3099_v48  ;;  %v2211_v38 = vpop.f32.mrf.mxu3 }
 0x42b   : > { %3163 = vst.msk [vmem:[%s5188_s14 + $0x30] sm:$0xff] %vm384_vm0, %v3131_v9  ;;  %v2252_v13 = vadd.f32 %v2211_v38, %v2018_v47  ;;  %v2966_v18 = vpop.f32.mrf.mxu2  ;;  %vm2785_vm5 = vcmp.gt.f32.partialorder %v2753_v19, 0.0  ;;  %v2817_v44 = vmul.f32 0.1, %v2753_v19  ;;  %v5539_v9 = vld [vmem:[#allocation64_spill] sm:$0xff] }
 0x42c   : > { %v2967_v29 = vadd.f32 %v5174_v27, %v2966_v18  ;;  %v1556_v38 = vadd.f32 %v5539_v9, %v5538_v2  ;;  %v2021_v18 = vadd.f32 %v5153_v10, %v1788_v53 }
 0x42d   : > { %v2485_v16 = vadd.f32 %v2444_v25, %v2252_v13  ;;  %v2849_v57 = vsel %vm2785_vm5, %v2753_v19, %v2817_v44  ;;  %v2682_v23 = vpop.f32.mrf.mxu1  ;;  %v2451_v44 = vpop.f32.mrf.mxu0 }
 0x42e   : > { %v3036_v58 = vadd.f32 %v3783_v42, %v2967_v29  ;;  %v2868_v7 = vpack.c.bf16 %v2849_v57, %v2848_v60 }
 0x42f   : > { %v2718_v4 = vadd.f32 %v2677_v43, %v2485_v16 }
 0x430   : > { %vm3068_vm6 = vcmp.gt.f32.partialorder %v3036_v58, 0.0  ;;  %v3100_v24 = vmul.f32 0.1, %v3036_v58  ;;  %3008 = vmatmul.bf16.gmra.mxu2 %v2868_v7 }
 0x431   : > { %v2754_v5 = vadd.f32 %v4996_v59, %v2718_v4  ;;  %v1557_v4 = vadd.f32 %v5542_v17, %v5541_v40 }
 0x432   : > { %v3132_v37 = vsel %vm3068_vm6, %v3036_v58, %v3100_v24  ;;  %v2213_v39 = vpop.f32.mrf.mxu3  ;;  %v5540_v58 = vld [vmem:[#allocation76_spill] sm:$0xff] }
 0x433   : > { %3164 = vst.msk [vmem:[%s5188_s14 + $0x38] sm:$0xff] %vm384_vm0, %v3132_v37  ;;  %v2253_v31 = vadd.f32 %v2213_v39, %v2019_v34  ;;  %v2969_v56 = vpop.f32.mrf.mxu2  ;;  %v2818_v25 = vmul.f32 0.1, %v2754_v5  ;;  %vm2786_vm8 = vcmp.gt.f32.partialorder %v2754_v5, 0.0  ;;  %v1789_v7 = vadd.f32 %v5540_v58, %v1556_v38  ;;  %v3787_v34 = vld [vmem:[#allocation5] ss:$0 sm:$0xff] }
 0x434   : > { %v2970_v62 = vadd.f32 %v5174_v27, %v2969_v56 }
 0x435   : > { %v2486_v35 = vadd.f32 %v2446_v12, %v2253_v31  ;;  %v2850_v32 = vsel %vm2786_vm8, %v2754_v5, %v2818_v25  ;;  %v2684_v61 = vpop.f32.mrf.mxu1  ;;  %v2022_v39 = vadd.f32 %v5160_v30, %v1789_v7  ;;  %v5543_v30 = vld [vmem:[#allocation77_spill] sm:$0xff] }
 0x436   : > { %v3037_v28 = vadd.f32 %v3784_v20, %v2970_v62 }
 0x437   : > { %v2719_v50 = vadd.f32 %v2679_v63, %v2486_v35  ;;  %v3786_v63 = vld [vmem:[%s3998_s22 + $0x50] sm:$0xff] }
 0x438   : > { %vm3069_vm7 = vcmp.gt.f32.partialorder %v3037_v28, 0.0  ;;  %v3101_v8 = vmul.f32 0.1, %v3037_v28 }
 0x439   : > { %v2755_v21 = vadd.f32 %v4996_v59, %v2719_v50 }
 0x43a   : > { %v3133_v3 = vsel %vm3069_vm7, %v3037_v28, %v3101_v8  ;;  %v2216_v41 = vpop.f32.mrf.mxu3  ;;  %v1790_v8 = vadd.f32 %v5543_v30, %v1557_v4 }
 0x43b   : > { %3165 = vst.msk [vmem:[%s5188_s14 + $0x40] sm:$0xff] %vm384_vm0, %v3133_v3  ;;  %v2254_v33 = vadd.f32 %v2216_v41, %v2020_v6  ;;  %v2971_v36 = vpop.f32.mrf.mxu2  ;;  %vm2787_vm9 = vcmp.gt.f32.partialorder %v2755_v21, 0.0  ;;  %v2819_v43 = vmul.f32 0.1, %v2755_v21 }
 0x43c   : > { %v2972_v54 = vadd.f32 %v5174_v27, %v2971_v36  ;;  %v2023_v25 = vadd.f32 %v5171_v14, %v1790_v8 }
 0x43d   : > { %v2487_v46 = vadd.f32 %v2449_v51, %v2254_v33  ;;  %v2851_v48 = vsel %vm2787_vm9, %v2755_v21, %v2819_v43  ;;  %v2687_v55 = vpop.f32.mrf.mxu1 }
 0x43e   : > { %v3038_v52 = vadd.f32 %v3785_v49, %v2972_v54  ;;  %v2869_v19 = vpack.c.bf16 %v2851_v48, %v2850_v32  ;;  %v3789_v48 = vld [vmem:[%s3998_s22 + $0x60] sm:$0xff] }
 0x43f   : > { %v2720_v13 = vadd.f32 %v2682_v23, %v2487_v46 }
 0x440   : > { %vm3070_vm10 = vcmp.gt.f32.partialorder %v3038_v52, 0.0  ;;  %v3102_v47 = vmul.f32 0.1, %v3038_v52  ;;  %3013 = vmatmul.bf16.gmra.mxu2 %v2869_v19 }
 0x441   : > { %v2756_v12 = vadd.f32 %v4996_v59, %v2720_v13  ;;  %v2454_v59 = vpop.f32.mrf.mxu0 }
 0x442   : > { %v3134_v29 = vsel %vm3070_vm10, %v3038_v52, %v3102_v47  ;;  %v2218_v16 = vpop.f32.mrf.mxu3 }
 0x443   : > { %3166 = vst.msk [vmem:[%s5188_s14 + $0x48] sm:$0xff] %vm384_vm0, %v3134_v29  ;;  %v2255_v60 = vadd.f32 %v2218_v16, %v2021_v18  ;;  %v2974_v57 = vpop.f32.mrf.mxu2  ;;  %v2820_v31 = vmul.f32 0.1, %v2756_v12  ;;  %vm2788_vm12 = vcmp.gt.f32.partialorder %v2756_v12, 0.0  ;;  %v3790_v18 = vld [vmem:[%s3998_s22 + $0x68] sm:$0xff] }
 0x444   : > { %v2975_v11 = vadd.f32 %v5174_v27, %v2974_v57 }
 0x445   : > { %v2488_v42 = vadd.f32 %v2451_v44, %v2255_v60  ;;  %v2852_v50 = vsel %vm2788_vm12, %v2756_v12, %v2820_v31  ;;  %v2689_v32 = vpop.f32.mrf.mxu1 }
 0x446   : > { %v3039_v24 = vadd.f32 %v3786_v63, %v2975_v11  ;;  %v3791_v11 = vld [vmem:[%s3998_s22 + $0x70] sm:$0xff] }
 0x447   : > { %v2721_v0 = vadd.f32 %v2684_v61, %v2488_v42 }
 0x448   : > { %vm3071_vm11 = vcmp.gt.f32.partialorder %v3039_v24, 0.0  ;;  %v3103_v10 = vmul.f32 0.1, %v3039_v24 }
 0x449   : > { %v2757_v37 = vadd.f32 %v3787_v34, %v2721_v0  ;;  %v2456_v36 = vpop.f32.mrf.mxu0 }
 0x44a   : > { %v3135_v56 = vsel %vm3071_vm11, %v3039_v24, %v3103_v10  ;;  %v2221_v62 = vpop.f32.mrf.mxu3  ;;  %v3792_v24 = vld [vmem:[%s3998_s22 + $0x78] sm:$0xff] }
 0x44b   : > { %3167 = vst.msk [vmem:[%s5188_s14 + $0x50] sm:$0xff] %vm384_vm0, %v3135_v56  ;;  %v2256_v5 = vadd.f32 %v2221_v62, %v2022_v39  ;;  %v2976_v35 = vpop.f32.mrf.mxu2  ;;  %vm2789_vm13 = vcmp.gt.f32.partialorder %v2757_v37, 0.0  ;;  %v2821_v15 = vmul.f32 0.1, %v2757_v37  ;;  %v3794_v62 = vld [vmem:[%s3998_s22 + $0x88] sm:$0xff] }
 0x44c   : > { %v2977_v20 = vadd.f32 %v5174_v27, %v2976_v35 }
 0x44d   : > { %v2489_v28 = vadd.f32 %v2454_v59, %v2256_v5  ;;  %v2853_v51 = vsel %vm2789_vm13, %v2757_v37, %v2821_v15 }
 0x44e   : > { %v3040_v1 = vadd.f32 %v3788_v22, %v2977_v20  ;;  %v2870_v26 = vpack.c.bf16 %v2853_v51, %v2852_v50 }
 0x44f   : > { %v2722_v6 = vadd.f32 %v2687_v55, %v2489_v28  ;;  %v3795_v28 = vld [vmem:[%s3998_s22 + $0x90] sm:$0xff] }
 0x450   : > { %vm3072_vm14 = vcmp.gt.f32.partialorder %v3040_v1, 0.0  ;;  %v3104_v21 = vmul.f32 0.1, %v3040_v1  ;;  %3018 = vmatmul.bf16.gmra.mxu2 %v2870_v26 }
 0x451   : > { %v2758_v54 = vadd.f32 %v3787_v34, %v2722_v6 }
 0x452   : > { %v3136_v23 = vsel %vm3072_vm14, %v3040_v1, %v3104_v21  ;;  %v2223_v3 = vpop.f32.mrf.mxu3  ;;  %v3796_v1 = vld [vmem:[%s3998_s22 + $0x98] sm:$0xff] }
 0x453   : > { %3168 = vst.msk [vmem:[%s5188_s14 + $0x58] sm:$0xff] %vm384_vm0, %v3136_v23  ;;  %v2257_v41 = vadd.f32 %v2223_v3, %v2023_v25  ;;  %v2979_v33 = vpop.f32.mrf.mxu2  ;;  %v2822_v52 = vmul.f32 0.1, %v2758_v54  ;;  %vm2790_vm1 = vcmp.gt.f32.partialorder %v2758_v54, 0.0  ;;  %v3797_v3 = vld [vmem:[%s3998_s22 + $0xa0] sm:$0xff] }
 0x454   : > { %v2980_v43 = vadd.f32 %v5174_v27, %v2979_v33 }
 0x455   : > { %v2490_v46 = vadd.f32 %v2456_v36, %v2257_v41  ;;  %v2854_v38 = vsel %vm2790_vm1, %v2758_v54, %v2822_v52 }
 0x456   : > { %v3041_v45 = vadd.f32 %v3789_v48, %v2980_v43 }
 0x457   : > { %v2723_v53 = vadd.f32 %v2689_v32, %v2490_v46  ;;  %v3798_v46 = vld [vmem:[%s3998_s22 + $0xa8] sm:$0xff] }
 0x458   : > { %vm3073_vm15 = vcmp.gt.f32.partialorder %v3041_v45, 0.0  ;;  %v3105_v49 = vmul.f32 0.1, %v3041_v45 }
 0x459   : > { %v2759_v14 = vadd.f32 %v3787_v34, %v2723_v53  ;;  %v3793_v34 = vld [vmem:[%s3998_s22 + $0x80] sm:$0xff] }
 0x45a   : > { %v3137_v19 = vsel %vm3073_vm15, %v3041_v45, %v3105_v49 }
 0x45b   : > { %3169 = vst.msk [vmem:[%s5188_s14 + $0x60] sm:$0xff] %vm384_vm0, %v3137_v19  ;;  %v2981_v47 = vpop.f32.mrf.mxu2  ;;  %vm2791_vm2 = vcmp.gt.f32.partialorder %v2759_v14, 0.0  ;;  %v2823_v2 = vmul.f32 0.1, %v2759_v14 }
 0x45c   : > { %v2982_v9 = vadd.f32 %v5174_v27, %v2981_v47 }
 0x45d   : > { %v2855_v13 = vsel %vm2791_vm2, %v2759_v14, %v2823_v2  ;;  %v3799_v14 = vld [vmem:[%s3998_s22 + $0xb0] sm:$0xff] }
 0x45e   : > { %v3042_v44 = vadd.f32 %v3790_v18, %v2982_v9  ;;  %v2871_v29 = vpack.c.bf16 %v2855_v13, %v2854_v38  ;;  %v3800_v38 = vld [vmem:[%s3998_s22 + $0xb8] sm:$0xff] }
 0x460   : > { %vm3074_vm3 = vcmp.gt.f32.partialorder %v3042_v44, 0.0  ;;  %v3106_v16 = vmul.f32 0.1, %v3042_v44  ;;  %3023 = vmatmul.bf16.gmra.mxu2 %v2871_v29 }
 0x462   : > { %v3138_v60 = vsel %vm3074_vm3, %v3042_v44, %v3106_v16 }
 0x463   : > { %3170 = vst.msk [vmem:[%s5188_s14 + $0x68] sm:$0xff] %vm384_vm0, %v3138_v60  ;;  %v2984_v57 = vpop.f32.mrf.mxu2  ;;  %v3801_v60 = vld [vmem:[%s3998_s22 + $0xc0] sm:$0xff] }
 0x464   : > { %v2985_v61 = vadd.f32 %v5174_v27, %v2984_v57 }
 0x466   : > { %v3043_v12 = vadd.f32 %v3791_v11, %v2985_v61 }
 0x468   : > { %vm3075_vm4 = vcmp.gt.f32.partialorder %v3043_v12, 0.0  ;;  %v3107_v42 = vmul.f32 0.1, %v3043_v12 }
 0x46a   : > { %v3139_v58 = vsel %vm3075_vm4, %v3043_v12, %v3107_v42 }
 0x46b   : > { %3171 = vst.msk [vmem:[%s5188_s14 + $0x70] sm:$0xff] %vm384_vm0, %v3139_v58  ;;  %v2986_v7 = vpop.f32.mrf.mxu2  ;;  %v3802_v58 = vld [vmem:[%s3998_s22 + $0xc8] sm:$0xff] }
 0x46c   : > { %v2987_v63 = vadd.f32 %v5174_v27, %v2986_v7 }
 0x46e   : > { %v3044_v0 = vadd.f32 %v3792_v24, %v2987_v63 }
 0x470   : > { %vm3076_vm5 = vcmp.gt.f32.partialorder %v3044_v0, 0.0  ;;  %v3108_v10 = vmul.f32 0.1, %v3044_v0 }
 0x472   : > { %v3140_v40 = vsel %vm3076_vm5, %v3044_v0, %v3108_v10 }
 0x473   : > { %3172 = vst.msk [vmem:[%s5188_s14 + $0x78] sm:$0xff] %vm384_vm0, %v3140_v40  ;;  %v2989_v17 = vpop.f32.mrf.mxu2  ;;  %v3803_v40 = vld [vmem:[%s3998_s22 + $0xd0] sm:$0xff] }
 0x474   : > { %v2990_v4 = vadd.f32 %v5174_v27, %v2989_v17 }
 0x476   : > { %v3045_v37 = vadd.f32 %v3793_v34, %v2990_v4 }
 0x478   : > { %vm3077_vm6 = vcmp.gt.f32.partialorder %v3045_v37, 0.0  ;;  %v3109_v39 = vmul.f32 0.1, %v3045_v37 }
 0x47a   : > { %v3141_v31 = vsel %vm3077_vm6, %v3045_v37, %v3109_v39 }
 0x47b   : > { %3173 = vst.msk [vmem:[%s5188_s14 + $0x80] sm:$0xff] %vm384_vm0, %v3141_v31  ;;  %v2991_v56 = vpop.f32.mrf.mxu2  ;;  %v3804_v31 = vld [vmem:[%s3998_s22 + $0xd8] sm:$0xff] }
 0x47c   : > { %v2992_v59 = vadd.f32 %v5174_v27, %v2991_v56 }
 0x47e   : > { %v3046_v5 = vadd.f32 %v3794_v62, %v2992_v59 }
 0x480   : > { %vm3078_vm7 = vcmp.gt.f32.partialorder %v3046_v5, 0.0  ;;  %v3110_v35 = vmul.f32 0.1, %v3046_v5 }
 0x482   : > { %v3142_v15 = vsel %vm3078_vm7, %v3046_v5, %v3110_v35 }
 0x483   : > { %3174 = vst.msk [vmem:[%s5188_s14 + $0x88] sm:$0xff] %vm384_vm0, %v3142_v15  ;;  %v2994_v55 = vpop.f32.mrf.mxu2  ;;  %v3805_v15 = vld [vmem:[%s3998_s22 + $0xe0] sm:$0xff] }
 0x484   : > { %v2995_v20 = vadd.f32 %v5174_v27, %v2994_v55 }
 0x486   : > { %v3047_v50 = vadd.f32 %v3795_v28, %v2995_v20 }
 0x488   : > { %vm3079_vm8 = vcmp.gt.f32.partialorder %v3047_v50, 0.0  ;;  %v3111_v51 = vmul.f32 0.1, %v3047_v50 }
 0x48a   : > { %v3143_v30 = vsel %vm3079_vm8, %v3047_v50, %v3111_v51 }
 0x48b   : > { %3175 = vst.msk [vmem:[%s5188_s14 + $0x90] sm:$0xff] %vm384_vm0, %v3143_v30  ;;  %v2996_v8 = vpop.f32.mrf.mxu2  ;;  %v3806_v30 = vld [vmem:[%s3998_s22 + $0xe8] sm:$0xff] }
 0x48c   : > { %v2997_v22 = vadd.f32 %v5174_v27, %v2996_v8 }
 0x48e   : > { %v3048_v26 = vadd.f32 %v3796_v1, %v2997_v22 }
 0x490   : > { %vm3080_vm9 = vcmp.gt.f32.partialorder %v3048_v26, 0.0  ;;  %v3112_v21 = vmul.f32 0.1, %v3048_v26 }
 0x492   : > { %v3144_v6 = vsel %vm3080_vm9, %v3048_v26, %v3112_v21 }
 0x493   : > { %3176 = vst.msk [vmem:[%s5188_s14 + $0x98] sm:$0xff] %vm384_vm0, %v3144_v6  ;;  %v2999_v25 = vpop.f32.mrf.mxu2  ;;  %v3807_v6 = vld [vmem:[%s3998_s22 + $0xf0] sm:$0xff] }
 0x494   : > { %v3000_v23 = vadd.f32 %v5174_v27, %v2999_v25 }
 0x496   : > { %v3049_v41 = vadd.f32 %v3797_v3, %v3000_v23 }
 0x498   : > { %vm3081_vm10 = vcmp.gt.f32.partialorder %v3049_v41, 0.0  ;;  %v3113_v33 = vmul.f32 0.1, %v3049_v41 }
 0x49a   : > { %v3145_v36 = vsel %vm3081_vm10, %v3049_v41, %v3113_v33 }
 0x49b   : > { %3177 = vst.msk [vmem:[%s5188_s14 + $0xa0] sm:$0xff] %vm384_vm0, %v3145_v36  ;;  %v3001_v43 = vpop.f32.mrf.mxu2  ;;  %v3808_v36 = vld [vmem:[%s3998_s22 + $0xf8] sm:$0xff] }
 0x49c   : > { %v3002_v54 = vadd.f32 %v5174_v27, %v3001_v43 }
 0x49e   : > { %v3050_v32 = vadd.f32 %v3798_v46, %v3002_v54 }
 0x4a0   : > { %vm3082_vm11 = vcmp.gt.f32.partialorder %v3050_v32, 0.0  ;;  %v3114_v48 = vmul.f32 0.1, %v3050_v32 }
 0x4a2   : > { %v3146_v45 = vsel %vm3082_vm11, %v3050_v32, %v3114_v48 }
 0x4a3   : > { %3178 = vst.msk [vmem:[%s5188_s14 + $0xa8] sm:$0xff] %vm384_vm0, %v3146_v45  ;;  %v3004_v53 = vpop.f32.mrf.mxu2 }
 0x4a4   : > { %v3005_v49 = vadd.f32 %v5174_v27, %v3004_v53 }
 0x4a6   : > { %v3051_v52 = vadd.f32 %v3799_v14, %v3005_v49 }
 0x4a8   : > { %vm3083_vm12 = vcmp.gt.f32.partialorder %v3051_v52, 0.0  ;;  %v3115_v19 = vmul.f32 0.1, %v3051_v52 }
 0x4aa   : > { %v3147_v47 = vsel %vm3083_vm12, %v3051_v52, %v3115_v19 }
 0x4ab   : > { %3179 = vst.msk [vmem:[%s5188_s14 + $0xb0] sm:$0xff] %vm384_vm0, %v3147_v47  ;;  %v3006_v2 = vpop.f32.mrf.mxu2 }
 0x4ac   : > { %v3007_v9 = vadd.f32 %v5174_v27, %v3006_v2 }
 0x4ae   : > { %v3052_v13 = vadd.f32 %v3800_v38, %v3007_v9 }
 0x4b0   : > { %vm3084_vm13 = vcmp.gt.f32.partialorder %v3052_v13, 0.0  ;;  %v3116_v18 = vmul.f32 0.1, %v3052_v13 }
 0x4b2   : > { %v3148_v44 = vsel %vm3084_vm13, %v3052_v13, %v3116_v18 }
 0x4b3   : > { %3180 = vst.msk [vmem:[%s5188_s14 + $0xb8] sm:$0xff] %vm384_vm0, %v3148_v44  ;;  %v3009_v29 = vpop.f32.mrf.mxu2 }
 0x4b4   : > { %v3010_v16 = vadd.f32 %v5174_v27, %v3009_v29 }
 0x4b6   : > { %v3053_v57 = vadd.f32 %v3801_v60, %v3010_v16 }
 0x4b8   : > { %vm3085_vm14 = vcmp.gt.f32.partialorder %v3053_v57, 0.0  ;;  %v3117_v61 = vmul.f32 0.1, %v3053_v57 }
 0x4ba   : > { %v3149_v11 = vsel %vm3085_vm14, %v3053_v57, %v3117_v61 }
 0x4bb   : > { %3181 = vst.msk [vmem:[%s5188_s14 + $0xc0] sm:$0xff] %vm384_vm0, %v3149_v11  ;;  %v3011_v12 = vpop.f32.mrf.mxu2 }
 0x4bc   : > { %v3012_v42 = vadd.f32 %v5174_v27, %v3011_v12 }
 0x4be   : > { %v3054_v7 = vadd.f32 %v3802_v58, %v3012_v42 }
 0x4c0   : > { %vm3086_vm15 = vcmp.gt.f32.partialorder %v3054_v7, 0.0  ;;  %v3118_v63 = vmul.f32 0.1, %v3054_v7 }
 0x4c2   : > { %v3150_v24 = vsel %vm3086_vm15, %v3054_v7, %v3118_v63 }
 0x4c3   : > { %3182 = vst.msk [vmem:[%s5188_s14 + $0xc8] sm:$0xff] %vm384_vm0, %v3150_v24  ;;  %v3014_v0 = vpop.f32.mrf.mxu2 }
 0x4c4   : > { %v3015_v10 = vadd.f32 %v5174_v27, %v3014_v0 }
 0x4c6   : > { %v3055_v17 = vadd.f32 %v3803_v40, %v3015_v10 }
 0x4c8   : > { %vm3087_vm1 = vcmp.gt.f32.partialorder %v3055_v17, 0.0  ;;  %v3119_v4 = vmul.f32 0.1, %v3055_v17 }
 0x4ca   : > { %v3151_v34 = vsel %vm3087_vm1, %v3055_v17, %v3119_v4 }
 0x4cb   : > { %3183 = vst.msk [vmem:[%s5188_s14 + $0xd0] sm:$0xff] %vm384_vm0, %v3151_v34  ;;  %v3016_v37 = vpop.f32.mrf.mxu2 }
 0x4cc   : > { %v3017_v39 = vadd.f32 %v5174_v27, %v3016_v37 }
 0x4ce   : > { %v3056_v56 = vadd.f32 %v3804_v31, %v3017_v39 }
 0x4d0   : > { %vm3088_vm2 = vcmp.gt.f32.partialorder %v3056_v56, 0.0  ;;  %v3120_v59 = vmul.f32 0.1, %v3056_v56 }
 0x4d2   : > { %v3152_v62 = vsel %vm3088_vm2, %v3056_v56, %v3120_v59 }
 0x4d3   : > { %3184 = vst.msk [vmem:[%s5188_s14 + $0xd8] sm:$0xff] %vm384_vm0, %v3152_v62  ;;  %v3019_v5 = vpop.f32.mrf.mxu2 }
 0x4d4   : > { %v3020_v35 = vadd.f32 %v5174_v27, %v3019_v5 }
 0x4d6   : > { %v3057_v55 = vadd.f32 %v3805_v15, %v3020_v35 }
 0x4d8   : > { %vm3089_vm3 = vcmp.gt.f32.partialorder %v3057_v55, 0.0  ;;  %v3121_v20 = vmul.f32 0.1, %v3057_v55 }
 0x4da   : > { %v3153_v28 = vsel %vm3089_vm3, %v3057_v55, %v3121_v20 }
 0x4db   : > { %3185 = vst.msk [vmem:[%s5188_s14 + $0xe0] sm:$0xff] %vm384_vm0, %v3153_v28  ;;  %v3021_v50 = vpop.f32.mrf.mxu2 }
 0x4dc   : > { %v3022_v51 = vadd.f32 %v5174_v27, %v3021_v50 }
 0x4de   : > { %v3058_v8 = vadd.f32 %v3806_v30, %v3022_v51 }
 0x4e0   : > { %vm3090_vm4 = vcmp.gt.f32.partialorder %v3058_v8, 0.0  ;;  %v3122_v22 = vmul.f32 0.1, %v3058_v8 }
 0x4e2   : > { %v3154_v1 = vsel %vm3090_vm4, %v3058_v8, %v3122_v22 }
 0x4e3   : > { %3186 = vst.msk [vmem:[%s5188_s14 + $0xe8] sm:$0xff] %vm384_vm0, %v3154_v1  ;;  %v3024_v26 = vpop.f32.mrf.mxu2 }
 0x4e4   : > { %v3025_v21 = vadd.f32 %v5174_v27, %v3024_v26 }
 0x4e6   : > { %v3059_v25 = vadd.f32 %v3807_v6, %v3025_v21 }
 0x4e8   : > { %vm3091_vm5 = vcmp.gt.f32.partialorder %v3059_v25, 0.0  ;;  %v3123_v23 = vmul.f32 0.1, %v3059_v25 }
 0x4ea   : > { %v3155_v3 = vsel %vm3091_vm5, %v3059_v25, %v3123_v23 }
 0x4eb   : > { %3187 = vst.msk [vmem:[%s5188_s14 + $0xf0] sm:$0xff] %vm384_vm0, %v3155_v3  ;;  %v3026_v41 = vpop.f32.mrf.mxu2 }
 0x4ec   : > { %v3027_v33 = vadd.f32 %v5174_v27, %v3026_v41 }
 0x4ee   : > { %v3060_v43 = vadd.f32 %v3808_v36, %v3027_v33 }
 0x4f0   : > { %vm3092_vm6 = vcmp.gt.f32.partialorder %v3060_v43, 0.0  ;;  %v3124_v54 = vmul.f32 0.1, %v3060_v43 }
 0x4f2   : > { %v3156_v46 = vsel %vm3092_vm6, %v3060_v43, %v3124_v54 }
 0x4f3   : > { %3188 = vst.msk [vmem:[%s5188_s14 + $0xf8] sm:$0xff] %vm384_vm0, %v3156_v46 }
 0x4f4 PF: > { %s19_s24 = sadd.s32 1, %s3913_s24  }
 0x4f5   : > { %p16_p7 = scmp.ge.s32.totalorder %s19_s24, 4  }
 0x4f7   :  { %18 = sbr.rel (!%p16_p7) target bundleno = 2 (0x2), region = 94 }
 0x4fc   :  { %3210 = vsyncpa [#allocation4], 1 }
 0x4fd   :  { %3212 = vsyncpa [#allocation4 + $0x1], 1 }
 0x4fe   :  { %3213 = vsyncpa [#allocation6], 1 }

</bundles_post_ra>
